<compile_context>
chip_gen: v7x
topology: tpu7x:2x2x1
jax: 0.10.0
libtpu: 0.0.40
codegen_flags: <defaults>
</compile_context>

<pallas_src>
import jax
import jax.numpy as jnp
from jax import lax
from jax.experimental import pallas as pl
from jax.experimental.pallas import tpu as pltpu

_EPS = 1e-5
_LANE = 128
_VMEM_LIMIT = 32 * 1024 * 1024  # explicit scoped-VMEM budget, safe on v5e/v6e/v7x


def _round_up(x, m):
    return ((x + m - 1) // m) * m


def _pick_tile_m(m, target=256):
    """Largest divisor of m that is a multiple of 8 and <= target (else m)."""
    if m <= target:
        return m
    for t in range(target, 7, -8):
        if m % t == 0:
            return t
    return m


# ----------------------------- Pallas kernels --------------------------------

def _bn_relu_conv1x1_kernel(x_ref, scale_ref, shift_ref, w_ref, b_ref,
                            y_ref, sum_ref, sq_ref):
    # x: (TM, Cin), scale/shift: (1, Cin), w: (Cin, C4p), b: (1, C4p)
    a = jnp.maximum(x_ref[...] * scale_ref[...] + shift_ref[...], 0.0)
    y = jnp.dot(a, w_ref[...], preferred_element_type=jnp.float32) + b_ref[...]
    y_ref[...] = y
    # Per-tile partials for BN2 batch statistics (row 0 of each 8-row stat block).
    c = y.shape[1]
    sum_ref[...] = jnp.broadcast_to(jnp.sum(y, axis=0, keepdims=True), (8, c))
    sq_ref[...] = jnp.broadcast_to(jnp.sum(y * y, axis=0, keepdims=True), (8, c))


def _bn_relu_conv3x3_kernel(y_ref, scale_ref, shift_ref, w_ref, b_ref,
                            o_ref, act_ref):
    # y_ref: (1, H+2, W+2, C4p) spatially padded activations of one image.
    hp2, wp2, c = y_ref.shape[1], y_ref.shape[2], y_ref.shape[3]
    h, w = hp2 - 2, wp2 - 2
    cout = o_ref.shape[3]

    yp = y_ref[0]                                                   # (H+2, W+2, C)
    act = jnp.maximum(yp * scale_ref[...] + shift_ref[...], 0.0)
    # BN/ReLU must be applied BEFORE spatial zero-padding; mask the halo back to 0.
    row = lax.broadcasted_iota(jnp.int32, (hp2, wp2, c), 0)
    col = lax.broadcasted_iota(jnp.int32, (hp2, wp2, c), 1)
    interior = (row >= 1) & (row <= h) & (col >= 1) & (col <= w)
    act_ref[...] = jnp.where(interior, act, 0.0)

    acc = jnp.zeros((h * w, cout), jnp.float32)
    for kh in range(3):
        for kw in range(3):
            tap = act_ref[kh:kh + h, kw:kw + w, :].reshape(h * w, c)
            acc = acc + jnp.dot(tap, w_ref[kh * 3 + kw],
                                preferred_element_type=jnp.float32)
    o_ref[0] = (acc + b_ref[...]).reshape(h, w, cout)


# ----------------------------- Kernel wrappers --------------------------------

def bn_relu_conv1x1(x, scale, shift, w, b, tm):
    m, cin = x.shape
    cout = w.shape[1]
    g = m // tm
    grid_spec = pltpu.PrefetchScalarGridSpec(
        num_scalar_prefetch=0,
        grid=(g,),
        in_specs=[
            pl.BlockSpec((tm, cin), lambda i: (i, 0)),
            pl.BlockSpec((1, cin), lambda i: (0, 0)),
            pl.BlockSpec((1, cin), lambda i: (0, 0)),
            pl.BlockSpec((cin, cout), lambda i: (0, 0)),   # resident weights
            pl.BlockSpec((1, cout), lambda i: (0, 0)),
        ],
        out_specs=[
            pl.BlockSpec((tm, cout), lambda i: (i, 0)),
            pl.BlockSpec((8, cout), lambda i: (i, 0)),
            pl.BlockSpec((8, cout), lambda i: (i, 0)),
        ],
    )
    return pl.pallas_call(
        _bn_relu_conv1x1_kernel,
        out_shape=(
            jax.ShapeDtypeStruct((m, cout), jnp.float32),
            jax.ShapeDtypeStruct((g * 8, cout), jnp.float32),
            jax.ShapeDtypeStruct((g * 8, cout), jnp.float32),
        ),
        grid_spec=grid_spec,
        compiler_params=pltpu.CompilerParams(
            dimension_semantics=("parallel",),
            vmem_limit_bytes=_VMEM_LIMIT,
        ),
    )(x, scale, shift, w, b)


def bn_relu_conv3x3(y_pad, scale, shift, w, b):
    n, hp2, wp2, c = y_pad.shape
    h, wd = hp2 - 2, wp2 - 2
    cout = w.shape[2]
    grid_spec = pltpu.PrefetchScalarGridSpec(
        num_scalar_prefetch=0,
        grid=(n,),
        in_specs=[
            pl.BlockSpec((1, hp2, wp2, c), lambda i: (i, 0, 0, 0)),
            pl.BlockSpec((1, c), lambda i: (0, 0)),
            pl.BlockSpec((1, c), lambda i: (0, 0)),
            pl.BlockSpec((9, c, cout), lambda i: (0, 0, 0)),   # resident weights
            pl.BlockSpec((1, cout), lambda i: (0, 0)),
        ],
        out_specs=pl.BlockSpec((1, h, wd, cout), lambda i: (i, 0, 0, 0)),
        scratch_shapes=[pltpu.VMEM((hp2, wp2, c), jnp.float32)],
    )
    return pl.pallas_call(
        _bn_relu_conv3x3_kernel,
        out_shape=jax.ShapeDtypeStruct((n, h, wd, cout), jnp.float32),
        grid_spec=grid_spec,
        compiler_params=pltpu.CompilerParams(
            dimension_semantics=("parallel",),
            vmem_limit_bytes=_VMEM_LIMIT,
        ),
    )(y_pad, scale, shift, w, b)


# ----------------------------- Model glue ------------------------------------

def dense_bottleneck_forward(x_nhwc, p):
    n, h, w, cin = x_nhwc.shape
    m = n * h * w
    xf = x_nhwc.reshape(m, cin)

    # --- BN1 batch statistics (training mode, biased variance) on the raw input ---
    mean1 = jnp.mean(xf, axis=0)
    var1 = jnp.mean(jnp.square(xf - mean1[None, :]), axis=0)
    scale1 = p["bn1_gamma"] / jnp.sqrt(var1 + _EPS)
    shift1 = p["bn1_beta"] - mean1 * scale1

    # --- Kernel 1: fused BN1 affine + ReLU + 1x1 conv + bias, tiled over M ---
    c4p = p["w1p"].shape[1]
    tm = _pick_tile_m(m)
    g = m // tm
    y, psum, psq = bn_relu_conv1x1(
        xf, scale1[None, :], shift1[None, :], p["w1p"], p["b1p"][None, :], tm)

    # --- BN2 statistics from per-tile partials (no extra full pass over y) ---
    ssum = psum.reshape(g, 8, c4p)[:, 0, :].sum(axis=0)
    ssq = psq.reshape(g, 8, c4p)[:, 0, :].sum(axis=0)
    mean2 = ssum / m
    var2 = jnp.maximum(ssq / m - jnp.square(mean2), 0.0)
    scale2 = p["bn2_gamma_p"] / jnp.sqrt(var2 + _EPS)
    shift2 = p["bn2_beta_p"] - mean2 * scale2

    # --- Kernel 2: fused BN2 affine + ReLU + 3x3 conv (9-tap accumulation) ---
    y_img = y.reshape(n, h, w, c4p)
    y_pad = jnp.pad(y_img, ((0, 0), (1, 1), (1, 1), (0, 0)))
    outp = bn_relu_conv3x3(
        y_pad, scale2[None, :], shift2[None, :], p["w2p"], p["b2p"][None, :])
    out_nhwc = outp[..., :p["cout"]]   # drop lane-padding channels (exact zeros)

    # Dense connection: cat([bottleneck(x), x], channel axis)
    return jnp.concatenate([out_nhwc, x_nhwc], axis=-1)


def dense_block_forward(x_nchw, params_list):
    x = jnp.transpose(x_nchw, (0, 2, 3, 1)).astype(jnp.float32)  # NCHW -> NHWC
    for p in params_list:
        x = dense_bottleneck_forward(x, p)
    return jnp.transpose(x, (0, 3, 1, 2))  # NHWC -> NCHW


# ----------------------------- Parameter init --------------------------------

def init_dense_block_params(key, in_channels, out_channels, num_layer):
    params_list = []
    for i in range(num_layer):
        cin = in_channels + i * out_channels
        c4 = 4 * out_channels
        c4p = _round_up(c4, _LANE)
        coutp = _round_up(out_channels, _LANE)
        key, k1, k2, k3, k4 = jax.random.split(key, 5)
        # Conv1x1 weight (4*out, cin, 1, 1) -> matmul form (cin, 4*out)
        w1 = jax.random.normal(k1, (cin, c4), jnp.float32) * 0.1
        b1 = jax.random.normal(k2, (c4,), jnp.float32) * 0.01
        # Conv3x3 weight (out, 4*out, 3, 3) -> tap layout (9, 4*out, out),
        # tap index = kh*3 + kw (matches in-kernel tap ordering).
        w2_conv = jax.random.normal(k3, (out_channels, c4, 3, 3), jnp.float32) * 0.1
        w2_taps = jnp.transpose(w2_conv, (2, 3, 1, 0)).reshape(9, c4, out_channels)
        b2 = jax.random.normal(k4, (out_channels,), jnp.float32) * 0.01

        # Zero-pad output channel dims up to the 128-lane width (lane-dense stores,
        # full-width MXU contraction in the 3x3 conv); padded channels stay exact
        # zeros through BN2/ReLU/conv and are sliced off in the wrapper.
        w1p = jnp.zeros((cin, c4p), jnp.float32).at[:, :c4].set(w1)
        b1p = jnp.zeros((c4p,), jnp.float32).at[:c4].set(b1)
        w2p = jnp.zeros((9, c4p, coutp), jnp.float32).at[:, :c4, :out_channels].set(w2_taps)
        b2p = jnp.zeros((coutp,), jnp.float32).at[:out_channels].set(b2)

        params_list.append(dict(
            bn1_gamma=jnp.ones((cin,), jnp.float32),
            bn1_beta=jnp.zeros((cin,), jnp.float32),
            w1p=w1p, b1p=b1p,
            bn2_gamma_p=jnp.ones((c4p,), jnp.float32),
            bn2_beta_p=jnp.zeros((c4p,), jnp.float32),
            w2p=w2p, b2p=b2p,
            cout=out_channels,
        ))
    return params_list


# ----------------------------- Main -------------------------------------------

if __name__ == "__main__":
    # Small shapes consistent with the module: batch=2, in_channels=4,
    # out_channels(growth)=4, num_layer=2, spatial 16x16.
    N, Cin, H, W = 2, 4, 16, 16
    out_channels, num_layer = 4, 2

    key = jax.random.PRNGKey(0)
    key, kx = jax.random.split(key)
    x = jax.random.normal(kx, (N, Cin, H, W), jnp.float32)

    params_list = init_dense_block_params(key, Cin, out_channels, num_layer)

    fwd = jax.jit(lambda xx: dense_block_forward(xx, params_list))
    y = fwd(x)
    jax.block_until_ready(y)

    expected_channels = Cin + num_layer * out_channels
    assert y.shape == (N, expected_channels, H, W), y.shape
    assert y.dtype == jnp.float32
    assert bool(jnp.all(jnp.isfinite(y)))

    print("KERNEL_OK")
</pallas_src>

<mosaic_0001>
module attributes {stable_mosaic.version = 11 : i64} {
  func.func @_bn_relu_conv1x1_kernel(%arg0: i32, %arg1: memref<256x4xf32, #tpu.memory_space<vmem>>, %arg2: memref<1x4xf32, #tpu.memory_space<vmem>>, %arg3: memref<1x4xf32, #tpu.memory_space<vmem>>, %arg4: memref<4x128xf32, #tpu.memory_space<vmem>>, %arg5: memref<1x128xf32, #tpu.memory_space<vmem>>, %arg6: memref<256x128xf32, #tpu.memory_space<vmem>>, %arg7: memref<8x128xf32, #tpu.memory_space<vmem>>, %arg8: memref<8x128xf32, #tpu.memory_space<vmem>>) attributes {dimension_semantics = [#tpu.dimension_semantics<parallel>], iteration_bounds = array<i64: 2>, scalar_prefetch = 0 : i64, scratch_operands = 0 : i64, tpu.core_type = #tpu.core_type<tc>, window_params = [{transform_indices = @transform_0, window_bounds = array<i64: 256, 4>}, {pipeline_mode = #tpu.pipeline_mode<synchronous>, transform_indices = @transform_1, window_bounds = array<i64: 1, 4>}, {pipeline_mode = #tpu.pipeline_mode<synchronous>, transform_indices = @transform_2, window_bounds = array<i64: 1, 4>}, {pipeline_mode = #tpu.pipeline_mode<synchronous>, transform_indices = @transform_3, window_bounds = array<i64: 4, 128>}, {pipeline_mode = #tpu.pipeline_mode<synchronous>, transform_indices = @transform_4, window_bounds = array<i64: 1, 128>}, {transform_indices = @transform_5, window_bounds = array<i64: 256, 128>}, {transform_indices = @transform_6, window_bounds = array<i64: 8, 128>}, {transform_indices = @transform_7, window_bounds = array<i64: 8, 128>}]} {
    %c0 = arith.constant 0 : index
    %c0_0 = arith.constant 0 : index
    %0 = vector.load %arg1[%c0, %c0_0] : memref<256x4xf32, #tpu.memory_space<vmem>>, vector<256x4xf32>
    %c0_1 = arith.constant 0 : index
    %c0_2 = arith.constant 0 : index
    %1 = vector.load %arg2[%c0_1, %c0_2] : memref<1x4xf32, #tpu.memory_space<vmem>>, vector<1x4xf32>
    %2 = vector.broadcast %1 : vector<1x4xf32> to vector<256x4xf32>
    %3 = arith.mulf %0, %2 : vector<256x4xf32>
    %c0_3 = arith.constant 0 : index
    %c0_4 = arith.constant 0 : index
    %4 = vector.load %arg3[%c0_3, %c0_4] : memref<1x4xf32, #tpu.memory_space<vmem>>, vector<1x4xf32>
    %5 = vector.broadcast %4 : vector<1x4xf32> to vector<256x4xf32>
    %6 = arith.addf %3, %5 : vector<256x4xf32>
    %cst = arith.constant 0.000000e+00 : f32
    %7 = vector.broadcast %cst : f32 to vector<256x4xf32>
    %8 = arith.maximumf %6, %7 : vector<256x4xf32>
    %c0_5 = arith.constant 0 : index
    %c0_6 = arith.constant 0 : index
    %9 = vector.load %arg4[%c0_5, %c0_6] : memref<4x128xf32, #tpu.memory_space<vmem>>, vector<4x128xf32>
    %cst_7 = arith.constant dense<0.000000e+00> : vector<256x128xf32>
    %10 = tpu.matmul %8, %9, %cst_7 {dimension_numbers = #tpu.dot_dimension_numbers<[1], [0], [0], [1], [0, 0, 1, 1], [], []>} : vector<256x4xf32>, vector<4x128xf32>, vector<256x128xf32> -> vector<256x128xf32>
    %c0_8 = arith.constant 0 : index
    %c0_9 = arith.constant 0 : index
    %11 = vector.load %arg5[%c0_8, %c0_9] : memref<1x128xf32, #tpu.memory_space<vmem>>, vector<1x128xf32>
    %12 = vector.broadcast %11 : vector<1x128xf32> to vector<256x128xf32>
    %13 = arith.addf %10, %12 : vector<256x128xf32>
    %c0_10 = arith.constant 0 : index
    %c0_11 = arith.constant 0 : index
    %14 = vector.load %arg6[%c0_10, %c0_11] : memref<256x128xf32, #tpu.memory_space<vmem>>, vector<256x128xf32>
    tpu.vector_store %arg6[%c0_10, %c0_11], %13 {strides = array<i32>} : memref<256x128xf32, #tpu.memory_space<vmem>>, vector<256x128xf32>,
    %cst_12 = arith.constant dense<0.000000e+00> : vector<128xf32>
    %15 = vector.multi_reduction <add>, %13, %cst_12 [0] : vector<256x128xf32> to vector<128xf32>
    %16 = vector.shape_cast %15 : vector<128xf32> to vector<1x128xf32>
    %17 = vector.shape_cast %16 : vector<1x128xf32> to vector<1x128xf32>
    %18 = vector.broadcast %17 : vector<1x128xf32> to vector<8x128xf32>
    %c0_13 = arith.constant 0 : index
    %c0_14 = arith.constant 0 : index
    %19 = vector.load %arg7[%c0_13, %c0_14] : memref<8x128xf32, #tpu.memory_space<vmem>>, vector<8x128xf32>
    tpu.vector_store %arg7[%c0_13, %c0_14], %18 {strides = array<i32>} : memref<8x128xf32, #tpu.memory_space<vmem>>, vector<8x128xf32>,
    %20 = arith.mulf %13, %13 : vector<256x128xf32>
    %cst_15 = arith.constant dense<0.000000e+00> : vector<128xf32>
    %21 = vector.multi_reduction <add>, %20, %cst_15 [0] : vector<256x128xf32> to vector<128xf32>
    %22 = vector.shape_cast %21 : vector<128xf32> to vector<1x128xf32>
    %23 = vector.shape_cast %22 : vector<1x128xf32> to vector<1x128xf32>
    %24 = vector.broadcast %23 : vector<1x128xf32> to vector<8x128xf32>
    %c0_16 = arith.constant 0 : index
    %c0_17 = arith.constant 0 : index
    %25 = vector.load %arg8[%c0_16, %c0_17] : memref<8x128xf32, #tpu.memory_space<vmem>>, vector<8x128xf32>
    tpu.vector_store %arg8[%c0_16, %c0_17], %24 {strides = array<i32>} : memref<8x128xf32, #tpu.memory_space<vmem>>, vector<8x128xf32>,
    return
  }
  func.func @transform_0(%arg0: i32) -> (i32, i32) {
    %c0_i32 = arith.constant 0 : i32
    %c0_i32_0 = arith.constant 0 : i32
    return %arg0, %c0_i32 : i32, i32
  }
  func.func @transform_1(%arg0: i32) -> (i32, i32) {
    %c0_i32 = arith.constant 0 : i32
    %c0_i32_0 = arith.constant 0 : i32
    %c0_i32_1 = arith.constant 0 : i32
    return %c0_i32, %c0_i32_0 : i32, i32
  }
  func.func @transform_2(%arg0: i32) -> (i32, i32) {
    %c0_i32 = arith.constant 0 : i32
    %c0_i32_0 = arith.constant 0 : i32
    %c0_i32_1 = arith.constant 0 : i32
    return %c0_i32, %c0_i32_0 : i32, i32
  }
  func.func @transform_3(%arg0: i32) -> (i32, i32) {
    %c0_i32 = arith.constant 0 : i32
    %c0_i32_0 = arith.constant 0 : i32
    %c0_i32_1 = arith.constant 0 : i32
    return %c0_i32, %c0_i32_0 : i32, i32
  }
  func.func @transform_4(%arg0: i32) -> (i32, i32) {
    %c0_i32 = arith.constant 0 : i32
    %c0_i32_0 = arith.constant 0 : i32
    %c0_i32_1 = arith.constant 0 : i32
    return %c0_i32, %c0_i32_0 : i32, i32
  }
  func.func @transform_5(%arg0: i32) -> (i32, i32) {
    %c0_i32 = arith.constant 0 : i32
    %c0_i32_0 = arith.constant 0 : i32
    return %arg0, %c0_i32 : i32, i32
  }
  func.func @transform_6(%arg0: i32) -> (i32, i32) {
    %c0_i32 = arith.constant 0 : i32
    %c0_i32_0 = arith.constant 0 : i32
    return %arg0, %c0_i32 : i32, i32
  }
  func.func @transform_7(%arg0: i32) -> (i32, i32) {
    %c0_i32 = arith.constant 0 : i32
    %c0_i32_0 = arith.constant 0 : i32
    return %arg0, %c0_i32 : i32, i32
  }
}

module attributes {stable_mosaic.version = 11 : i64} {
  func.func @_bn_relu_conv3x3_kernel(%arg0: i32, %arg1: memref<1x18x18x128xf32, #tpu.memory_space<vmem>>, %arg2: memref<1x128xf32, #tpu.memory_space<vmem>>, %arg3: memref<1x128xf32, #tpu.memory_space<vmem>>, %arg4: memref<9x128x128xf32, #tpu.memory_space<vmem>>, %arg5: memref<1x128xf32, #tpu.memory_space<vmem>>, %arg6: memref<1x16x16x128xf32, #tpu.memory_space<vmem>>, %arg7: memref<18x18x128xf32, #tpu.memory_space<vmem>>) attributes {dimension_semantics = [#tpu.dimension_semantics<parallel>], iteration_bounds = array<i64: 2>, scalar_prefetch = 0 : i64, scratch_operands = 1 : i64, tpu.core_type = #tpu.core_type<tc>, window_params = [{transform_indices = @transform_0, window_bounds = array<i64: 1, 18, 18, 128>}, {pipeline_mode = #tpu.pipeline_mode<synchronous>, transform_indices = @transform_1, window_bounds = array<i64: 1, 128>}, {pipeline_mode = #tpu.pipeline_mode<synchronous>, transform_indices = @transform_2, window_bounds = array<i64: 1, 128>}, {pipeline_mode = #tpu.pipeline_mode<synchronous>, transform_indices = @transform_3, window_bounds = array<i64: 9, 128, 128>}, {pipeline_mode = #tpu.pipeline_mode<synchronous>, transform_indices = @transform_4, window_bounds = array<i64: 1, 128>}, {transform_indices = @transform_5, window_bounds = array<i64: 1, 16, 16, 128>}]} {
    %c0 = arith.constant 0 : index
    %c0_0 = arith.constant 0 : index
    %c0_1 = arith.constant 0 : index
    %c0_2 = arith.constant 0 : index
    %0 = vector.load %arg1[%c0, %c0_0, %c0_1, %c0_2] : memref<1x18x18x128xf32, #tpu.memory_space<vmem>>, vector<1x18x18x128xf32>
    %1 = vector.shape_cast %0 : vector<1x18x18x128xf32> to vector<18x18x128xf32>
    %c0_3 = arith.constant 0 : index
    %c0_4 = arith.constant 0 : index
    %2 = vector.load %arg2[%c0_3, %c0_4] : memref<1x128xf32, #tpu.memory_space<vmem>>, vector<1x128xf32>
    %3 = vector.shape_cast %2 : vector<1x128xf32> to vector<1x1x128xf32>
    %4 = vector.broadcast %3 : vector<1x1x128xf32> to vector<18x18x128xf32>
    %5 = arith.mulf %1, %4 : vector<18x18x128xf32>
    %c0_5 = arith.constant 0 : index
    %c0_6 = arith.constant 0 : index
    %6 = vector.load %arg3[%c0_5, %c0_6] : memref<1x128xf32, #tpu.memory_space<vmem>>, vector<1x128xf32>
    %7 = vector.shape_cast %6 : vector<1x128xf32> to vector<1x1x128xf32>
    %8 = vector.broadcast %7 : vector<1x1x128xf32> to vector<18x18x128xf32>
    %9 = arith.addf %5, %8 : vector<18x18x128xf32>
    %cst = arith.constant 0.000000e+00 : f32
    %10 = vector.broadcast %cst : f32 to vector<18x18x128xf32>
    %11 = arith.maximumf %9, %10 : vector<18x18x128xf32>
    %12 = tpu.iota {dimensions = array<i32: 0>} : vector<18x18x128xi32>
    %13 = tpu.iota {dimensions = array<i32: 1>} : vector<18x18x128xi32>
    %c1_i32 = arith.constant 1 : i32
    %14 = vector.broadcast %c1_i32 : i32 to vector<18x18x128xi32>
    %15 = arith.cmpi sge, %12, %14 : vector<18x18x128xi32>
    %c16_i32 = arith.constant 16 : i32
    %16 = vector.broadcast %c16_i32 : i32 to vector<18x18x128xi32>
    %17 = arith.cmpi sle, %12, %16 : vector<18x18x128xi32>
    %18 = arith.andi %15, %17 : vector<18x18x128xi1>
    %c1_i32_7 = arith.constant 1 : i32
    %19 = vector.broadcast %c1_i32_7 : i32 to vector<18x18x128xi32>
    %20 = arith.cmpi sge, %13, %19 : vector<18x18x128xi32>
    %21 = arith.andi %18, %20 : vector<18x18x128xi1>
    %c16_i32_8 = arith.constant 16 : i32
    %22 = vector.broadcast %c16_i32_8 : i32 to vector<18x18x128xi32>
    %23 = arith.cmpi sle, %13, %22 : vector<18x18x128xi32>
    %24 = arith.andi %21, %23 : vector<18x18x128xi1>
    %cst_9 = arith.constant 0.000000e+00 : f32
    %25 = vector.broadcast %cst_9 : f32 to vector<18x18x128xf32>
    %26 = arith.select %24, %11, %25 : vector<18x18x128xi1>, vector<18x18x128xf32>
    %c0_10 = arith.constant 0 : index
    %c0_11 = arith.constant 0 : index
    %c0_12 = arith.constant 0 : index
    %27 = vector.load %arg7[%c0_10, %c0_11, %c0_12] : memref<18x18x128xf32, #tpu.memory_space<vmem>>, vector<18x18x128xf32>
    tpu.vector_store %arg7[%c0_10, %c0_11, %c0_12], %26 {strides = array<i32>} : memref<18x18x128xf32, #tpu.memory_space<vmem>>, vector<18x18x128xf32>,
    %cst_13 = arith.constant 0.000000e+00 : f32
    %28 = vector.broadcast %cst_13 : f32 to vector<256x128xf32>
    %c0_14 = arith.constant 0 : index
    %c0_15 = arith.constant 0 : index
    %c0_16 = arith.constant 0 : index
    %29 = vector.load %arg7[%c0_14, %c0_15, %c0_16] : memref<18x18x128xf32, #tpu.memory_space<vmem>>, vector<16x16x128xf32>
    %30 = vector.shape_cast %29 : vector<16x16x128xf32> to vector<256x128xf32>
    %c0_17 = arith.constant 0 : index
    %c0_18 = arith.constant 0 : index
    %c0_19 = arith.constant 0 : index
    %31 = vector.load %arg4[%c0_17, %c0_18, %c0_19] : memref<9x128x128xf32, #tpu.memory_space<vmem>>, vector<1x128x128xf32>
    %32 = vector.shape_cast %31 : vector<1x128x128xf32> to vector<128x128xf32>
    %cst_20 = arith.constant dense<0.000000e+00> : vector<256x128xf32>
    %33 = tpu.matmul %30, %32, %cst_20 {dimension_numbers = #tpu.dot_dimension_numbers<[1], [0], [0], [1], [0, 0, 1, 1], [], []>} : vector<256x128xf32>, vector<128x128xf32>, vector<256x128xf32> -> vector<256x128xf32>
    %34 = arith.addf %28, %33 : vector<256x128xf32>
    %c0_21 = arith.constant 0 : index
    %c1 = arith.constant 1 : index
    %c0_22 = arith.constant 0 : index
    %35 = vector.load %arg7[%c0_21, %c1, %c0_22] : memref<18x18x128xf32, #tpu.memory_space<vmem>>, vector<16x16x128xf32>
    %36 = vector.shape_cast %35 : vector<16x16x128xf32> to vector<256x128xf32>
    %c1_23 = arith.constant 1 : index
    %c0_24 = arith.constant 0 : index
    %c0_25 = arith.constant 0 : index
    %37 = vector.load %arg4[%c1_23, %c0_24, %c0_25] : memref<9x128x128xf32, #tpu.memory_space<vmem>>, vector<1x128x128xf32>
    %38 = vector.shape_cast %37 : vector<1x128x128xf32> to vector<128x128xf32>
    %cst_26 = arith.constant dense<0.000000e+00> : vector<256x128xf32>
    %39 = tpu.matmul %36, %38, %cst_26 {dimension_numbers = #tpu.dot_dimension_numbers<[1], [0], [0], [1], [0, 0, 1, 1], [], []>} : vector<256x128xf32>, vector<128x128xf32>, vector<256x128xf32> -> vector<256x128xf32>
    %40 = arith.addf %34, %39 : vector<256x128xf32>
    %c0_27 = arith.constant 0 : index
    %c2 = arith.constant 2 : index
    %c0_28 = arith.constant 0 : index
    %41 = vector.load %arg7[%c0_27, %c2, %c0_28] : memref<18x18x128xf32, #tpu.memory_space<vmem>>, vector<16x16x128xf32>
    %42 = vector.shape_cast %41 : vector<16x16x128xf32> to vector<256x128xf32>
    %c2_29 = arith.constant 2 : index
    %c0_30 = arith.constant 0 : index
    %c0_31 = arith.constant 0 : index
    %43 = vector.load %arg4[%c2_29, %c0_30, %c0_31] : memref<9x128x128xf32, #tpu.memory_space<vmem>>, vector<1x128x128xf32>
    %44 = vector.shape_cast %43 : vector<1x128x128xf32> to vector<128x128xf32>
    %cst_32 = arith.constant dense<0.000000e+00> : vector<256x128xf32>
    %45 = tpu.matmul %42, %44, %cst_32 {dimension_numbers = #tpu.dot_dimension_numbers<[1], [0], [0], [1], [0, 0, 1, 1], [], []>} : vector<256x128xf32>, vector<128x128xf32>, vector<256x128xf32> -> vector<256x128xf32>
    %46 = arith.addf %40, %45 : vector<256x128xf32>
    %c1_33 = arith.constant 1 : index
    %c0_34 = arith.constant 0 : index
    %c0_35 = arith.constant 0 : index
    %47 = vector.load %arg7[%c1_33, %c0_34, %c0_35] : memref<18x18x128xf32, #tpu.memory_space<vmem>>, vector<16x16x128xf32>
    %48 = vector.shape_cast %47 : vector<16x16x128xf32> to vector<256x128xf32>
    %c3 = arith.constant 3 : index
    %c0_36 = arith.constant 0 : index
    %c0_37 = arith.constant 0 : index
    %49 = vector.load %arg4[%c3, %c0_36, %c0_37] : memref<9x128x128xf32, #tpu.memory_space<vmem>>, vector<1x128x128xf32>
    %50 = vector.shape_cast %49 : vector<1x128x128xf32> to vector<128x128xf32>
    %cst_38 = arith.constant dense<0.000000e+00> : vector<256x128xf32>
    %51 = tpu.matmul %48, %50, %cst_38 {dimension_numbers = #tpu.dot_dimension_numbers<[1], [0], [0], [1], [0, 0, 1, 1], [], []>} : vector<256x128xf32>, vector<128x128xf32>, vector<256x128xf32> -> vector<256x128xf32>
    %52 = arith.addf %46, %51 : vector<256x128xf32>
    %c1_39 = arith.constant 1 : index
    %c1_40 = arith.constant 1 : index
    %c0_41 = arith.constant 0 : index
    %53 = vector.load %arg7[%c1_39, %c1_40, %c0_41] : memref<18x18x128xf32, #tpu.memory_space<vmem>>, vector<16x16x128xf32>
    %54 = vector.shape_cast %53 : vector<16x16x128xf32> to vector<256x128xf32>
    %c4 = arith.constant 4 : index
    %c0_42 = arith.constant 0 : index
    %c0_43 = arith.constant 0 : index
    %55 = vector.load %arg4[%c4, %c0_42, %c0_43] : memref<9x128x128xf32, #tpu.memory_space<vmem>>, vector<1x128x128xf32>
    %56 = vector.shape_cast %55 : vector<1x128x128xf32> to vector<128x128xf32>
    %cst_44 = arith.constant dense<0.000000e+00> : vector<256x128xf32>
    %57 = tpu.matmul %54, %56, %cst_44 {dimension_numbers = #tpu.dot_dimension_numbers<[1], [0], [0], [1], [0, 0, 1, 1], [], []>} : vector<256x128xf32>, vector<128x128xf32>, vector<256x128xf32> -> vector<256x128xf32>
    %58 = arith.addf %52, %57 : vector<256x128xf32>
    %c1_45 = arith.constant 1 : index
    %c2_46 = arith.constant 2 : index
    %c0_47 = arith.constant 0 : index
    %59 = vector.load %arg7[%c1_45, %c2_46, %c0_47] : memref<18x18x128xf32, #tpu.memory_space<vmem>>, vector<16x16x128xf32>
    %60 = vector.shape_cast %59 : vector<16x16x128xf32> to vector<256x128xf32>
    %c5 = arith.constant 5 : index
    %c0_48 = arith.constant 0 : index
    %c0_49 = arith.constant 0 : index
    %61 = vector.load %arg4[%c5, %c0_48, %c0_49] : memref<9x128x128xf32, #tpu.memory_space<vmem>>, vector<1x128x128xf32>
    %62 = vector.shape_cast %61 : vector<1x128x128xf32> to vector<128x128xf32>
    %cst_50 = arith.constant dense<0.000000e+00> : vector<256x128xf32>
    %63 = tpu.matmul %60, %62, %cst_50 {dimension_numbers = #tpu.dot_dimension_numbers<[1], [0], [0], [1], [0, 0, 1, 1], [], []>} : vector<256x128xf32>, vector<128x128xf32>, vector<256x128xf32> -> vector<256x128xf32>
    %64 = arith.addf %58, %63 : vector<256x128xf32>
    %c2_51 = arith.constant 2 : index
    %c0_52 = arith.constant 0 : index
    %c0_53 = arith.constant 0 : index
    %65 = vector.load %arg7[%c2_51, %c0_52, %c0_53] : memref<18x18x128xf32, #tpu.memory_space<vmem>>, vector<16x16x128xf32>
    %66 = vector.shape_cast %65 : vector<16x16x128xf32> to vector<256x128xf32>
    %c6 = arith.constant 6 : index
    %c0_54 = arith.constant 0 : index
    %c0_55 = arith.constant 0 : index
    %67 = vector.load %arg4[%c6, %c0_54, %c0_55] : memref<9x128x128xf32, #tpu.memory_space<vmem>>, vector<1x128x128xf32>
    %68 = vector.shape_cast %67 : vector<1x128x128xf32> to vector<128x128xf32>
    %cst_56 = arith.constant dense<0.000000e+00> : vector<256x128xf32>
    %69 = tpu.matmul %66, %68, %cst_56 {dimension_numbers = #tpu.dot_dimension_numbers<[1], [0], [0], [1], [0, 0, 1, 1], [], []>} : vector<256x128xf32>, vector<128x128xf32>, vector<256x128xf32> -> vector<256x128xf32>
    %70 = arith.addf %64, %69 : vector<256x128xf32>
    %c2_57 = arith.constant 2 : index
    %c1_58 = arith.constant 1 : index
    %c0_59 = arith.constant 0 : index
    %71 = vector.load %arg7[%c2_57, %c1_58, %c0_59] : memref<18x18x128xf32, #tpu.memory_space<vmem>>, vector<16x16x128xf32>
    %72 = vector.shape_cast %71 : vector<16x16x128xf32> to vector<256x128xf32>
    %c7 = arith.constant 7 : index
    %c0_60 = arith.constant 0 : index
    %c0_61 = arith.constant 0 : index
    %73 = vector.load %arg4[%c7, %c0_60, %c0_61] : memref<9x128x128xf32, #tpu.memory_space<vmem>>, vector<1x128x128xf32>
    %74 = vector.shape_cast %73 : vector<1x128x128xf32> to vector<128x128xf32>
    %cst_62 = arith.constant dense<0.000000e+00> : vector<256x128xf32>
    %75 = tpu.matmul %72, %74, %cst_62 {dimension_numbers = #tpu.dot_dimension_numbers<[1], [0], [0], [1], [0, 0, 1, 1], [], []>} : vector<256x128xf32>, vector<128x128xf32>, vector<256x128xf32> -> vector<256x128xf32>
    %76 = arith.addf %70, %75 : vector<256x128xf32>
    %c2_63 = arith.constant 2 : index
    %c2_64 = arith.constant 2 : index
    %c0_65 = arith.constant 0 : index
    %77 = vector.load %arg7[%c2_63, %c2_64, %c0_65] : memref<18x18x128xf32, #tpu.memory_space<vmem>>, vector<16x16x128xf32>
    %78 = vector.shape_cast %77 : vector<16x16x128xf32> to vector<256x128xf32>
    %c8 = arith.constant 8 : index
    %c0_66 = arith.constant 0 : index
    %c0_67 = arith.constant 0 : index
    %79 = vector.load %arg4[%c8, %c0_66, %c0_67] : memref<9x128x128xf32, #tpu.memory_space<vmem>>, vector<1x128x128xf32>
    %80 = vector.shape_cast %79 : vector<1x128x128xf32> to vector<128x128xf32>
    %cst_68 = arith.constant dense<0.000000e+00> : vector<256x128xf32>
    %81 = tpu.matmul %78, %80, %cst_68 {dimension_numbers = #tpu.dot_dimension_numbers<[1], [0], [0], [1], [0, 0, 1, 1], [], []>} : vector<256x128xf32>, vector<128x128xf32>, vector<256x128xf32> -> vector<256x128xf32>
    %82 = arith.addf %76, %81 : vector<256x128xf32>
    %c0_69 = arith.constant 0 : index
    %c0_70 = arith.constant 0 : index
    %83 = vector.load %arg5[%c0_69, %c0_70] : memref<1x128xf32, #tpu.memory_space<vmem>>, vector<1x128xf32>
    %84 = vector.broadcast %83 : vector<1x128xf32> to vector<256x128xf32>
    %85 = arith.addf %82, %84 : vector<256x128xf32>
    %86 = vector.shape_cast %85 : vector<256x128xf32> to vector<16x16x128xf32>
    %c0_71 = arith.constant 0 : index
    %c0_72 = arith.constant 0 : index
    %c0_73 = arith.constant 0 : index
    %c0_74 = arith.constant 0 : index
    %87 = vector.load %arg6[%c0_71, %c0_72, %c0_73, %c0_74] : memref<1x16x16x128xf32, #tpu.memory_space<vmem>>, vector<1x16x16x128xf32>
    %88 = vector.shape_cast %87 : vector<1x16x16x128xf32> to vector<16x16x128xf32>
    %89 = vector.shape_cast %86 : vector<16x16x128xf32> to vector<1x16x16x128xf32>
    tpu.vector_store %arg6[%c0_71, %c0_72, %c0_73, %c0_74], %89 {strides = array<i32>} : memref<1x16x16x128xf32, #tpu.memory_space<vmem>>, vector<1x16x16x128xf32>,
    return
  }
  func.func @transform_0(%arg0: i32) -> (i32, i32, i32, i32) {
    %c0_i32 = arith.constant 0 : i32
    %c0_i32_0 = arith.constant 0 : i32
    %c0_i32_1 = arith.constant 0 : i32
    %c0_i32_2 = arith.constant 0 : i32
    return %arg0, %c0_i32, %c0_i32_0, %c0_i32_1 : i32, i32, i32, i32
  }
  func.func @transform_1(%arg0: i32) -> (i32, i32) {
    %c0_i32 = arith.constant 0 : i32
    %c0_i32_0 = arith.constant 0 : i32
    %c0_i32_1 = arith.constant 0 : i32
    return %c0_i32, %c0_i32_0 : i32, i32
  }
  func.func @transform_2(%arg0: i32) -> (i32, i32) {
    %c0_i32 = arith.constant 0 : i32
    %c0_i32_0 = arith.constant 0 : i32
    %c0_i32_1 = arith.constant 0 : i32
    return %c0_i32, %c0_i32_0 : i32, i32
  }
  func.func @transform_3(%arg0: i32) -> (i32, i32, i32) {
    %c0_i32 = arith.constant 0 : i32
    %c0_i32_0 = arith.constant 0 : i32
    %c0_i32_1 = arith.constant 0 : i32
    %c0_i32_2 = arith.constant 0 : i32
    return %c0_i32, %c0_i32_0, %c0_i32_1 : i32, i32, i32
  }
  func.func @transform_4(%arg0: i32) -> (i32, i32) {
    %c0_i32 = arith.constant 0 : i32
    %c0_i32_0 = arith.constant 0 : i32
    %c0_i32_1 = arith.constant 0 : i32
    return %c0_i32, %c0_i32_0 : i32, i32
  }
  func.func @transform_5(%arg0: i32) -> (i32, i32, i32, i32) {
    %c0_i32 = arith.constant 0 : i32
    %c0_i32_0 = arith.constant 0 : i32
    %c0_i32_1 = arith.constant 0 : i32
    %c0_i32_2 = arith.constant 0 : i32
    return %arg0, %c0_i32, %c0_i32_0, %c0_i32_1 : i32, i32, i32, i32
  }
}

module attributes {stable_mosaic.version = 11 : i64} {
  func.func @_bn_relu_conv1x1_kernel(%arg0: i32, %arg1: memref<256x8xf32, #tpu.memory_space<vmem>>, %arg2: memref<1x8xf32, #tpu.memory_space<vmem>>, %arg3: memref<1x8xf32, #tpu.memory_space<vmem>>, %arg4: memref<8x128xf32, #tpu.memory_space<vmem>>, %arg5: memref<1x128xf32, #tpu.memory_space<vmem>>, %arg6: memref<256x128xf32, #tpu.memory_space<vmem>>, %arg7: memref<8x128xf32, #tpu.memory_space<vmem>>, %arg8: memref<8x128xf32, #tpu.memory_space<vmem>>) attributes {dimension_semantics = [#tpu.dimension_semantics<parallel>], iteration_bounds = array<i64: 2>, scalar_prefetch = 0 : i64, scratch_operands = 0 : i64, tpu.core_type = #tpu.core_type<tc>, window_params = [{transform_indices = @transform_0, window_bounds = array<i64: 256, 8>}, {pipeline_mode = #tpu.pipeline_mode<synchronous>, transform_indices = @transform_1, window_bounds = array<i64: 1, 8>}, {pipeline_mode = #tpu.pipeline_mode<synchronous>, transform_indices = @transform_2, window_bounds = array<i64: 1, 8>}, {pipeline_mode = #tpu.pipeline_mode<synchronous>, transform_indices = @transform_3, window_bounds = array<i64: 8, 128>}, {pipeline_mode = #tpu.pipeline_mode<synchronous>, transform_indices = @transform_4, window_bounds = array<i64: 1, 128>}, {transform_indices = @transform_5, window_bounds = array<i64: 256, 128>}, {transform_indices = @transform_6, window_bounds = array<i64: 8, 128>}, {transform_indices = @transform_7, window_bounds = array<i64: 8, 128>}]} {
    %c0 = arith.constant 0 : index
    %c0_0 = arith.constant 0 : index
    %0 = vector.load %arg1[%c0, %c0_0] : memref<256x8xf32, #tpu.memory_space<vmem>>, vector<256x8xf32>
    %c0_1 = arith.constant 0 : index
    %c0_2 = arith.constant 0 : index
    %1 = vector.load %arg2[%c0_1, %c0_2] : memref<1x8xf32, #tpu.memory_space<vmem>>, vector<1x8xf32>
    %2 = vector.broadcast %1 : vector<1x8xf32> to vector<256x8xf32>
    %3 = arith.mulf %0, %2 : vector<256x8xf32>
    %c0_3 = arith.constant 0 : index
    %c0_4 = arith.constant 0 : index
    %4 = vector.load %arg3[%c0_3, %c0_4] : memref<1x8xf32, #tpu.memory_space<vmem>>, vector<1x8xf32>
    %5 = vector.broadcast %4 : vector<1x8xf32> to vector<256x8xf32>
    %6 = arith.addf %3, %5 : vector<256x8xf32>
    %cst = arith.constant 0.000000e+00 : f32
    %7 = vector.broadcast %cst : f32 to vector<256x8xf32>
    %8 = arith.maximumf %6, %7 : vector<256x8xf32>
    %c0_5 = arith.constant 0 : index
    %c0_6 = arith.constant 0 : index
    %9 = vector.load %arg4[%c0_5, %c0_6] : memref<8x128xf32, #tpu.memory_space<vmem>>, vector<8x128xf32>
    %cst_7 = arith.constant dense<0.000000e+00> : vector<256x128xf32>
    %10 = tpu.matmul %8, %9, %cst_7 {dimension_numbers = #tpu.dot_dimension_numbers<[1], [0], [0], [1], [0, 0, 1, 1], [], []>} : vector<256x8xf32>, vector<8x128xf32>, vector<256x128xf32> -> vector<256x128xf32>
    %c0_8 = arith.constant 0 : index
    %c0_9 = arith.constant 0 : index
    %11 = vector.load %arg5[%c0_8, %c0_9] : memref<1x128xf32, #tpu.memory_space<vmem>>, vector<1x128xf32>
    %12 = vector.broadcast %11 : vector<1x128xf32> to vector<256x128xf32>
    %13 = arith.addf %10, %12 : vector<256x128xf32>
    %c0_10 = arith.constant 0 : index
    %c0_11 = arith.constant 0 : index
    %14 = vector.load %arg6[%c0_10, %c0_11] : memref<256x128xf32, #tpu.memory_space<vmem>>, vector<256x128xf32>
    tpu.vector_store %arg6[%c0_10, %c0_11], %13 {strides = array<i32>} : memref<256x128xf32, #tpu.memory_space<vmem>>, vector<256x128xf32>,
    %cst_12 = arith.constant dense<0.000000e+00> : vector<128xf32>
    %15 = vector.multi_reduction <add>, %13, %cst_12 [0] : vector<256x128xf32> to vector<128xf32>
    %16 = vector.shape_cast %15 : vector<128xf32> to vector<1x128xf32>
    %17 = vector.shape_cast %16 : vector<1x128xf32> to vector<1x128xf32>
    %18 = vector.broadcast %17 : vector<1x128xf32> to vector<8x128xf32>
    %c0_13 = arith.constant 0 : index
    %c0_14 = arith.constant 0 : index
    %19 = vector.load %arg7[%c0_13, %c0_14] : memref<8x128xf32, #tpu.memory_space<vmem>>, vector<8x128xf32>
    tpu.vector_store %arg7[%c0_13, %c0_14], %18 {strides = array<i32>} : memref<8x128xf32, #tpu.memory_space<vmem>>, vector<8x128xf32>,
    %20 = arith.mulf %13, %13 : vector<256x128xf32>
    %cst_15 = arith.constant dense<0.000000e+00> : vector<128xf32>
    %21 = vector.multi_reduction <add>, %20, %cst_15 [0] : vector<256x128xf32> to vector<128xf32>
    %22 = vector.shape_cast %21 : vector<128xf32> to vector<1x128xf32>
    %23 = vector.shape_cast %22 : vector<1x128xf32> to vector<1x128xf32>
    %24 = vector.broadcast %23 : vector<1x128xf32> to vector<8x128xf32>
    %c0_16 = arith.constant 0 : index
    %c0_17 = arith.constant 0 : index
    %25 = vector.load %arg8[%c0_16, %c0_17] : memref<8x128xf32, #tpu.memory_space<vmem>>, vector<8x128xf32>
    tpu.vector_store %arg8[%c0_16, %c0_17], %24 {strides = array<i32>} : memref<8x128xf32, #tpu.memory_space<vmem>>, vector<8x128xf32>,
    return
  }
  func.func @transform_0(%arg0: i32) -> (i32, i32) {
    %c0_i32 = arith.constant 0 : i32
    %c0_i32_0 = arith.constant 0 : i32
    return %arg0, %c0_i32 : i32, i32
  }
  func.func @transform_1(%arg0: i32) -> (i32, i32) {
    %c0_i32 = arith.constant 0 : i32
    %c0_i32_0 = arith.constant 0 : i32
    %c0_i32_1 = arith.constant 0 : i32
    return %c0_i32, %c0_i32_0 : i32, i32
  }
  func.func @transform_2(%arg0: i32) -> (i32, i32) {
    %c0_i32 = arith.constant 0 : i32
    %c0_i32_0 = arith.constant 0 : i32
    %c0_i32_1 = arith.constant 0 : i32
    return %c0_i32, %c0_i32_0 : i32, i32
  }
  func.func @transform_3(%arg0: i32) -> (i32, i32) {
    %c0_i32 = arith.constant 0 : i32
    %c0_i32_0 = arith.constant 0 : i32
    %c0_i32_1 = arith.constant 0 : i32
    return %c0_i32, %c0_i32_0 : i32, i32
  }
  func.func @transform_4(%arg0: i32) -> (i32, i32) {
    %c0_i32 = arith.constant 0 : i32
    %c0_i32_0 = arith.constant 0 : i32
    %c0_i32_1 = arith.constant 0 : i32
    return %c0_i32, %c0_i32_0 : i32, i32
  }
  func.func @transform_5(%arg0: i32) -> (i32, i32) {
    %c0_i32 = arith.constant 0 : i32
    %c0_i32_0 = arith.constant 0 : i32
    return %arg0, %c0_i32 : i32, i32
  }
  func.func @transform_6(%arg0: i32) -> (i32, i32) {
    %c0_i32 = arith.constant 0 : i32
    %c0_i32_0 = arith.constant 0 : i32
    return %arg0, %c0_i32 : i32, i32
  }
  func.func @transform_7(%arg0: i32) -> (i32, i32) {
    %c0_i32 = arith.constant 0 : i32
    %c0_i32_0 = arith.constant 0 : i32
    return %arg0, %c0_i32 : i32, i32
  }
}

</mosaic_0001>

<bundles_post_ra>
// kernel: _lambda_.4
= control target key start
LH: loop header
LB: loop body
LE: loop exit
PB: predicated region body
PF: predicated region fallthrough
CT: control target
= control target key end

     0   :  { %s1227_s24 = smov 0   ;;  %s1530_s0 = inlined_call_operand.vmem [shape: f32[512,4], index: 0, kind: input, shape index: {}]   ;;  %s1531_s1 = inlined_call_operand.vmem [shape: f32[1,4], index: 1, kind: input, shape index: {}]   ;;  %s1532_s2 = inlined_call_operand.vmem [shape: f32[1,4], index: 2, kind: input, shape index: {}]   ;;  %s1533_s3 = inlined_call_operand.vmem [shape: f32[4,128], index: 3, kind: input, shape index: {}]   ;;  %s1534_s4 = inlined_call_operand.vmem [shape: f32[1,128], index: 4, kind: input, shape index: {}]   ;;  %s1535_s5 = inlined_call_operand.vmem [shape: f32[512,128], index: 5, kind: output, shape index: {0}]   ;;  %s1536_s6 = inlined_call_operand.vmem [shape: f32[16,128], index: 6, kind: output, shape index: {1}]   ;;  %s1537_s7 = inlined_call_operand.vmem [shape: f32[16,128], index: 7, kind: output, shape index: {2}]  }
   0x1 LB: > { %s1233_s25 = sadd.s32 4294967295, %s1185_s24   ;;  %p1041_p0 = scmp.ge.s32.totalorder %s1185_s24, 1  ;;  %s1185_s24 = sphi %s1227_s24, %s18_s24  }
   0x2   : > { %p243_p1 = scmp.lt.s32.totalorder %s1185_s24, 3 }
   0x4   : > { %p244_p2 = pnand %p1041_p0, %p243_p1 }
   0x5   : > { %v445_v0 = vld [vmem:[%s1533_s3] sm:$0xf] (!%p244_p2)  ;;  %vm550_vm0 = vcmask (!%p244_p2), 1043456   ;;  %s1042_s28 = sshll.u32 (!%p244_p2), %s1233_s25, 5  ;;  %vm453_vm1 = vcmask (!%p244_p2), 31744   ;;  %p295_p4 = scmp.lt.s32.totalorder (!%p244_p2), %s1233_s25, 1 }
   0x6   : > { %247 = sbr.rel (%p244_p2) target bundleno = 318 (0x13e), region = 40  ;;  %1119 = vmatprep.subr.msk.mxu0 (!%p244_p2), %vm550_vm0, %v445_v0  ;;  %p284_p3 = scmp.lt.s32.totalorder (!%p244_p2), %s1042_s28, 63  ;;  %1169 = vmatprep.subr.msk.mxu1 (!%p244_p2), %vm550_vm0, %v445_v0  ;;  %v1247_v1 = vld [vmem:[%s1531_s1] ss:$0 sm:$0xff] (!%p244_p2) }
   0x7   : > { %1120 = vmatpush3.msk.msra.mxu0 (!%p244_p2), %vm550_vm0, %v445_v0  ;;  %1170 = vmatpush3.msk.msra.mxu1 (!%p244_p2), %vm550_vm0, %v445_v0  ;;  %v1259_v2 = vld [vmem:[%s1532_s2] ss:$0 sm:$0xff] (!%p244_p2) }
   0xd   : > { %s1539_s28 = smov (!%p284_p3, %s1042_s28), 63  ;;  %s1541_s25 = smov (!%p295_p4, %s1233_s25), 1 }
   0xe   : > { %s1043_s29 = sshll.u32 %s1539_s28, 3  ;;  %s1046_s19 = sshll.u32 %s1541_s25, 3 }
   0xf   : > { %s1254_s11 = scalar_lea.vmem %s1530_s0, %s1043_s29  ;;  %s1399_s18 = scalar_lea.vmem %s1535_s5, %s1043_s29 }
  0x10   : > { %v303_v3 = vld [vmem:[%s1254_s11] sm:$0xff]  ;;  %v304_v4 = vld [vmem:[%s1254_s11 + $0x8] sm:$0xff]  ;;  %v305_v5 = vld [vmem:[%s1254_s11 + $0x10] sm:$0xff]  ;;  %s298_s22 = scalar_lea.vmem %s1536_s6, %s1046_s19  ;;  %s302_s27 = scalar_lea.vmem %s1537_s7, %s1046_s19 }
  0x11   : > { %v342_v6 = vmul.f32 %v1247_v1, %v303_v3  ;;  %v343_v7 = vmul.f32 %v1247_v1, %v304_v4  ;;  %v344_v8 = vmul.f32 %v1247_v1, %v305_v5  ;;  %v306_v9 = vld [vmem:[%s1254_s11 + $0x18] sm:$0xff]  ;;  %v307_v10 = vld [vmem:[%s1254_s11 + $0x20] sm:$0xff]  ;;  %v308_v11 = vld [vmem:[%s1254_s11 + $0x28] sm:$0xff] }
  0x12   : > { %v345_v12 = vmul.f32 %v1247_v1, %v306_v9  ;;  %v346_v13 = vmul.f32 %v1247_v1, %v307_v10  ;;  %v309_v14 = vld [vmem:[%s1254_s11 + $0x30] sm:$0xff]  ;;  %v310_v15 = vld [vmem:[%s1254_s11 + $0x38] sm:$0xff]  ;;  %v347_v19 = vmul.f32 %v1247_v1, %v308_v11  ;;  %v311_v27 = vld [vmem:[%s1254_s11 + $0x40] sm:$0xff] }
  0x13   : > { %v381_v16 = vadd.f32 %v1259_v2, %v342_v6  ;;  %v382_v17 = vadd.f32 %v1259_v2, %v343_v7  ;;  %v383_v18 = vadd.f32 %v1259_v2, %v344_v8  ;;  %v348_v21 = vmul.f32 %v1247_v1, %v309_v14  ;;  %v312_v29 = vld [vmem:[%s1254_s11 + $0x48] sm:$0xff]  ;;  %v313_v34 = vld [vmem:[%s1254_s11 + $0x50] sm:$0xff]  ;;  %v314_v36 = vld [vmem:[%s1254_s11 + $0x58] sm:$0xff] }
  0x14   : > { %v384_v20 = vadd.f32 %v1259_v2, %v345_v12  ;;  %v349_v22 = vmul.f32 %v1247_v1, %v310_v15  ;;  %v385_v26 = vadd.f32 %v1259_v2, %v346_v13  ;;  %v386_v28 = vadd.f32 %v1259_v2, %v347_v19  ;;  %v319_v38 = vld [vmem:[%s1254_s11 + $0x80] sm:$0xff]  ;;  %v320_v39 = vld [vmem:[%s1254_s11 + $0x88] sm:$0xff]  ;;  %v321_v40 = vld [vmem:[%s1254_s11 + $0x90] sm:$0xff] }
  0x15   : > { %v413_v23 = vmax.f32 %v381_v16, 0.0  ;;  %v414_v24 = vmax.f32 %v382_v17, 0.0  ;;  %v415_v25 = vmax.f32 %v383_v18, 0.0  ;;  %v387_v31 = vadd.f32 %v1259_v2, %v348_v21  ;;  %v315_v42 = vld [vmem:[%s1254_s11 + $0x60] sm:$0xff]  ;;  %v322_v43 = vld [vmem:[%s1254_s11 + $0x98] sm:$0xff]  ;;  %v324_v53 = vld [vmem:[%s1254_s11 + $0xa8] sm:$0xff] }
  0x16   : > { %v416_v30 = vmax.f32 %v384_v20, 0.0  ;;  %v388_v32 = vadd.f32 %v1259_v2, %v349_v22  ;;  %v350_v33 = vmul.f32 %v1247_v1, %v311_v27  ;;  %v417_v35 = vmax.f32 %v385_v26, 0.0  ;;  %v323_v44 = vld [vmem:[%s1254_s11 + $0xa0] sm:$0xff]  ;;  %v325_v54 = vld [vmem:[%s1254_s11 + $0xb0] sm:$0xff]  ;;  %v316_v0 = vld [vmem:[%s1254_s11 + $0x68] sm:$0xff] }
  0x17   : > { %1121 = vmatprep.mubr.msk.f32.mxu0 %vm453_vm1, %v413_v23  ;;  %v351_v37 = vmul.f32 %v1247_v1, %v312_v29  ;;  %v352_v41 = vmul.f32 %v1247_v1, %v313_v34  ;;  %v418_v45 = vmax.f32 %v386_v28, 0.0  ;;  %v419_v46 = vmax.f32 %v387_v31, 0.0  ;;  %v317_v3 = vld [vmem:[%s1254_s11 + $0x70] sm:$0xff]  ;;  %v326_v11 = vld [vmem:[%s1254_s11 + $0xb8] sm:$0xff]  ;;  %v327_v12 = vld [vmem:[%s1254_s11 + $0xc0] sm:$0xff] }
  0x18   : > { %1122 = vmatmul.mubr.msk.f32.vlgmr.msra.gmra.mrb[0].mxu0 %vm453_vm1, %v414_v24  ;;  %v420_v47 = vmax.f32 %v388_v32, 0.0  ;;  %v389_v48 = vadd.f32 %v1259_v2, %v350_v33  ;;  %v353_v49 = vmul.f32 %v1247_v1, %v314_v36  ;;  %v358_v50 = vmul.f32 %v1247_v1, %v319_v38  ;;  %v318_v18 = vld [vmem:[%s1254_s11 + $0x78] sm:$0xff]  ;;  %v328_v26 = vld [vmem:[%s1254_s11 + $0xc8] sm:$0xff]  ;;  %v329_v27 = vld [vmem:[%s1254_s11 + $0xd0] sm:$0xff] }
  0x19   : > { %1124 = vmatprep.mubr.msk.f32.mxu0 %vm453_vm1, %v415_v25  ;;  %v359_v51 = vmul.f32 %v1247_v1, %v320_v39  ;;  %v360_v52 = vmul.f32 %v1247_v1, %v321_v40  ;;  %v390_v55 = vadd.f32 %v1259_v2, %v351_v37  ;;  %v354_v56 = vmul.f32 %v1247_v1, %v315_v42  ;;  %v330_v39 = vld [vmem:[%s1254_s11 + $0xd8] sm:$0xff]  ;;  %v331_v40 = vld [vmem:[%s1254_s11 + $0xe0] sm:$0xff] }
  0x1a   : > { %v361_v57 = vmul.f32 %v1247_v1, %v322_v43  ;;  %v362_v58 = vmul.f32 %v1247_v1, %v323_v44  ;;  %v391_v59 = vadd.f32 %v1259_v2, %v352_v41  ;;  %v397_v60 = vadd.f32 %v1259_v2, %v358_v50  ;;  %v332_v50 = vld [vmem:[%s1254_s11 + $0xe8] sm:$0xff] }
  0x1b   : > { %v398_v61 = vadd.f32 %v1259_v2, %v359_v51  ;;  %v399_v62 = vadd.f32 %v1259_v2, %v360_v52  ;;  %v421_v63 = vmax.f32 %v389_v48, 0.0  ;;  %v363_v5 = vmul.f32 %v1247_v1, %v324_v53  ;;  %v333_v51 = vld [vmem:[%s1254_s11 + $0xf0] sm:$0xff] }
  0x1c   : > { %1125 = vmatmul.mubr.msk.f32.gmra.mrb[2].mxu0 %vm453_vm1, %v416_v30  ;;  %v400_v4 = vadd.f32 %v1259_v2, %v361_v57  ;;  %v364_v6 = vmul.f32 %v1247_v1, %v325_v54  ;;  %v429_v7 = vmax.f32 %v397_v60, 0.0  ;;  %v401_v10 = vadd.f32 %v1259_v2, %v362_v58 }
  0x1d   : > { %1127 = vmatprep.mubr.msk.f32.mxu0 %vm453_vm1, %v417_v35  ;;  %v430_v8 = vmax.f32 %v398_v61, 0.0  ;;  %v431_v9 = vmax.f32 %v399_v62, 0.0  ;;  %v392_v13 = vadd.f32 %v1259_v2, %v353_v49  ;;  %v393_v14 = vadd.f32 %v1259_v2, %v354_v56 }
  0x1e   : > { %v355_v15 = vmul.f32 %v1247_v1, %v316_v0  ;;  %v356_v16 = vmul.f32 %v1247_v1, %v317_v3  ;;  %1145 = vmatprep.mubr.msk.f32.mxu1 %vm453_vm1, %v429_v7  ;;  %v422_v17 = vmax.f32 %v390_v55, 0.0  ;;  %v432_v19 = vmax.f32 %v400_v4, 0.0 }
  0x1f   : > { %1146 = vmatmul.mubr.msk.f32.vlgmr.msra.gmra.mrb[0].mxu1 %vm453_vm1, %v430_v8  ;;  %v402_v20 = vadd.f32 %v1259_v2, %v363_v5  ;;  %v365_v21 = vmul.f32 %v1247_v1, %v326_v11  ;;  %v423_v22 = vmax.f32 %v391_v59, 0.0  ;;  %v433_v23 = vmax.f32 %v401_v10, 0.0  ;;  %v334_v59 = vld [vmem:[%s1254_s11 + $0xf8] sm:$0xff] }
  0x20   : > { %1128 = vmatmul.mubr.msk.f32.gmra.mrb[4].mxu0 %vm453_vm1, %v418_v45  ;;  %1148 = vmatprep.mubr.msk.f32.mxu1 %vm453_vm1, %v431_v9  ;;  %v403_v24 = vadd.f32 %v1259_v2, %v364_v6  ;;  %v366_v25 = vmul.f32 %v1247_v1, %v327_v12  ;;  %v394_v28 = vadd.f32 %v1259_v2, %v355_v15  ;;  %v424_v31 = vmax.f32 %v392_v13, 0.0 }
  0x21   : > { %1130 = vmatprep.mubr.msk.f32.mxu0 %vm453_vm1, %v419_v46  ;;  %v395_v29 = vadd.f32 %v1259_v2, %v356_v16  ;;  %v357_v30 = vmul.f32 %v1247_v1, %v318_v18  ;;  %v434_v32 = vmax.f32 %v402_v20, 0.0  ;;  %v404_v33 = vadd.f32 %v1259_v2, %v365_v21 }
  0x22   : > { %v367_v34 = vmul.f32 %v1247_v1, %v328_v26  ;;  %v425_v35 = vmax.f32 %v393_v14, 0.0  ;;  %v435_v36 = vmax.f32 %v403_v24, 0.0  ;;  %v405_v37 = vadd.f32 %v1259_v2, %v366_v25 }
  0x23   : > { %1149 = vmatmul.mubr.msk.f32.gmra.mrb[2].mxu1 %vm453_vm1, %v432_v19  ;;  %v368_v38 = vmul.f32 %v1247_v1, %v329_v27  ;;  %v426_v41 = vmax.f32 %v394_v28, 0.0  ;;  %v396_v42 = vadd.f32 %v1259_v2, %v357_v30  ;;  %v436_v43 = vmax.f32 %v404_v33, 0.0 }
  0x24   : > { %1131 = vmatmul.mubr.msk.f32.gmra.mrb[6].mxu0 %vm453_vm1, %v420_v47  ;;  %1151 = vmatprep.mubr.msk.f32.mxu1 %vm453_vm1, %v433_v23  ;;  %v406_v44 = vadd.f32 %v1259_v2, %v367_v34  ;;  %v369_v45 = vmul.f32 %v1247_v1, %v330_v39  ;;  %v427_v46 = vmax.f32 %v395_v29, 0.0  ;;  %v437_v47 = vmax.f32 %v405_v37, 0.0 }
  0x25   : > { %1133 = vmatprep.mubr.msk.f32.mxu0 %vm453_vm1, %v421_v63  ;;  %v407_v48 = vadd.f32 %v1259_v2, %v368_v38  ;;  %v370_v49 = vmul.f32 %v1247_v1, %v331_v40  ;;  %v428_v52 = vmax.f32 %v396_v42, 0.0  ;;  %v371_v55 = vmul.f32 %v1247_v1, %v332_v50 }
  0x26   : > { %v438_v53 = vmax.f32 %v406_v44, 0.0  ;;  %v408_v54 = vadd.f32 %v1259_v2, %v369_v45  ;;  %v372_v58 = vmul.f32 %v1247_v1, %v333_v51  ;;  %v373_v62 = vmul.f32 %v1247_v1, %v334_v59  ;;  %v1392_v1 = vld [vmem:[%s1534_s4] ss:$0 sm:$0xff] }
  0x27   : > { %1152 = vmatmul.mubr.msk.f32.gmra.mrb[4].mxu1 %vm453_vm1, %v434_v32  ;;  %v439_v56 = vmax.f32 %v407_v48, 0.0  ;;  %v409_v57 = vadd.f32 %v1259_v2, %v370_v49  ;;  %v410_v61 = vadd.f32 %v1259_v2, %v371_v55 }
  0x28   : > { %1134 = vmatmul.mubr.msk.f32.gmra.mrb[8].mxu0 %vm453_vm1, %v422_v17  ;;  %1154 = vmatprep.mubr.msk.f32.mxu1 %vm453_vm1, %v435_v36  ;;  %v440_v60 = vmax.f32 %v408_v54, 0.0  ;;  %v411_v0 = vadd.f32 %v1259_v2, %v372_v58  ;;  %v412_v4 = vadd.f32 %v1259_v2, %v373_v62 }
  0x29   : > { %1136 = vmatprep.mubr.msk.f32.mxu0 %vm453_vm1, %v423_v22  ;;  %v441_v63 = vmax.f32 %v409_v57, 0.0  ;;  %v442_v3 = vmax.f32 %v410_v61, 0.0 }
  0x2a   : > { %v443_v5 = vmax.f32 %v411_v0, 0.0  ;;  %v444_v6 = vmax.f32 %v412_v4, 0.0 }
  0x2b   : > { %1155 = vmatmul.mubr.msk.f32.gmra.mrb[6].mxu1 %vm453_vm1, %v436_v43 }
  0x2c   : > { %1137 = vmatmul.mubr.msk.f32.gmra.mrb[10].mxu0 %vm453_vm1, %v424_v31  ;;  %1157 = vmatprep.mubr.msk.f32.mxu1 %vm453_vm1, %v437_v47 }
  0x2d   : > { %1139 = vmatprep.mubr.msk.f32.mxu0 %vm453_vm1, %v425_v35 }
  0x2f   : > { %1158 = vmatmul.mubr.msk.f32.gmra.mrb[8].mxu1 %vm453_vm1, %v438_v53 }
  0x30   : > { %1140 = vmatmul.mubr.msk.f32.gmra.mrb[12].mxu0 %vm453_vm1, %v426_v41  ;;  %1160 = vmatprep.mubr.msk.f32.mxu1 %vm453_vm1, %v439_v56 }
  0x31   : > { %1142 = vmatprep.mubr.msk.f32.mxu0 %vm453_vm1, %v427_v46 }
  0x33   : > { %1161 = vmatmul.mubr.msk.f32.gmra.mrb[10].mxu1 %vm453_vm1, %v440_v60 }
  0x34   : > { %1143 = vmatmul.mubr.msk.f32.gmra.mrb[14].mxu0 %vm453_vm1, %v428_v52  ;;  %1163 = vmatprep.mubr.msk.f32.mxu1 %vm453_vm1, %v441_v63 }
  0x37   : > { %1164 = vmatmul.mubr.msk.f32.gmra.mrb[12].mxu1 %vm453_vm1, %v442_v3 }
  0x38   : > { %1166 = vmatprep.mubr.msk.f32.mxu1 %vm453_vm1, %v443_v5 }
  0x3b   : > { %1167 = vmatmul.mubr.msk.f32.gmra.mrb[14].mxu1 %vm453_vm1, %v444_v6 }
  0xeb   : > { %v1123_v2 = vpop.f32.mrb[0].mxu0 }
  0xec   : > { %v626_v7 = vadd.f32 %v1123_v2, %v1392_v1  ;;  %v620_v8 = vpop.f32.mrb[1].mxu0 }
  0xed   : > { %v621_v9 = vadd.f32 %v1392_v1, %v620_v8 }
  0xee   : > { %780 = vst [vmem:[%s1399_s18 + $0x8] sm:$0xff] %v626_v7  ;;  %v850_v10 = vmul.f32 %v626_v7, %v626_v7 }
  0xef   : > { %779 = vst [vmem:[%s1399_s18] sm:$0xff] %v621_v9  ;;  %v811_v11 = vadd.f32 %v626_v7, %v621_v9  ;;  %v849_v12 = vmul.f32 %v621_v9, %v621_v9  ;;  %v1126_v13 = vpop.f32.mrb[2].mxu0 }
  0xf0   : > { %v636_v14 = vadd.f32 %v1126_v13, %v1392_v1  ;;  %v630_v15 = vpop.f32.mrb[3].mxu0 }
  0xf1   : > { %v881_v16 = vadd.f32 %v850_v10, %v849_v12  ;;  %v631_v17 = vadd.f32 %v1392_v1, %v630_v15 }
  0xf2   : > { %782 = vst [vmem:[%s1399_s18 + $0x18] sm:$0xff] %v636_v14  ;;  %v852_v23 = vmul.f32 %v636_v14, %v636_v14  ;;  %v1147_v31 = vpop.f32.mrb[0].mxu1 }
  0xf3   : > { %781 = vst [vmem:[%s1399_s18 + $0x10] sm:$0xff] %v631_v17  ;;  %v812_v18 = vadd.f32 %v811_v11, %v631_v17  ;;  %v851_v19 = vmul.f32 %v631_v17, %v631_v17  ;;  %v1129_v20 = vpop.f32.mrb[4].mxu0  ;;  %v1415_v35 = vadd.f32 %v1147_v31, %v1392_v1  ;;  %v700_v36 = vpop.f32.mrb[1].mxu1 }
  0xf4   : > { %v646_v21 = vadd.f32 %v1129_v20, %v1392_v1  ;;  %v640_v22 = vpop.f32.mrb[5].mxu0  ;;  %v1419_v40 = vadd.f32 %v1392_v1, %v700_v36 }
  0xf5   : > { %v882_v24 = vadd.f32 %v881_v16, %v851_v19  ;;  %v641_v25 = vadd.f32 %v1392_v1, %v640_v22  ;;  %v813_v26 = vadd.f32 %v812_v18, %v636_v14  ;;  %796 = vst [vmem:[%s1399_s18 + $0x88] sm:$0xff] %v1415_v35 }
  0xf6   : > { %784 = vst [vmem:[%s1399_s18 + $0x28] sm:$0xff] %v646_v21  ;;  %v854_v32 = vmul.f32 %v646_v21, %v646_v21  ;;  %795 = vst [vmem:[%s1399_s18 + $0x80] sm:$0xff] %v1419_v40  ;;  %v1150_v45 = vpop.f32.mrb[2].mxu1 }
  0xf7   : > { %783 = vst [vmem:[%s1399_s18 + $0x20] sm:$0xff] %v641_v25  ;;  %v814_v27 = vadd.f32 %v813_v26, %v641_v25  ;;  %v853_v28 = vmul.f32 %v641_v25, %v641_v25  ;;  %v883_v29 = vadd.f32 %v882_v24, %v852_v23  ;;  %v1132_v30 = vpop.f32.mrb[6].mxu0  ;;  %v1429_v49 = vadd.f32 %v1150_v45, %v1392_v1  ;;  %v710_v50 = vpop.f32.mrb[3].mxu1 }
  0xf8   : > { %v656_v33 = vadd.f32 %v1132_v30, %v1392_v1  ;;  %v650_v34 = vpop.f32.mrb[7].mxu0  ;;  %v1433_v54 = vadd.f32 %v1392_v1, %v710_v50 }
  0xf9   : > { %v884_v37 = vadd.f32 %v883_v29, %v853_v28  ;;  %v651_v38 = vadd.f32 %v1392_v1, %v650_v34  ;;  %v815_v39 = vadd.f32 %v814_v27, %v646_v21  ;;  %798 = vst [vmem:[%s1399_s18 + $0x98] sm:$0xff] %v1429_v49 }
  0xfa   : > { %786 = vst [vmem:[%s1399_s18 + $0x38] sm:$0xff] %v656_v33  ;;  %v856_v46 = vmul.f32 %v656_v33, %v656_v33  ;;  %797 = vst [vmem:[%s1399_s18 + $0x90] sm:$0xff] %v1433_v54  ;;  %v1153_v59 = vpop.f32.mrb[4].mxu1 }
  0xfb   : > { %785 = vst [vmem:[%s1399_s18 + $0x30] sm:$0xff] %v651_v38  ;;  %v816_v41 = vadd.f32 %v815_v39, %v651_v38  ;;  %v855_v42 = vmul.f32 %v651_v38, %v651_v38  ;;  %v885_v43 = vadd.f32 %v884_v37, %v854_v32  ;;  %v1135_v44 = vpop.f32.mrb[8].mxu0  ;;  %v1443_v63 = vadd.f32 %v1153_v59, %v1392_v1  ;;  %v720_v0 = vpop.f32.mrb[5].mxu1 }
  0xfc   : > { %v666_v47 = vadd.f32 %v1135_v44, %v1392_v1  ;;  %v660_v48 = vpop.f32.mrb[9].mxu0  ;;  %v1447_v6 = vadd.f32 %v1392_v1, %v720_v0  ;;  %v865_v39 = vmul.f32 %v1419_v40, %v1419_v40 }
  0xfd   : > { %v886_v51 = vadd.f32 %v885_v43, %v855_v42  ;;  %v661_v52 = vadd.f32 %v1392_v1, %v660_v48  ;;  %v817_v53 = vadd.f32 %v816_v41, %v656_v33  ;;  %800 = vst [vmem:[%s1399_s18 + $0xa8] sm:$0xff] %v1443_v63 }
  0xfe   : > { %788 = vst [vmem:[%s1399_s18 + $0x48] sm:$0xff] %v666_v47  ;;  %v858_v60 = vmul.f32 %v666_v47, %v666_v47  ;;  %799 = vst [vmem:[%s1399_s18 + $0xa0] sm:$0xff] %v1447_v6  ;;  %v1156_v10 = vpop.f32.mrb[6].mxu1 }
  0xff   : > { %787 = vst [vmem:[%s1399_s18 + $0x40] sm:$0xff] %v661_v52  ;;  %v818_v55 = vadd.f32 %v817_v53, %v661_v52  ;;  %v857_v56 = vmul.f32 %v661_v52, %v661_v52  ;;  %v887_v57 = vadd.f32 %v886_v51, %v856_v46  ;;  %v1138_v58 = vpop.f32.mrb[10].mxu0  ;;  %v1457_v14 = vadd.f32 %v1156_v10, %v1392_v1  ;;  %v730_v15 = vpop.f32.mrb[7].mxu1 }
 0x100   : > { %v676_v61 = vadd.f32 %v1138_v58, %v1392_v1  ;;  %v670_v62 = vpop.f32.mrb[11].mxu0  ;;  %v1461_v19 = vadd.f32 %v1392_v1, %v730_v15  ;;  %v866_v51 = vmul.f32 %v1415_v35, %v1415_v35 }
 0x101   : > { %v888_v3 = vadd.f32 %v887_v57, %v857_v56  ;;  %v671_v4 = vadd.f32 %v1392_v1, %v670_v62  ;;  %v819_v5 = vadd.f32 %v818_v55, %v666_v47  ;;  %802 = vst [vmem:[%s1399_s18 + $0xb8] sm:$0xff] %v1457_v14  ;;  %v867_v57 = vmul.f32 %v1433_v54, %v1433_v54 }
 0x102   : > { %790 = vst [vmem:[%s1399_s18 + $0x58] sm:$0xff] %v676_v61  ;;  %v860_v11 = vmul.f32 %v676_v61, %v676_v61  ;;  %801 = vst [vmem:[%s1399_s18 + $0xb0] sm:$0xff] %v1461_v19  ;;  %v1159_v24 = vpop.f32.mrb[8].mxu1  ;;  %v871_v10 = vmul.f32 %v1461_v19, %v1461_v19 }
 0x103   : > { %789 = vst [vmem:[%s1399_s18 + $0x50] sm:$0xff] %v671_v4  ;;  %v820_v2 = vadd.f32 %v819_v5, %v671_v4  ;;  %v859_v7 = vmul.f32 %v671_v4, %v671_v4  ;;  %v889_v8 = vadd.f32 %v888_v3, %v858_v60  ;;  %v1141_v9 = vpop.f32.mrb[12].mxu0  ;;  %v1471_v28 = vadd.f32 %v1159_v24, %v1392_v1  ;;  %v740_v29 = vpop.f32.mrb[9].mxu1 }
 0x104   : > { %v686_v12 = vadd.f32 %v1141_v9, %v1392_v1  ;;  %v680_v13 = vpop.f32.mrb[13].mxu0  ;;  %v741_v33 = vadd.f32 %v1392_v1, %v740_v29  ;;  %v869_v4 = vmul.f32 %v1447_v6, %v1447_v6 }
 0x105   : > { %v890_v16 = vadd.f32 %v889_v8, %v859_v7  ;;  %v681_v17 = vadd.f32 %v1392_v1, %v680_v13  ;;  %v821_v18 = vadd.f32 %v820_v2, %v676_v61  ;;  %804 = vst [vmem:[%s1399_s18 + $0xc8] sm:$0xff] %v1471_v28  ;;  %v868_v61 = vmul.f32 %v1429_v49, %v1429_v49 }
 0x106   : > { %792 = vst [vmem:[%s1399_s18 + $0x68] sm:$0xff] %v686_v12  ;;  %v862_v25 = vmul.f32 %v686_v12, %v686_v12  ;;  %803 = vst [vmem:[%s1399_s18 + $0xc0] sm:$0xff] %v741_v33  ;;  %v1162_v38 = vpop.f32.mrb[10].mxu1  ;;  %v870_v7 = vmul.f32 %v1443_v63, %v1443_v63  ;;  %v873_v13 = vmul.f32 %v741_v33, %v741_v33 }
 0x107   : > { %791 = vst [vmem:[%s1399_s18 + $0x60] sm:$0xff] %v681_v17  ;;  %v822_v20 = vadd.f32 %v821_v18, %v681_v17  ;;  %v861_v21 = vmul.f32 %v681_v17, %v681_v17  ;;  %v891_v22 = vadd.f32 %v890_v16, %v860_v11  ;;  %v1144_v23 = vpop.f32.mrb[14].mxu0  ;;  %v756_v41 = vadd.f32 %v1162_v38, %v1392_v1  ;;  %v750_v42 = vpop.f32.mrb[11].mxu1 }
 0x108   : > { %v696_v26 = vadd.f32 %v1144_v23, %v1392_v1  ;;  %v690_v27 = vpop.f32.mrb[15].mxu0  ;;  %v751_v46 = vadd.f32 %v1392_v1, %v750_v42  ;;  %v874_v17 = vmul.f32 %v1471_v28, %v1471_v28 }
 0x109   : > { %v892_v30 = vadd.f32 %v891_v22, %v861_v21  ;;  %v691_v31 = vadd.f32 %v1392_v1, %v690_v27  ;;  %v823_v32 = vadd.f32 %v822_v20, %v686_v12  ;;  %806 = vst [vmem:[%s1399_s18 + $0xd8] sm:$0xff] %v756_v41  ;;  %v876_v22 = vmul.f32 %v756_v41, %v756_v41 }
 0x10a   : > { %794 = vst [vmem:[%s1399_s18 + $0x78] sm:$0xff] %v696_v26  ;;  %v864_v43 = vmul.f32 %v696_v26, %v696_v26  ;;  %805 = vst [vmem:[%s1399_s18 + $0xd0] sm:$0xff] %v751_v46  ;;  %v1165_v50 = vpop.f32.mrb[12].mxu1  ;;  %v875_v20 = vmul.f32 %v751_v46, %v751_v46 }
 0x10b   : > { %793 = vst [vmem:[%s1399_s18 + $0x70] sm:$0xff] %v691_v31  ;;  %v824_v34 = vadd.f32 %v823_v32, %v691_v31  ;;  %v863_v36 = vmul.f32 %v691_v31, %v691_v31  ;;  %v893_v37 = vadd.f32 %v892_v30, %v862_v25  ;;  %v766_v52 = vadd.f32 %v1165_v50, %v1392_v1  ;;  %v760_v53 = vpop.f32.mrb[13].mxu1 }
 0x10c   : > { %v761_v58 = vadd.f32 %v1392_v1, %v760_v53 }
 0x10d   : > { %v894_v44 = vadd.f32 %v893_v37, %v863_v36  ;;  %v825_v45 = vadd.f32 %v824_v34, %v696_v26  ;;  %808 = vst [vmem:[%s1399_s18 + $0xe8] sm:$0xff] %v766_v52  ;;  %v878_v27 = vmul.f32 %v766_v52, %v766_v52 }
 0x10e   : > { %807 = vst [vmem:[%s1399_s18 + $0xe0] sm:$0xff] %v761_v58  ;;  %v1168_v60 = vpop.f32.mrb[14].mxu1  ;;  %v877_v25 = vmul.f32 %v761_v58, %v761_v58 }
 0x10f   : > { %v826_v47 = vadd.f32 %v825_v45, %v1419_v40  ;;  %v895_v48 = vadd.f32 %v894_v44, %v864_v43  ;;  %v776_v62 = vadd.f32 %v1168_v60, %v1392_v1  ;;  %v770_v0 = vpop.f32.mrb[15].mxu1 }
 0x110   : > { %v771_v5 = vadd.f32 %v1392_v1, %v770_v0  ;;  %v872_v1 = vmul.f32 %v1457_v14, %v1457_v14 }
 0x111   : > { %v896_v55 = vadd.f32 %v895_v48, %v865_v39  ;;  %v827_v56 = vadd.f32 %v826_v47, %v1415_v35  ;;  %810 = vst [vmem:[%s1399_s18 + $0xf8] sm:$0xff] %v776_v62  ;;  %v880_v34 = vmul.f32 %v776_v62, %v776_v62 }
 0x112   : > { %809 = vst [vmem:[%s1399_s18 + $0xf0] sm:$0xff] %v771_v5  ;;  %v879_v31 = vmul.f32 %v771_v5, %v771_v5 }
 0x113   : > { %v828_v40 = vadd.f32 %v827_v56, %v1433_v54  ;;  %v897_v59 = vadd.f32 %v896_v55, %v866_v51 }
 0x115   : > { %v898_v3 = vadd.f32 %v897_v59, %v867_v57  ;;  %v829_v35 = vadd.f32 %v828_v40, %v1429_v49 }
 0x117   : > { %v830_v54 = vadd.f32 %v829_v35, %v1447_v6  ;;  %v899_v2 = vadd.f32 %v898_v3, %v868_v61 }
 0x119   : > { %v900_v8 = vadd.f32 %v899_v2, %v869_v4  ;;  %v831_v9 = vadd.f32 %v830_v54, %v1443_v63 }
 0x11b   : > { %v832_v49 = vadd.f32 %v831_v9, %v1461_v19  ;;  %v901_v11 = vadd.f32 %v900_v8, %v870_v7 }
 0x11d   : > { %v902_v12 = vadd.f32 %v901_v11, %v871_v10  ;;  %v833_v6 = vadd.f32 %v832_v49, %v1457_v14 }
 0x11f   : > { %v834_v15 = vadd.f32 %v833_v6, %v741_v33  ;;  %v903_v16 = vadd.f32 %v902_v12, %v872_v1 }
 0x121   : > { %v904_v18 = vadd.f32 %v903_v16, %v873_v13  ;;  %v835_v63 = vadd.f32 %v834_v15, %v1471_v28 }
 0x123   : > { %v836_v21 = vadd.f32 %v835_v63, %v751_v46  ;;  %v905_v19 = vadd.f32 %v904_v18, %v874_v17 }
 0x125   : > { %v906_v23 = vadd.f32 %v905_v19, %v875_v20  ;;  %v837_v24 = vadd.f32 %v836_v21, %v756_v41 }
 0x127   : > { %v838_v26 = vadd.f32 %v837_v24, %v761_v58  ;;  %v907_v14 = vadd.f32 %v906_v23, %v876_v22 }
 0x129   : > { %v908_v29 = vadd.f32 %v907_v14, %v877_v25  ;;  %v839_v30 = vadd.f32 %v838_v26, %v766_v52 }
 0x12b   : > { %v840_v32 = vadd.f32 %v839_v30, %v771_v5  ;;  %v909_v33 = vadd.f32 %v908_v29, %v878_v27 }
 0x12d   : > { %v841_v28 = vadd.f32 %v840_v32, %v776_v62  ;;  %v910_v36 = vadd.f32 %v909_v33, %v879_v31 }
 0x12f   : > { %v842_v37 = vrot.slane %v841_v28, 4  ;;  %v911_v38 = vadd.f32 %v910_v36, %v880_v34 }
 0x131   : > { %v843_v39 = vadd.f32 %v842_v37, %v841_v28  ;;  %v912_v42 = vrot.slane %v911_v38, 4 }
 0x133   : > { %v844_v41 = vrot.slane %v843_v39, 2  ;;  %v913_v43 = vadd.f32 %v912_v42, %v911_v38 }
 0x135   : > { %v845_v44 = vadd.f32 %v844_v41, %v843_v39  ;;  %v914_v45 = vrot.slane %v913_v43, 2 }
 0x137   : > { %v846_v46 = vrot.slane %v845_v44, 1  ;;  %v915_v47 = vadd.f32 %v914_v45, %v913_v43 }
 0x139   : > { %v847_v48 = vadd.f32 %v846_v46, %v845_v44  ;;  %v916_v50 = vrot.slane %v915_v47, 1 }
 0x13b   : > { %848 = vst [vmem:[%s298_s22] sm:$0xff] %v847_v48  ;;  %v917_v51 = vadd.f32 %v916_v50, %v915_v47 }
 0x13d   : > { %918 = vst [vmem:[%s302_s27] sm:$0xff] %v917_v51 }
 0x13e PF: > { %s18_s24 = sadd.s32 1, %s1185_s24  }
 0x13f   : > { %p15_p5 = scmp.ge.s32.totalorder %s18_s24, 4  }
 0x141   :  { %17 = sbr.rel (!%p15_p5) target bundleno = 1 (0x1), region = 94 }

// kernel: _lambda_.6
= control target key start
LH: loop header
LB: loop body
LE: loop exit
PB: predicated region body
PF: predicated region fallthrough
CT: control target
= control target key end

     0   :  { %s1222_s24 = smov 0   ;;  %s1525_s0 = inlined_call_operand.vmem [shape: f32[512,8], index: 0, kind: input, shape index: {}]   ;;  %s1526_s1 = inlined_call_operand.vmem [shape: f32[1,8], index: 1, kind: input, shape index: {}]   ;;  %s1527_s2 = inlined_call_operand.vmem [shape: f32[1,8], index: 2, kind: input, shape index: {}]   ;;  %s1528_s3 = inlined_call_operand.vmem [shape: f32[8,128], index: 3, kind: input, shape index: {}]   ;;  %s1529_s4 = inlined_call_operand.vmem [shape: f32[1,128], index: 4, kind: input, shape index: {}]   ;;  %s1530_s5 = inlined_call_operand.vmem [shape: f32[512,128], index: 5, kind: output, shape index: {0}]   ;;  %s1531_s6 = inlined_call_operand.vmem [shape: f32[16,128], index: 6, kind: output, shape index: {1}]   ;;  %s1532_s7 = inlined_call_operand.vmem [shape: f32[16,128], index: 7, kind: output, shape index: {2}]  }
   0x1 LB: > { %s1228_s25 = sadd.s32 4294967295, %s1180_s24   ;;  %p1037_p0 = scmp.ge.s32.totalorder %s1180_s24, 1  ;;  %s1180_s24 = sphi %s1222_s24, %s18_s24  }
   0x2   : > { %p243_p1 = scmp.lt.s32.totalorder %s1180_s24, 3 }
   0x4   : > { %p244_p2 = pnand %p1037_p0, %p243_p1 }
   0x5   : > { %v445_v0 = vld [vmem:[%s1528_s3] sm:$0xff] (!%p244_p2)  ;;  %s1038_s28 = sshll.u32 (!%p244_p2), %s1228_s25, 5  ;;  %vm453_vm0 = vcmask (!%p244_p2), 64512   ;;  %p295_p4 = scmp.lt.s32.totalorder (!%p244_p2), %s1228_s25, 1 }
   0x6   : > { %247 = sbr.rel (%p244_p2) target bundleno = 318 (0x13e), region = 40  ;;  %1114 = vmatprep.subr.mxu0 (!%p244_p2), %v445_v0  ;;  %p284_p3 = scmp.lt.s32.totalorder (!%p244_p2), %s1038_s28, 63  ;;  %1164 = vmatprep.subr.mxu1 (!%p244_p2), %v445_v0  ;;  %v1242_v1 = vld [vmem:[%s1526_s1] ss:$0 sm:$0xff] (!%p244_p2) }
   0x7   : > { %1115 = vmatpush3.msra.mxu0 (!%p244_p2), %v445_v0  ;;  %1165 = vmatpush3.msra.mxu1 (!%p244_p2), %v445_v0  ;;  %v1254_v2 = vld [vmem:[%s1527_s2] ss:$0 sm:$0xff] (!%p244_p2) }
   0xd   : > { %s1534_s28 = smov (!%p284_p3, %s1038_s28), 63  ;;  %s1536_s25 = smov (!%p295_p4, %s1228_s25), 1 }
   0xe   : > { %s1039_s29 = sshll.u32 %s1534_s28, 3  ;;  %s1042_s19 = sshll.u32 %s1536_s25, 3 }
   0xf   : > { %s1249_s11 = scalar_lea.vmem %s1525_s0, %s1039_s29  ;;  %s1394_s18 = scalar_lea.vmem %s1530_s5, %s1039_s29 }
  0x10   : > { %v303_v3 = vld [vmem:[%s1249_s11] sm:$0xff]  ;;  %v304_v4 = vld [vmem:[%s1249_s11 + $0x8] sm:$0xff]  ;;  %v305_v5 = vld [vmem:[%s1249_s11 + $0x10] sm:$0xff]  ;;  %s298_s22 = scalar_lea.vmem %s1531_s6, %s1042_s19  ;;  %s302_s27 = scalar_lea.vmem %s1532_s7, %s1042_s19 }
  0x11   : > { %v342_v6 = vmul.f32 %v1242_v1, %v303_v3  ;;  %v343_v7 = vmul.f32 %v1242_v1, %v304_v4  ;;  %v344_v8 = vmul.f32 %v1242_v1, %v305_v5  ;;  %v306_v9 = vld [vmem:[%s1249_s11 + $0x18] sm:$0xff]  ;;  %v307_v10 = vld [vmem:[%s1249_s11 + $0x20] sm:$0xff]  ;;  %v308_v11 = vld [vmem:[%s1249_s11 + $0x28] sm:$0xff] }
  0x12   : > { %v345_v12 = vmul.f32 %v1242_v1, %v306_v9  ;;  %v346_v13 = vmul.f32 %v1242_v1, %v307_v10  ;;  %v309_v14 = vld [vmem:[%s1249_s11 + $0x30] sm:$0xff]  ;;  %v310_v15 = vld [vmem:[%s1249_s11 + $0x38] sm:$0xff]  ;;  %v347_v19 = vmul.f32 %v1242_v1, %v308_v11  ;;  %v311_v27 = vld [vmem:[%s1249_s11 + $0x40] sm:$0xff] }
  0x13   : > { %v381_v16 = vadd.f32 %v1254_v2, %v342_v6  ;;  %v382_v17 = vadd.f32 %v1254_v2, %v343_v7  ;;  %v383_v18 = vadd.f32 %v1254_v2, %v344_v8  ;;  %v348_v21 = vmul.f32 %v1242_v1, %v309_v14  ;;  %v312_v29 = vld [vmem:[%s1249_s11 + $0x48] sm:$0xff]  ;;  %v313_v34 = vld [vmem:[%s1249_s11 + $0x50] sm:$0xff]  ;;  %v314_v36 = vld [vmem:[%s1249_s11 + $0x58] sm:$0xff] }
  0x14   : > { %v384_v20 = vadd.f32 %v1254_v2, %v345_v12  ;;  %v349_v22 = vmul.f32 %v1242_v1, %v310_v15  ;;  %v385_v26 = vadd.f32 %v1254_v2, %v346_v13  ;;  %v386_v28 = vadd.f32 %v1254_v2, %v347_v19  ;;  %v319_v38 = vld [vmem:[%s1249_s11 + $0x80] sm:$0xff]  ;;  %v320_v39 = vld [vmem:[%s1249_s11 + $0x88] sm:$0xff]  ;;  %v321_v40 = vld [vmem:[%s1249_s11 + $0x90] sm:$0xff] }
  0x15   : > { %v413_v23 = vmax.f32 %v381_v16, 0.0  ;;  %v414_v24 = vmax.f32 %v382_v17, 0.0  ;;  %v415_v25 = vmax.f32 %v383_v18, 0.0  ;;  %v387_v31 = vadd.f32 %v1254_v2, %v348_v21  ;;  %v315_v42 = vld [vmem:[%s1249_s11 + $0x60] sm:$0xff]  ;;  %v322_v43 = vld [vmem:[%s1249_s11 + $0x98] sm:$0xff]  ;;  %v324_v53 = vld [vmem:[%s1249_s11 + $0xa8] sm:$0xff] }
  0x16   : > { %v416_v30 = vmax.f32 %v384_v20, 0.0  ;;  %v388_v32 = vadd.f32 %v1254_v2, %v349_v22  ;;  %v350_v33 = vmul.f32 %v1242_v1, %v311_v27  ;;  %v417_v35 = vmax.f32 %v385_v26, 0.0  ;;  %v323_v44 = vld [vmem:[%s1249_s11 + $0xa0] sm:$0xff]  ;;  %v325_v54 = vld [vmem:[%s1249_s11 + $0xb0] sm:$0xff]  ;;  %v316_v0 = vld [vmem:[%s1249_s11 + $0x68] sm:$0xff] }
  0x17   : > { %1116 = vmatprep.mubr.msk.f32.mxu0 %vm453_vm0, %v413_v23  ;;  %v351_v37 = vmul.f32 %v1242_v1, %v312_v29  ;;  %v352_v41 = vmul.f32 %v1242_v1, %v313_v34  ;;  %v418_v45 = vmax.f32 %v386_v28, 0.0  ;;  %v419_v46 = vmax.f32 %v387_v31, 0.0  ;;  %v317_v3 = vld [vmem:[%s1249_s11 + $0x70] sm:$0xff]  ;;  %v326_v11 = vld [vmem:[%s1249_s11 + $0xb8] sm:$0xff]  ;;  %v327_v12 = vld [vmem:[%s1249_s11 + $0xc0] sm:$0xff] }
  0x18   : > { %1117 = vmatmul.mubr.msk.f32.vlgmr.msra.gmra.mrb[0].mxu0 %vm453_vm0, %v414_v24  ;;  %v420_v47 = vmax.f32 %v388_v32, 0.0  ;;  %v389_v48 = vadd.f32 %v1254_v2, %v350_v33  ;;  %v353_v49 = vmul.f32 %v1242_v1, %v314_v36  ;;  %v358_v50 = vmul.f32 %v1242_v1, %v319_v38  ;;  %v318_v18 = vld [vmem:[%s1249_s11 + $0x78] sm:$0xff]  ;;  %v328_v26 = vld [vmem:[%s1249_s11 + $0xc8] sm:$0xff]  ;;  %v329_v27 = vld [vmem:[%s1249_s11 + $0xd0] sm:$0xff] }
  0x19   : > { %1119 = vmatprep.mubr.msk.f32.mxu0 %vm453_vm0, %v415_v25  ;;  %v359_v51 = vmul.f32 %v1242_v1, %v320_v39  ;;  %v360_v52 = vmul.f32 %v1242_v1, %v321_v40  ;;  %v390_v55 = vadd.f32 %v1254_v2, %v351_v37  ;;  %v354_v56 = vmul.f32 %v1242_v1, %v315_v42  ;;  %v330_v39 = vld [vmem:[%s1249_s11 + $0xd8] sm:$0xff]  ;;  %v331_v40 = vld [vmem:[%s1249_s11 + $0xe0] sm:$0xff] }
  0x1a   : > { %v361_v57 = vmul.f32 %v1242_v1, %v322_v43  ;;  %v362_v58 = vmul.f32 %v1242_v1, %v323_v44  ;;  %v391_v59 = vadd.f32 %v1254_v2, %v352_v41  ;;  %v397_v60 = vadd.f32 %v1254_v2, %v358_v50  ;;  %v332_v50 = vld [vmem:[%s1249_s11 + $0xe8] sm:$0xff] }
  0x1b   : > { %v398_v61 = vadd.f32 %v1254_v2, %v359_v51  ;;  %v399_v62 = vadd.f32 %v1254_v2, %v360_v52  ;;  %v421_v63 = vmax.f32 %v389_v48, 0.0  ;;  %v363_v5 = vmul.f32 %v1242_v1, %v324_v53  ;;  %v333_v51 = vld [vmem:[%s1249_s11 + $0xf0] sm:$0xff] }
  0x1c   : > { %1120 = vmatmul.mubr.msk.f32.gmra.mrb[2].mxu0 %vm453_vm0, %v416_v30  ;;  %v400_v4 = vadd.f32 %v1254_v2, %v361_v57  ;;  %v364_v6 = vmul.f32 %v1242_v1, %v325_v54  ;;  %v429_v7 = vmax.f32 %v397_v60, 0.0  ;;  %v401_v10 = vadd.f32 %v1254_v2, %v362_v58 }
  0x1d   : > { %1122 = vmatprep.mubr.msk.f32.mxu0 %vm453_vm0, %v417_v35  ;;  %v430_v8 = vmax.f32 %v398_v61, 0.0  ;;  %v431_v9 = vmax.f32 %v399_v62, 0.0  ;;  %v392_v13 = vadd.f32 %v1254_v2, %v353_v49  ;;  %v393_v14 = vadd.f32 %v1254_v2, %v354_v56 }
  0x1e   : > { %v355_v15 = vmul.f32 %v1242_v1, %v316_v0  ;;  %v356_v16 = vmul.f32 %v1242_v1, %v317_v3  ;;  %1140 = vmatprep.mubr.msk.f32.mxu1 %vm453_vm0, %v429_v7  ;;  %v422_v17 = vmax.f32 %v390_v55, 0.0  ;;  %v432_v19 = vmax.f32 %v400_v4, 0.0 }
  0x1f   : > { %1141 = vmatmul.mubr.msk.f32.vlgmr.msra.gmra.mrb[0].mxu1 %vm453_vm0, %v430_v8  ;;  %v402_v20 = vadd.f32 %v1254_v2, %v363_v5  ;;  %v365_v21 = vmul.f32 %v1242_v1, %v326_v11  ;;  %v423_v22 = vmax.f32 %v391_v59, 0.0  ;;  %v433_v23 = vmax.f32 %v401_v10, 0.0  ;;  %v334_v59 = vld [vmem:[%s1249_s11 + $0xf8] sm:$0xff] }
  0x20   : > { %1123 = vmatmul.mubr.msk.f32.gmra.mrb[4].mxu0 %vm453_vm0, %v418_v45  ;;  %1143 = vmatprep.mubr.msk.f32.mxu1 %vm453_vm0, %v431_v9  ;;  %v403_v24 = vadd.f32 %v1254_v2, %v364_v6  ;;  %v366_v25 = vmul.f32 %v1242_v1, %v327_v12  ;;  %v394_v28 = vadd.f32 %v1254_v2, %v355_v15  ;;  %v424_v31 = vmax.f32 %v392_v13, 0.0 }
  0x21   : > { %1125 = vmatprep.mubr.msk.f32.mxu0 %vm453_vm0, %v419_v46  ;;  %v395_v29 = vadd.f32 %v1254_v2, %v356_v16  ;;  %v357_v30 = vmul.f32 %v1242_v1, %v318_v18  ;;  %v434_v32 = vmax.f32 %v402_v20, 0.0  ;;  %v404_v33 = vadd.f32 %v1254_v2, %v365_v21 }
  0x22   : > { %v367_v34 = vmul.f32 %v1242_v1, %v328_v26  ;;  %v425_v35 = vmax.f32 %v393_v14, 0.0  ;;  %v435_v36 = vmax.f32 %v403_v24, 0.0  ;;  %v405_v37 = vadd.f32 %v1254_v2, %v366_v25 }
  0x23   : > { %1144 = vmatmul.mubr.msk.f32.gmra.mrb[2].mxu1 %vm453_vm0, %v432_v19  ;;  %v368_v38 = vmul.f32 %v1242_v1, %v329_v27  ;;  %v426_v41 = vmax.f32 %v394_v28, 0.0  ;;  %v396_v42 = vadd.f32 %v1254_v2, %v357_v30  ;;  %v436_v43 = vmax.f32 %v404_v33, 0.0 }
  0x24   : > { %1126 = vmatmul.mubr.msk.f32.gmra.mrb[6].mxu0 %vm453_vm0, %v420_v47  ;;  %1146 = vmatprep.mubr.msk.f32.mxu1 %vm453_vm0, %v433_v23  ;;  %v406_v44 = vadd.f32 %v1254_v2, %v367_v34  ;;  %v369_v45 = vmul.f32 %v1242_v1, %v330_v39  ;;  %v427_v46 = vmax.f32 %v395_v29, 0.0  ;;  %v437_v47 = vmax.f32 %v405_v37, 0.0 }
  0x25   : > { %1128 = vmatprep.mubr.msk.f32.mxu0 %vm453_vm0, %v421_v63  ;;  %v407_v48 = vadd.f32 %v1254_v2, %v368_v38  ;;  %v370_v49 = vmul.f32 %v1242_v1, %v331_v40  ;;  %v428_v52 = vmax.f32 %v396_v42, 0.0  ;;  %v371_v55 = vmul.f32 %v1242_v1, %v332_v50 }
  0x26   : > { %v438_v53 = vmax.f32 %v406_v44, 0.0  ;;  %v408_v54 = vadd.f32 %v1254_v2, %v369_v45  ;;  %v372_v58 = vmul.f32 %v1242_v1, %v333_v51  ;;  %v373_v62 = vmul.f32 %v1242_v1, %v334_v59  ;;  %v1387_v1 = vld [vmem:[%s1529_s4] ss:$0 sm:$0xff] }
  0x27   : > { %1147 = vmatmul.mubr.msk.f32.gmra.mrb[4].mxu1 %vm453_vm0, %v434_v32  ;;  %v439_v56 = vmax.f32 %v407_v48, 0.0  ;;  %v409_v57 = vadd.f32 %v1254_v2, %v370_v49  ;;  %v410_v61 = vadd.f32 %v1254_v2, %v371_v55 }
  0x28   : > { %1129 = vmatmul.mubr.msk.f32.gmra.mrb[8].mxu0 %vm453_vm0, %v422_v17  ;;  %1149 = vmatprep.mubr.msk.f32.mxu1 %vm453_vm0, %v435_v36  ;;  %v440_v60 = vmax.f32 %v408_v54, 0.0  ;;  %v411_v0 = vadd.f32 %v1254_v2, %v372_v58  ;;  %v412_v4 = vadd.f32 %v1254_v2, %v373_v62 }
  0x29   : > { %1131 = vmatprep.mubr.msk.f32.mxu0 %vm453_vm0, %v423_v22  ;;  %v441_v63 = vmax.f32 %v409_v57, 0.0  ;;  %v442_v3 = vmax.f32 %v410_v61, 0.0 }
  0x2a   : > { %v443_v5 = vmax.f32 %v411_v0, 0.0  ;;  %v444_v6 = vmax.f32 %v412_v4, 0.0 }
  0x2b   : > { %1150 = vmatmul.mubr.msk.f32.gmra.mrb[6].mxu1 %vm453_vm0, %v436_v43 }
  0x2c   : > { %1132 = vmatmul.mubr.msk.f32.gmra.mrb[10].mxu0 %vm453_vm0, %v424_v31  ;;  %1152 = vmatprep.mubr.msk.f32.mxu1 %vm453_vm0, %v437_v47 }
  0x2d   : > { %1134 = vmatprep.mubr.msk.f32.mxu0 %vm453_vm0, %v425_v35 }
  0x2f   : > { %1153 = vmatmul.mubr.msk.f32.gmra.mrb[8].mxu1 %vm453_vm0, %v438_v53 }
  0x30   : > { %1135 = vmatmul.mubr.msk.f32.gmra.mrb[12].mxu0 %vm453_vm0, %v426_v41  ;;  %1155 = vmatprep.mubr.msk.f32.mxu1 %vm453_vm0, %v439_v56 }
  0x31   : > { %1137 = vmatprep.mubr.msk.f32.mxu0 %vm453_vm0, %v427_v46 }
  0x33   : > { %1156 = vmatmul.mubr.msk.f32.gmra.mrb[10].mxu1 %vm453_vm0, %v440_v60 }
  0x34   : > { %1138 = vmatmul.mubr.msk.f32.gmra.mrb[14].mxu0 %vm453_vm0, %v428_v52  ;;  %1158 = vmatprep.mubr.msk.f32.mxu1 %vm453_vm0, %v441_v63 }
  0x37   : > { %1159 = vmatmul.mubr.msk.f32.gmra.mrb[12].mxu1 %vm453_vm0, %v442_v3 }
  0x38   : > { %1161 = vmatprep.mubr.msk.f32.mxu1 %vm453_vm0, %v443_v5 }
  0x3b   : > { %1162 = vmatmul.mubr.msk.f32.gmra.mrb[14].mxu1 %vm453_vm0, %v444_v6 }
  0xeb   : > { %v1118_v2 = vpop.f32.mrb[0].mxu0 }
  0xec   : > { %v622_v7 = vadd.f32 %v1118_v2, %v1387_v1  ;;  %v616_v8 = vpop.f32.mrb[1].mxu0 }
  0xed   : > { %v617_v9 = vadd.f32 %v1387_v1, %v616_v8 }
  0xee   : > { %776 = vst [vmem:[%s1394_s18 + $0x8] sm:$0xff] %v622_v7  ;;  %v846_v10 = vmul.f32 %v622_v7, %v622_v7 }
  0xef   : > { %775 = vst [vmem:[%s1394_s18] sm:$0xff] %v617_v9  ;;  %v807_v11 = vadd.f32 %v622_v7, %v617_v9  ;;  %v845_v12 = vmul.f32 %v617_v9, %v617_v9  ;;  %v1121_v13 = vpop.f32.mrb[2].mxu0 }
  0xf0   : > { %v632_v14 = vadd.f32 %v1121_v13, %v1387_v1  ;;  %v626_v15 = vpop.f32.mrb[3].mxu0 }
  0xf1   : > { %v877_v16 = vadd.f32 %v846_v10, %v845_v12  ;;  %v627_v17 = vadd.f32 %v1387_v1, %v626_v15 }
  0xf2   : > { %778 = vst [vmem:[%s1394_s18 + $0x18] sm:$0xff] %v632_v14  ;;  %v848_v23 = vmul.f32 %v632_v14, %v632_v14  ;;  %v1142_v31 = vpop.f32.mrb[0].mxu1 }
  0xf3   : > { %777 = vst [vmem:[%s1394_s18 + $0x10] sm:$0xff] %v627_v17  ;;  %v808_v18 = vadd.f32 %v807_v11, %v627_v17  ;;  %v847_v19 = vmul.f32 %v627_v17, %v627_v17  ;;  %v1124_v20 = vpop.f32.mrb[4].mxu0  ;;  %v1410_v35 = vadd.f32 %v1142_v31, %v1387_v1  ;;  %v696_v36 = vpop.f32.mrb[1].mxu1 }
  0xf4   : > { %v642_v21 = vadd.f32 %v1124_v20, %v1387_v1  ;;  %v636_v22 = vpop.f32.mrb[5].mxu0  ;;  %v1414_v40 = vadd.f32 %v1387_v1, %v696_v36 }
  0xf5   : > { %v878_v24 = vadd.f32 %v877_v16, %v847_v19  ;;  %v637_v25 = vadd.f32 %v1387_v1, %v636_v22  ;;  %v809_v26 = vadd.f32 %v808_v18, %v632_v14  ;;  %792 = vst [vmem:[%s1394_s18 + $0x88] sm:$0xff] %v1410_v35 }
  0xf6   : > { %780 = vst [vmem:[%s1394_s18 + $0x28] sm:$0xff] %v642_v21  ;;  %v850_v32 = vmul.f32 %v642_v21, %v642_v21  ;;  %791 = vst [vmem:[%s1394_s18 + $0x80] sm:$0xff] %v1414_v40  ;;  %v1145_v45 = vpop.f32.mrb[2].mxu1 }
  0xf7   : > { %779 = vst [vmem:[%s1394_s18 + $0x20] sm:$0xff] %v637_v25  ;;  %v810_v27 = vadd.f32 %v809_v26, %v637_v25  ;;  %v849_v28 = vmul.f32 %v637_v25, %v637_v25  ;;  %v879_v29 = vadd.f32 %v878_v24, %v848_v23  ;;  %v1127_v30 = vpop.f32.mrb[6].mxu0  ;;  %v1424_v49 = vadd.f32 %v1145_v45, %v1387_v1  ;;  %v706_v50 = vpop.f32.mrb[3].mxu1 }
  0xf8   : > { %v652_v33 = vadd.f32 %v1127_v30, %v1387_v1  ;;  %v646_v34 = vpop.f32.mrb[7].mxu0  ;;  %v1428_v54 = vadd.f32 %v1387_v1, %v706_v50 }
  0xf9   : > { %v880_v37 = vadd.f32 %v879_v29, %v849_v28  ;;  %v647_v38 = vadd.f32 %v1387_v1, %v646_v34  ;;  %v811_v39 = vadd.f32 %v810_v27, %v642_v21  ;;  %794 = vst [vmem:[%s1394_s18 + $0x98] sm:$0xff] %v1424_v49 }
  0xfa   : > { %782 = vst [vmem:[%s1394_s18 + $0x38] sm:$0xff] %v652_v33  ;;  %v852_v46 = vmul.f32 %v652_v33, %v652_v33  ;;  %793 = vst [vmem:[%s1394_s18 + $0x90] sm:$0xff] %v1428_v54  ;;  %v1148_v59 = vpop.f32.mrb[4].mxu1 }
  0xfb   : > { %781 = vst [vmem:[%s1394_s18 + $0x30] sm:$0xff] %v647_v38  ;;  %v812_v41 = vadd.f32 %v811_v39, %v647_v38  ;;  %v851_v42 = vmul.f32 %v647_v38, %v647_v38  ;;  %v881_v43 = vadd.f32 %v880_v37, %v850_v32  ;;  %v1130_v44 = vpop.f32.mrb[8].mxu0  ;;  %v1438_v63 = vadd.f32 %v1148_v59, %v1387_v1  ;;  %v716_v0 = vpop.f32.mrb[5].mxu1 }
  0xfc   : > { %v662_v47 = vadd.f32 %v1130_v44, %v1387_v1  ;;  %v656_v48 = vpop.f32.mrb[9].mxu0  ;;  %v1442_v6 = vadd.f32 %v1387_v1, %v716_v0  ;;  %v861_v39 = vmul.f32 %v1414_v40, %v1414_v40 }
  0xfd   : > { %v882_v51 = vadd.f32 %v881_v43, %v851_v42  ;;  %v657_v52 = vadd.f32 %v1387_v1, %v656_v48  ;;  %v813_v53 = vadd.f32 %v812_v41, %v652_v33  ;;  %796 = vst [vmem:[%s1394_s18 + $0xa8] sm:$0xff] %v1438_v63 }
  0xfe   : > { %784 = vst [vmem:[%s1394_s18 + $0x48] sm:$0xff] %v662_v47  ;;  %v854_v60 = vmul.f32 %v662_v47, %v662_v47  ;;  %795 = vst [vmem:[%s1394_s18 + $0xa0] sm:$0xff] %v1442_v6  ;;  %v1151_v10 = vpop.f32.mrb[6].mxu1 }
  0xff   : > { %783 = vst [vmem:[%s1394_s18 + $0x40] sm:$0xff] %v657_v52  ;;  %v814_v55 = vadd.f32 %v813_v53, %v657_v52  ;;  %v853_v56 = vmul.f32 %v657_v52, %v657_v52  ;;  %v883_v57 = vadd.f32 %v882_v51, %v852_v46  ;;  %v1133_v58 = vpop.f32.mrb[10].mxu0  ;;  %v1452_v14 = vadd.f32 %v1151_v10, %v1387_v1  ;;  %v726_v15 = vpop.f32.mrb[7].mxu1 }
 0x100   : > { %v672_v61 = vadd.f32 %v1133_v58, %v1387_v1  ;;  %v666_v62 = vpop.f32.mrb[11].mxu0  ;;  %v1456_v19 = vadd.f32 %v1387_v1, %v726_v15  ;;  %v862_v51 = vmul.f32 %v1410_v35, %v1410_v35 }
 0x101   : > { %v884_v3 = vadd.f32 %v883_v57, %v853_v56  ;;  %v667_v4 = vadd.f32 %v1387_v1, %v666_v62  ;;  %v815_v5 = vadd.f32 %v814_v55, %v662_v47  ;;  %798 = vst [vmem:[%s1394_s18 + $0xb8] sm:$0xff] %v1452_v14  ;;  %v863_v57 = vmul.f32 %v1428_v54, %v1428_v54 }
 0x102   : > { %786 = vst [vmem:[%s1394_s18 + $0x58] sm:$0xff] %v672_v61  ;;  %v856_v11 = vmul.f32 %v672_v61, %v672_v61  ;;  %797 = vst [vmem:[%s1394_s18 + $0xb0] sm:$0xff] %v1456_v19  ;;  %v1154_v24 = vpop.f32.mrb[8].mxu1  ;;  %v867_v10 = vmul.f32 %v1456_v19, %v1456_v19 }
 0x103   : > { %785 = vst [vmem:[%s1394_s18 + $0x50] sm:$0xff] %v667_v4  ;;  %v816_v2 = vadd.f32 %v815_v5, %v667_v4  ;;  %v855_v7 = vmul.f32 %v667_v4, %v667_v4  ;;  %v885_v8 = vadd.f32 %v884_v3, %v854_v60  ;;  %v1136_v9 = vpop.f32.mrb[12].mxu0  ;;  %v1466_v28 = vadd.f32 %v1154_v24, %v1387_v1  ;;  %v736_v29 = vpop.f32.mrb[9].mxu1 }
 0x104   : > { %v682_v12 = vadd.f32 %v1136_v9, %v1387_v1  ;;  %v676_v13 = vpop.f32.mrb[13].mxu0  ;;  %v737_v33 = vadd.f32 %v1387_v1, %v736_v29  ;;  %v865_v4 = vmul.f32 %v1442_v6, %v1442_v6 }
 0x105   : > { %v886_v16 = vadd.f32 %v885_v8, %v855_v7  ;;  %v677_v17 = vadd.f32 %v1387_v1, %v676_v13  ;;  %v817_v18 = vadd.f32 %v816_v2, %v672_v61  ;;  %800 = vst [vmem:[%s1394_s18 + $0xc8] sm:$0xff] %v1466_v28  ;;  %v864_v61 = vmul.f32 %v1424_v49, %v1424_v49 }
 0x106   : > { %788 = vst [vmem:[%s1394_s18 + $0x68] sm:$0xff] %v682_v12  ;;  %v858_v25 = vmul.f32 %v682_v12, %v682_v12  ;;  %799 = vst [vmem:[%s1394_s18 + $0xc0] sm:$0xff] %v737_v33  ;;  %v1157_v38 = vpop.f32.mrb[10].mxu1  ;;  %v866_v7 = vmul.f32 %v1438_v63, %v1438_v63  ;;  %v869_v13 = vmul.f32 %v737_v33, %v737_v33 }
 0x107   : > { %787 = vst [vmem:[%s1394_s18 + $0x60] sm:$0xff] %v677_v17  ;;  %v818_v20 = vadd.f32 %v817_v18, %v677_v17  ;;  %v857_v21 = vmul.f32 %v677_v17, %v677_v17  ;;  %v887_v22 = vadd.f32 %v886_v16, %v856_v11  ;;  %v1139_v23 = vpop.f32.mrb[14].mxu0  ;;  %v752_v41 = vadd.f32 %v1157_v38, %v1387_v1  ;;  %v746_v42 = vpop.f32.mrb[11].mxu1 }
 0x108   : > { %v692_v26 = vadd.f32 %v1139_v23, %v1387_v1  ;;  %v686_v27 = vpop.f32.mrb[15].mxu0  ;;  %v747_v46 = vadd.f32 %v1387_v1, %v746_v42  ;;  %v870_v17 = vmul.f32 %v1466_v28, %v1466_v28 }
 0x109   : > { %v888_v30 = vadd.f32 %v887_v22, %v857_v21  ;;  %v687_v31 = vadd.f32 %v1387_v1, %v686_v27  ;;  %v819_v32 = vadd.f32 %v818_v20, %v682_v12  ;;  %802 = vst [vmem:[%s1394_s18 + $0xd8] sm:$0xff] %v752_v41  ;;  %v872_v22 = vmul.f32 %v752_v41, %v752_v41 }
 0x10a   : > { %790 = vst [vmem:[%s1394_s18 + $0x78] sm:$0xff] %v692_v26  ;;  %v860_v43 = vmul.f32 %v692_v26, %v692_v26  ;;  %801 = vst [vmem:[%s1394_s18 + $0xd0] sm:$0xff] %v747_v46  ;;  %v1160_v50 = vpop.f32.mrb[12].mxu1  ;;  %v871_v20 = vmul.f32 %v747_v46, %v747_v46 }
 0x10b   : > { %789 = vst [vmem:[%s1394_s18 + $0x70] sm:$0xff] %v687_v31  ;;  %v820_v34 = vadd.f32 %v819_v32, %v687_v31  ;;  %v859_v36 = vmul.f32 %v687_v31, %v687_v31  ;;  %v889_v37 = vadd.f32 %v888_v30, %v858_v25  ;;  %v762_v52 = vadd.f32 %v1160_v50, %v1387_v1  ;;  %v756_v53 = vpop.f32.mrb[13].mxu1 }
 0x10c   : > { %v757_v58 = vadd.f32 %v1387_v1, %v756_v53 }
 0x10d   : > { %v890_v44 = vadd.f32 %v889_v37, %v859_v36  ;;  %v821_v45 = vadd.f32 %v820_v34, %v692_v26  ;;  %804 = vst [vmem:[%s1394_s18 + $0xe8] sm:$0xff] %v762_v52  ;;  %v874_v27 = vmul.f32 %v762_v52, %v762_v52 }
 0x10e   : > { %803 = vst [vmem:[%s1394_s18 + $0xe0] sm:$0xff] %v757_v58  ;;  %v1163_v60 = vpop.f32.mrb[14].mxu1  ;;  %v873_v25 = vmul.f32 %v757_v58, %v757_v58 }
 0x10f   : > { %v822_v47 = vadd.f32 %v821_v45, %v1414_v40  ;;  %v891_v48 = vadd.f32 %v890_v44, %v860_v43  ;;  %v772_v62 = vadd.f32 %v1163_v60, %v1387_v1  ;;  %v766_v0 = vpop.f32.mrb[15].mxu1 }
 0x110   : > { %v767_v5 = vadd.f32 %v1387_v1, %v766_v0  ;;  %v868_v1 = vmul.f32 %v1452_v14, %v1452_v14 }
 0x111   : > { %v892_v55 = vadd.f32 %v891_v48, %v861_v39  ;;  %v823_v56 = vadd.f32 %v822_v47, %v1410_v35  ;;  %806 = vst [vmem:[%s1394_s18 + $0xf8] sm:$0xff] %v772_v62  ;;  %v876_v34 = vmul.f32 %v772_v62, %v772_v62 }
 0x112   : > { %805 = vst [vmem:[%s1394_s18 + $0xf0] sm:$0xff] %v767_v5  ;;  %v875_v31 = vmul.f32 %v767_v5, %v767_v5 }
 0x113   : > { %v824_v40 = vadd.f32 %v823_v56, %v1428_v54  ;;  %v893_v59 = vadd.f32 %v892_v55, %v862_v51 }
 0x115   : > { %v894_v3 = vadd.f32 %v893_v59, %v863_v57  ;;  %v825_v35 = vadd.f32 %v824_v40, %v1424_v49 }
 0x117   : > { %v826_v54 = vadd.f32 %v825_v35, %v1442_v6  ;;  %v895_v2 = vadd.f32 %v894_v3, %v864_v61 }
 0x119   : > { %v896_v8 = vadd.f32 %v895_v2, %v865_v4  ;;  %v827_v9 = vadd.f32 %v826_v54, %v1438_v63 }
 0x11b   : > { %v828_v49 = vadd.f32 %v827_v9, %v1456_v19  ;;  %v897_v11 = vadd.f32 %v896_v8, %v866_v7 }
 0x11d   : > { %v898_v12 = vadd.f32 %v897_v11, %v867_v10  ;;  %v829_v6 = vadd.f32 %v828_v49, %v1452_v14 }
 0x11f   : > { %v830_v15 = vadd.f32 %v829_v6, %v737_v33  ;;  %v899_v16 = vadd.f32 %v898_v12, %v868_v1 }
 0x121   : > { %v900_v18 = vadd.f32 %v899_v16, %v869_v13  ;;  %v831_v63 = vadd.f32 %v830_v15, %v1466_v28 }
 0x123   : > { %v832_v21 = vadd.f32 %v831_v63, %v747_v46  ;;  %v901_v19 = vadd.f32 %v900_v18, %v870_v17 }
 0x125   : > { %v902_v23 = vadd.f32 %v901_v19, %v871_v20  ;;  %v833_v24 = vadd.f32 %v832_v21, %v752_v41 }
 0x127   : > { %v834_v26 = vadd.f32 %v833_v24, %v757_v58  ;;  %v903_v14 = vadd.f32 %v902_v23, %v872_v22 }
 0x129   : > { %v904_v29 = vadd.f32 %v903_v14, %v873_v25  ;;  %v835_v30 = vadd.f32 %v834_v26, %v762_v52 }
 0x12b   : > { %v836_v32 = vadd.f32 %v835_v30, %v767_v5  ;;  %v905_v33 = vadd.f32 %v904_v29, %v874_v27 }
 0x12d   : > { %v837_v28 = vadd.f32 %v836_v32, %v772_v62  ;;  %v906_v36 = vadd.f32 %v905_v33, %v875_v31 }
 0x12f   : > { %v838_v37 = vrot.slane %v837_v28, 4  ;;  %v907_v38 = vadd.f32 %v906_v36, %v876_v34 }
 0x131   : > { %v839_v39 = vadd.f32 %v838_v37, %v837_v28  ;;  %v908_v42 = vrot.slane %v907_v38, 4 }
 0x133   : > { %v840_v41 = vrot.slane %v839_v39, 2  ;;  %v909_v43 = vadd.f32 %v908_v42, %v907_v38 }
 0x135   : > { %v841_v44 = vadd.f32 %v840_v41, %v839_v39  ;;  %v910_v45 = vrot.slane %v909_v43, 2 }
 0x137   : > { %v842_v46 = vrot.slane %v841_v44, 1  ;;  %v911_v47 = vadd.f32 %v910_v45, %v909_v43 }
 0x139   : > { %v843_v48 = vadd.f32 %v842_v46, %v841_v44  ;;  %v912_v50 = vrot.slane %v911_v47, 1 }
 0x13b   : > { %844 = vst [vmem:[%s298_s22] sm:$0xff] %v843_v48  ;;  %v913_v51 = vadd.f32 %v912_v50, %v911_v47 }
 0x13d   : > { %914 = vst [vmem:[%s302_s27] sm:$0xff] %v913_v51 }
 0x13e PF: > { %s18_s24 = sadd.s32 1, %s1180_s24  }
 0x13f   : > { %p15_p5 = scmp.ge.s32.totalorder %s18_s24, 4  }
 0x141   :  { %17 = sbr.rel (!%p15_p5) target bundleno = 1 (0x1), region = 94 }

// kernel: _lambda_.5
= control target key start
LH: loop header
LB: loop body
LE: loop exit
PB: predicated region body
PF: predicated region fallthrough
CT: control target
= control target key end

     0   :  { %s5339_s18 = smov 0   ;;  %s6656_s0 = inlined_call_operand.vmem [shape: f32[2,18,18,128], index: 0, kind: input, shape index: {}]   ;;  %s6657_s1 = inlined_call_operand.vmem [shape: f32[1,128], index: 1, kind: input, shape index: {}]   ;;  %s6658_s2 = inlined_call_operand.vmem [shape: f32[1,128], index: 2, kind: input, shape index: {}]   ;;  %s6659_s3 = inlined_call_operand.vmem [shape: f32[9,128,128], index: 3, kind: input, shape index: {}]   ;;  %s6660_s4 = inlined_call_operand.vmem [shape: f32[1,128], index: 4, kind: input, shape index: {}]   ;;  %s6661_s5 = inlined_call_operand.vmem [shape: f32[2,16,16,128], index: 5, kind: output, shape index: {}]  }
   0x1 LB: > { %s3402_s19 = sadd.s32 4294967295, %s5306_s18   ;;  %p3406_p0 = scmp.ge.s32.totalorder %s5306_s18, 1  ;;  %s5306_s18 = sphi %s5339_s18, %s15_s18  }
   0x2   : > { %p187_p1 = scmp.lt.s32.totalorder %s5306_s18, 3 }
   0x4   : > { %p188_p2 = pnand %p3406_p0, %p187_p1 }
   0x6   : > { %191 = sbr.rel (%p188_p2) target bundleno = 552 (0x228), region = 40 }
   0xd   : > { %v3412_v0 = vld [vmem:[%s6659_s3 + $0x80] sm:$0xff]  ;;  %v3413_v1 = vld [vmem:[%s6659_s3 + $0x88] sm:$0xff]  ;;  %p5356_p3 = scmp.lt.s32.totalorder %s3402_s19, 1  ;;  %v3414_v5 = vld [vmem:[%s6659_s3 + $0x90] sm:$0xff]  ;;  %v5308_v7 = vmov 0.0   ;;  %v455_v18 = vlaneseq }
   0xe   : > { %v3460_v2 = vld [vmem:[%s6659_s3 + $0x200] sm:$0xff]  ;;  %v4696_v3 = vpack.c.bf16 %v3413_v1, %v3412_v0  ;;  %v3461_v4 = vld [vmem:[%s6659_s3 + $0x208] sm:$0xff]  ;;  %v3415_v6 = vld [vmem:[%s6659_s3 + $0x98] sm:$0xff]  ;;  %531 = vst [vmem:[#allocation2] sm:$0xff] %v5308_v7 }
   0xf   : > { %532 = vst [vmem:[#allocation2 + $0x8] sm:$0xff] %v5308_v7  ;;  %533 = vst [vmem:[#allocation2 + $0x10] sm:$0x3] %v5308_v7  ;;  %v5369_v8 = vpack.c.bf16 %v3461_v4, %v3460_v2  ;;  %v4700_v9 = vpack.c.bf16 %v3415_v6, %v3414_v5  ;;  %v3462_v10 = vld [vmem:[%s6659_s3 + $0x210] sm:$0xff]  ;;  %v3463_v11 = vld [vmem:[%s6659_s3 + $0x218] sm:$0xff]  ;;  %s6736_s19 = smov (!%p5356_p3, %s3402_s19), 1 }
  0x10   : > { %582 = vst [vmem:[#allocation2 + $0x198] sm:$0xff] %v5308_v7  ;;  %583 = vst [vmem:[#allocation2 + $0x1a0] sm:$0xff] %v5308_v7  ;;  %v3416_v12 = vld [vmem:[%s6659_s3 + $0xa0] sm:$0xff]  ;;  %4697 = vmatprep.subr.bf16.mxu1 %v4696_v3  ;;  %v5384_v13 = vpack.c.bf16 %v3463_v11, %v3462_v10  ;;  %v3417_v14 = vld [vmem:[%s6659_s3 + $0xa8] sm:$0xff]  ;;  %s5256_s22 = smul.u32 432, %s6736_s19  ;;  %v5431_v29 = vshrl.u32 %v455_v18, 7 }
  0x11   : > { %584 = vst [vmem:[#allocation2 + $0x1a8] sm:$0x3] %v5308_v7  ;;  %v3464_v15 = vld [vmem:[%s6659_s3 + $0x220] sm:$0xff]  ;;  %v3465_v16 = vld [vmem:[%s6659_s3 + $0x228] sm:$0xff]  ;;  %4825 = vmatprep.subr.bf16.mxu0 %v5369_v8  ;;  %4699 = vmatpush3.bf16.msra.mxu1 %v4696_v3  ;;  %v4704_v17 = vpack.c.bf16 %v3417_v14, %v3416_v12  ;;  %v3418_v20 = vld [vmem:[%s6659_s3 + $0xb0] sm:$0xff] }
  0x12   : > { %6695 = vst [vmem:[#allocation3_spill] sm:$0xff] %v5384_v13  ;;  %4827 = vmatpush3.bf16.msra.mxu0 %v5369_v8  ;;  %4701 = vmatprep.subr.bf16.mxu1 %v4700_v9  ;;  %v5399_v19 = vpack.c.bf16 %v3465_v16, %v3464_v15  ;;  %v3419_v21 = vld [vmem:[%s6659_s3 + $0xb8] sm:$0xff]  ;;  %v3466_v22 = vld [vmem:[%s6659_s3 + $0x230] sm:$0xff]  ;;  %v3420_v24 = vld [vmem:[%s6659_s3 + $0xc0] sm:$0xff]  ;;  %s5419_s10 = scalar_lea.vmem %s6656_s0, %s5256_s22  ;;  %vm459_vm0 = vcmp.ge.s32.totalorder %v5431_v29, 1  ;;  %v5469_v45 = vadd.s32 16, %v5431_v29 }
  0x13   : > { %4829 = vmatprep.subr.bf16.mxu0 %v5384_v13  ;;  %v3467_v23 = vld [vmem:[%s6659_s3 + $0x238] sm:$0xff]  ;;  %v4708_v25 = vpack.c.bf16 %v3419_v21, %v3418_v20  ;;  %v3421_v26 = vld [vmem:[%s6659_s3 + $0xc8] sm:$0xff]  ;;  %v3468_v27 = vld [vmem:[%s6659_s3 + $0x240] sm:$0xff]  ;;  %s3543_s22 = sshll.u32 %s6736_s19, 8 }
  0x14   : > { %6696 = vst [vmem:[#allocation4_spill] sm:$0xff] %v5399_v19  ;;  %v3469_v28 = vld [vmem:[%s6659_s3 + $0x248] sm:$0xff]  ;;  %v5434_v30 = vpack.c.bf16 %v3467_v23, %v3466_v22  ;;  %v3422_v31 = vld [vmem:[%s6659_s3 + $0xd0] sm:$0xff]  ;;  %v3423_v32 = vld [vmem:[%s6659_s3 + $0xd8] sm:$0xff]  ;;  %v4712_v42 = vpack.c.bf16 %v3421_v26, %v3420_v24  ;;  %vm470_vm1 = vcmp.le.s32.totalorder %v5469_v45, 16  ;;  %s6586_s27 = scalar_lea.vmem %s6661_s5, %s3543_s22 }
  0x15   : > { %4703 = vmatpush3.bf16.msra.mxu1 %v4700_v9  ;;  %v228_v34 = vld [vmem:[%s5419_s10 + $0x18] sm:$0xff]  ;;  %v229_v35 = vld [vmem:[%s5419_s10 + $0x20] sm:$0xff]  ;;  %v3470_v37 = vld [vmem:[%s6659_s3 + $0x250] sm:$0xff]  ;;  %v5472_v46 = vpack.c.bf16 %v3469_v28, %v3468_v27  ;;  %v5482_v53 = vpack.c.bf16 %v3423_v32, %v3422_v31 }
  0x16   : > { %4831 = vmatpush3.bf16.msra.mxu0 %v5384_v13  ;;  %4705 = vmatprep.subr.bf16.mxu1 %v4704_v17  ;;  %6697 = vst [vmem:[#allocation5_spill] sm:$0xff] %v5434_v30  ;;  %v633_v33 = vld [vmem:[#allocation2 + $0x1] sm:$0xff]  ;;  %v5447_v36 = vld [vmem:[%s6657_s1] ss:$0 sm:$0xff]  ;;  %v3471_v38 = vld [vmem:[%s6659_s3 + $0x258] sm:$0xff] }
  0x17   : > { %4833 = vmatprep.subr.bf16.mxu0 %v5399_v19  ;;  %4008 = vmatprep.mubr.f32.mxu1 %v633_v33  ;;  %v289_v39 = vmul.f32 %v5447_v36, %v228_v34  ;;  %v290_v40 = vmul.f32 %v5447_v36, %v229_v35  ;;  %v5460_v41 = vld [vmem:[%s6658_s2] ss:$0 sm:$0xff]  ;;  %v230_v44 = vld [vmem:[%s5419_s10 + $0x28] sm:$0x3]  ;;  %6698 = vst [vmem:[#allocation6_spill] sm:$0xff] %v5472_v46  ;;  %v231_v51 = vld [vmem:[%s5419_s10 + $0x30] sm:$0xff] }
  0x18   : > { %v3424_v43 = vld [vmem:[%s6659_s3 + $0xe0] sm:$0xff]  ;;  %v3425_v47 = vld [vmem:[%s6659_s3 + $0xe8] sm:$0xff]  ;;  %v291_v50 = vmul.f32 %v5447_v36, %v230_v44  ;;  %v232_v52 = vld [vmem:[%s5419_s10 + $0x38] sm:$0xff]  ;;  %v5484_v54 = vpack.c.bf16 %v3471_v38, %v3470_v37  ;;  %v292_v56 = vmul.f32 %v5447_v36, %v231_v51 }
  0x19   : > { %4707 = vmatpush3.bf16.msra.mxu1 %v4704_v17  ;;  %v350_v48 = vadd.f32 %v5460_v41, %v289_v39  ;;  %v351_v49 = vadd.f32 %v5460_v41, %v290_v40  ;;  %v3472_v55 = vld [vmem:[%s6659_s3 + $0x260] sm:$0xff]  ;;  %v293_v57 = vmul.f32 %v5447_v36, %v232_v52  ;;  %v3473_v59 = vld [vmem:[%s6659_s3 + $0x268] sm:$0xff]  ;;  %v235_v1 = vld [vmem:[%s5419_s10 + $0x50] sm:$0xff]  ;;  %v5500_v2 = vpack.c.bf16 %v3425_v47, %v3424_v43 }
  0x1a   : > { %4835 = vmatpush3.bf16.msra.mxu0 %v5399_v19  ;;  %4709 = vmatprep.subr.bf16.mxu1 %v4708_v25  ;;  %6699 = vst [vmem:[#allocation7_spill] sm:$0xff] %v5484_v54  ;;  %v233_v58 = vld [vmem:[%s5419_s10 + $0x40] sm:$0x3]  ;;  %v352_v62 = vadd.f32 %v5460_v41, %v291_v50  ;;  %v234_v0 = vld [vmem:[%s5419_s10 + $0x48] sm:$0xff]  ;;  %v5504_v3 = vadd.f32 %v5460_v41, %v292_v56  ;;  %v236_v5 = vld [vmem:[%s5419_s10 + $0x58] sm:$0x3] }
  0x1b   : > { %4837 = vmatprep.subr.bf16.mxu0 %v5434_v30  ;;  %v404_v60 = vmax.f32 %v350_v48, 0.0  ;;  %v405_v61 = vmax.f32 %v351_v49, 0.0  ;;  %v294_v63 = vmul.f32 %v5447_v36, %v233_v58  ;;  %v354_v4 = vadd.f32 %v5460_v41, %v293_v57  ;;  %v3426_v6 = vld [vmem:[%s6659_s3 + $0xf0] sm:$0xff]  ;;  %v3427_v7 = vld [vmem:[%s6659_s3 + $0xf8] sm:$0xff]  ;;  %v237_v14 = vld [vmem:[%s5419_s10 + $0x60] sm:$0xff] }
  0x1c   : > { %v406_v10 = vmax.f32 %v352_v62, 0.0  ;;  %v295_v12 = vmul.f32 %v5447_v36, %v234_v0  ;;  %v5520_v15 = vpack.c.bf16 %v3473_v59, %v3472_v55  ;;  %v6671_v16 = vmax.f32 %v5504_v3, 0.0  ;;  %v238_v20 = vld [vmem:[%s5419_s10 + $0x68] sm:$0xff]  ;;  %v3474_v21 = vld [vmem:[%s6659_s3 + $0x270] sm:$0xff]  ;;  %v3475_v22 = vld [vmem:[%s6659_s3 + $0x278] sm:$0xff] }
  0x1d   : > { %4711 = vmatpush3.bf16.msra.mxu1 %v4708_v25  ;;  %v480_v9 = vsel %vm459_vm0, %v404_v60, 0.0  ;;  %535 = vst [vmem:[#allocation2 + $0x20] sm:$0xff] %v405_v61  ;;  %v355_v11 = vadd.f32 %v5460_v41, %v294_v63  ;;  %v408_v17 = vmax.f32 %v354_v4, 0.0  ;;  %v296_v18 = vmul.f32 %v5447_v36, %v235_v1  ;;  %v239_v27 = vld [vmem:[%s5419_s10 + $0x70] sm:$0x3]  ;;  %v240_v34 = vld [vmem:[%s5419_s10 + $0x78] sm:$0xff] }
  0x1e   : > { %4839 = vmatpush3.bf16.msra.mxu0 %v5434_v30  ;;  %4713 = vmatprep.subr.bf16.mxu1 %v4712_v42  ;;  %6700 = vst [vmem:[#allocation8_spill] sm:$0xff] %v5520_v15  ;;  %534 = vst [vmem:[#allocation2 + $0x18] sm:$0xff] %v480_v9  ;;  %v482_v23 = vsel %vm470_vm1, %v406_v10, 0.0  ;;  %v5534_v25 = vadd.f32 %v5460_v41, %v295_v12  ;;  %v297_v26 = vmul.f32 %v5447_v36, %v236_v5  ;;  %v617_v35 = vld [vmem:[%s6659_s3] sm:$0xff]  ;;  %v618_v37 = vld [vmem:[%s6659_s3 + $0x8] sm:$0xff] }
  0x1f   : > { %4841 = vmatprep.subr.bf16.mxu0 %v5472_v46  ;;  %v409_v24 = vmax.f32 %v355_v11, 0.0  ;;  %v5540_v28 = vpack.c.bf16 %v3427_v7, %v3426_v6  ;;  %536 = vst [vmem:[#allocation2 + $0x28] sm:$0x3] %v482_v23  ;;  %v483_v31 = vsel %vm459_vm0, %v6671_v16, 0.0  ;;  %538 = vst [vmem:[#allocation2 + $0x38] sm:$0xff] %v408_v17  ;;  %v5547_v32 = vadd.f32 %v5460_v41, %v296_v18  ;;  %v241_v43 = vld [vmem:[%s5419_s10 + $0x80] sm:$0xff] }
  0x20   : > { %v298_v33 = vmul.f32 %v5447_v36, %v237_v14  ;;  %537 = vst [vmem:[#allocation2 + $0x30] sm:$0xff] %v483_v31  ;;  %v6670_v39 = vmax.f32 %v5534_v25, 0.0  ;;  %v358_v40 = vadd.f32 %v5460_v41, %v297_v26  ;;  %v5564_v44 = vpack.c.bf16 %v3475_v22, %v3474_v21  ;;  %v242_v50 = vld [vmem:[%s5419_s10 + $0x88] sm:$0x3]  ;;  %v3476_v51 = vld [vmem:[%s6659_s3 + $0x280] sm:$0xff]  ;;  %v3478_v59 = vld [vmem:[%s6659_s3 + $0x290] sm:$0xff] }
  0x21   : > { %4715 = vmatpush3.bf16.msra.mxu1 %v4712_v42  ;;  %v485_v38 = vsel %vm470_vm1, %v409_v24, 0.0  ;;  %v299_v42 = vmul.f32 %v5447_v36, %v238_v20  ;;  %v6669_v47 = vmax.f32 %v5547_v32, 0.0  ;;  %v300_v49 = vmul.f32 %v5447_v36, %v239_v27  ;;  %v3477_v52 = vld [vmem:[%s6659_s3 + $0x288] sm:$0xff]  ;;  %v243_v63 = vld [vmem:[%s5419_s10 + $0x90] sm:$0xff]  ;;  %v244_v0 = vld [vmem:[%s5419_s10 + $0x98] sm:$0xff] }
  0x22   : > { %4843 = vmatpush3.bf16.msra.mxu0 %v5472_v46  ;;  %4717 = vmatprep.subr.bf16.mxu1 %v5482_v53  ;;  %6701 = vst [vmem:[#allocation9_spill] sm:$0xff] %v5564_v44  ;;  %539 = vst [vmem:[#allocation2 + $0x40] sm:$0x3] %v485_v38  ;;  %v5568_v48 = vadd.f32 %v5460_v41, %v298_v33  ;;  %v486_v55 = vsel %vm459_vm0, %v6670_v39, 0.0  ;;  %v412_v56 = vmax.f32 %v358_v40, 0.0  ;;  %v3479_v4 = vld [vmem:[%s6659_s3 + $0x298] sm:$0xff] }
  0x23   : > { %4845 = vmatprep.subr.bf16.mxu0 %v5484_v54  ;;  %v5584_v57 = vadd.f32 %v5460_v41, %v299_v42  ;;  %v5589_v58 = vpack.c.bf16 %v618_v37, %v617_v35  ;;  %540 = vst [vmem:[#allocation2 + $0x48] sm:$0xff] %v486_v55  ;;  %541 = vst [vmem:[#allocation2 + $0x50] sm:$0xff] %v6669_v47  ;;  %v361_v61 = vadd.f32 %v5460_v41, %v300_v49  ;;  %v245_v10 = vld [vmem:[%s5419_s10 + $0xa0] sm:$0x3]  ;;  %v619_v12 = vld [vmem:[%s6659_s3 + $0x10] sm:$0xff] }
  0x24   : > { %v6666_v60 = vmax.f32 %v5568_v48, 0.0  ;;  %v302_v62 = vmul.f32 %v5447_v36, %v241_v43  ;;  %v488_v5 = vsel %vm470_vm1, %v412_v56, 0.0  ;;  %v303_v9 = vmul.f32 %v5447_v36, %v242_v50  ;;  %v620_v20 = vld [vmem:[%s6659_s3 + $0x18] sm:$0xff]  ;;  %v246_v26 = vld [vmem:[%s5419_s10 + $0xa8] sm:$0xff]  ;;  %v247_v27 = vld [vmem:[%s5419_s10 + $0xb0] sm:$0xff] }
  0x25   : > { %4719 = vmatpush3.bf16.msra.mxu1 %v5482_v53  ;;  %v301_v53 = vmul.f32 %v5447_v36, %v240_v34  ;;  %v5602_v1 = vld [vmem:[#allocation2 + $0x19] sm:$0xff]  ;;  %v6665_v6 = vmax.f32 %v5584_v57, 0.0  ;;  %v5616_v11 = vpack.c.bf16 %v3477_v52, %v3476_v51  ;;  %542 = vst [vmem:[#allocation2 + $0x58] sm:$0x3] %v488_v5  ;;  %v415_v17 = vmax.f32 %v361_v61, 0.0  ;;  %v3481_v38 = vld [vmem:[%s6659_s3 + $0x2a8] sm:$0xff] }
  0x26   : > { %4847 = vmatpush3.bf16.msra.mxu0 %v5484_v54  ;;  %4721 = vmatprep.subr.bf16.mxu1 %v5500_v2  ;;  %v489_v14 = vsel %vm459_vm0, %v6666_v60, 0.0  ;;  %v5626_v18 = vadd.f32 %v5460_v41, %v302_v62  ;;  %v364_v22 = vadd.f32 %v5460_v41, %v303_v9  ;;  %v304_v23 = vmul.f32 %v5447_v36, %v243_v63  ;;  %v248_v35 = vld [vmem:[%s5419_s10 + $0xb8] sm:$0x3]  ;;  %v3480_v37 = vld [vmem:[%s6659_s3 + $0x2a0] sm:$0xff]  ;;  %v634_v50 = vld [vmem:[#allocation2 + $0x9] sm:$0xff] }
  0x27   : > { %4849 = vmatprep.subr.bf16.mxu0 %v5520_v15  ;;  %v5611_v7 = vadd.f32 %v5460_v41, %v301_v53  ;;  %4328 = vmatprep.mubr.f32.mxu0 %v5602_v1  ;;  %543 = vst [vmem:[#allocation2 + $0x60] sm:$0xff] %v489_v14  ;;  %544 = vst [vmem:[#allocation2 + $0x68] sm:$0xff] %v6665_v6  ;;  %v305_v24 = vmul.f32 %v5447_v36, %v244_v0  ;;  %v491_v31 = vsel %vm470_vm1, %v415_v17, 0.0  ;;  %v249_v53 = vld [vmem:[%s5419_s10 + $0xc0] sm:$0xff]  ;;  %v3482_v61 = vld [vmem:[%s6659_s3 + $0x2b0] sm:$0xff] }
  0x28   : > { %v6663_v33 = vmax.f32 %v5626_v18, 0.0  ;;  %v306_v34 = vmul.f32 %v5447_v36, %v245_v10  ;;  %545 = vst [vmem:[#allocation2 + $0x70] sm:$0x3] %v491_v31  ;;  %v418_v42 = vmax.f32 %v364_v22, 0.0  ;;  %v365_v43 = vadd.f32 %v5460_v41, %v304_v23  ;;  %v251_v5 = vld [vmem:[%s5419_s10 + $0xd0] sm:$0x3] }
  0x29   : > { %4723 = vmatpush3.bf16.msra.mxu1 %v5500_v2  ;;  %v6664_v21 = vmax.f32 %v5611_v7, 0.0  ;;  %v5642_v2 = vpack.c.bf16 %v3479_v4, %v3478_v59  ;;  %v5662_v49 = vadd.f32 %v5460_v41, %v305_v24  ;;  %v5664_v51 = vpack.c.bf16 %v620_v20, %v619_v12  ;;  %v250_v59 = vld [vmem:[%s5419_s10 + $0xc8] sm:$0xff]  ;;  %v3483_v10 = vld [vmem:[%s6659_s3 + $0x2b8] sm:$0xff]  ;;  %v621_v12 = vld [vmem:[%s6659_s3 + $0x20] sm:$0xff] }
  0x2a   : > { %4851 = vmatpush3.bf16.msra.mxu0 %v5520_v15  ;;  %4725 = vmatprep.subr.bf16.mxu1 %v5540_v28  ;;  %547 = vst [vmem:[#allocation2 + $0x80] sm:$0xff] %v6663_v33  ;;  %v367_v52 = vadd.f32 %v5460_v41, %v306_v34  ;;  %v307_v55 = vmul.f32 %v5447_v36, %v246_v26  ;;  %v494_v62 = vsel %vm470_vm1, %v418_v42, 0.0  ;;  %v5679_v63 = vmax.f32 %v365_v43, 0.0  ;;  %v1746_v9 = vld [vmem:[#allocation2 + $0x21] sm:$0xff]  ;;  %v252_v43 = vld [vmem:[%s5419_s10 + $0xd8] sm:$0xff]  ;;  %v271_v6 = vld [vmem:[%s5419_s10 + $0x170] sm:$0xff] }
  0x2b   : > { %4853 = vmatprep.subr.bf16.mxu0 %v5564_v44  ;;  %v492_v40 = vsel %vm459_vm0, %v6664_v21, 0.0  ;;  %v308_v56 = vmul.f32 %v5447_v36, %v247_v27  ;;  %v6662_v0 = vmax.f32 %v5662_v49, 0.0  ;;  %v309_v4 = vmul.f32 %v5447_v36, %v248_v35  ;;  %548 = vst [vmem:[#allocation2 + $0x88] sm:$0x3] %v494_v62  ;;  %v622_v22 = vld [vmem:[%s6659_s3 + $0x28] sm:$0xff]  ;;  %v3484_v23 = vld [vmem:[%s6659_s3 + $0x2c0] sm:$0xff] }
  0x2c   : > { %546 = vst [vmem:[#allocation2 + $0x78] sm:$0xff] %v492_v40  ;;  %v421_v14 = vmax.f32 %v367_v52, 0.0  ;;  %v368_v17 = vadd.f32 %v5460_v41, %v307_v55  ;;  %v3485_v24 = vld [vmem:[%s6659_s3 + $0x2c8] sm:$0xff]  ;;  %v495_v26 = vsel %vm459_vm0, %v5679_v63, 0.0  ;;  %v310_v31 = vmul.f32 %v5447_v36, %v249_v53  ;;  %v1747_v35 = vld [vmem:[#allocation2 + $0x31] sm:$0xff]  ;;  %v253_v53 = vld [vmem:[%s5419_s10 + $0xe0] sm:$0xff] }
  0x2d   : > { %4727 = vmatpush3.bf16.msra.mxu1 %v5540_v28  ;;  %v5686_v28 = vpack.c.bf16 %v3481_v38, %v3480_v37  ;;  %v369_v20 = vadd.f32 %v5460_v41, %v308_v56  ;;  %550 = vst [vmem:[#allocation2 + $0x98] sm:$0xff] %v6662_v0  ;;  %v370_v27 = vadd.f32 %v5460_v41, %v309_v4  ;;  %549 = vst [vmem:[#allocation2 + $0x90] sm:$0xff] %v495_v26  ;;  %v255_v62 = vld [vmem:[%s5419_s10 + $0xf0] sm:$0xff]  ;;  %v1748_v4 = vld [vmem:[#allocation2 + $0x39] sm:$0xff] }
  0x2e   : > { %4855 = vmatpush3.bf16.msra.mxu0 %v5564_v44  ;;  %4729 = vmatprep.subr.bf16.mxu1 %v5589_v58  ;;  %v311_v34 = vmul.f32 %v5447_v36, %v250_v59  ;;  %v497_v37 = vsel %vm470_vm1, %v421_v14, 0.0  ;;  %v5716_v38 = vmax.f32 %v368_v17, 0.0  ;;  %v312_v42 = vmul.f32 %v5447_v36, %v251_v5  ;;  %v254_v59 = vld [vmem:[%s5419_s10 + $0xe8] sm:$0x3]  ;;  %v256_v14 = vld [vmem:[%s5419_s10 + $0xf8] sm:$0xff]  ;;  %v6108_v15 = vld [vmem:[#allocation2] sm:$0xff] }
  0x2f   : > { %4857 = vmatprep.subr.bf16.mxu0 %v5616_v11  ;;  %v5718_v40 = vmax.f32 %v369_v20, 0.0  ;;  %v5723_v52 = vpack.c.bf16 %v3483_v10, %v3482_v61  ;;  %551 = vst [vmem:[#allocation2 + $0xa0] sm:$0x3] %v497_v37  ;;  %v371_v55 = vadd.f32 %v5460_v41, %v310_v31  ;;  %v5732_v5 = vpack.c.bf16 %v622_v22, %v621_v12  ;;  %v257_v17 = vld [vmem:[%s5419_s10 + $0x100] sm:$0x3]  ;;  %v270_v21 = vld [vmem:[%s5419_s10 + $0x168] sm:$0xff] }
  0x30   : > { %4009 = vmatmul.mubr.f32.vlgmr.msra.gmra.mrb[0].mxu1 %v634_v50  ;;  %v424_v50 = vmax.f32 %v370_v27, 0.0  ;;  %v372_v56 = vadd.f32 %v5460_v41, %v311_v34  ;;  %v498_v61 = vsel %vm459_vm0, %v5716_v38, 0.0  ;;  %v373_v10 = vadd.f32 %v5460_v41, %v312_v42  ;;  %v625_v37 = vld [vmem:[%s6659_s3 + $0x40] sm:$0xff]  ;;  %v626_v42 = vld [vmem:[%s6659_s3 + $0x48] sm:$0xff]  ;;  %v3431_v44 = vld [vmem:[%s6659_s3 + $0x118] sm:$0xff] }
  0x31   : > { %4329 = vmatmul.mubr.f32.vlgmr.msra.gmra.mrb[0].mxu0 %v1746_v9  ;;  %4731 = vmatpush3.bf16.msra.mxu1 %v5589_v58  ;;  %v5734_v58 = vpack.c.bf16 %v3485_v24, %v3484_v23  ;;  %553 = vst [vmem:[#allocation2 + $0xb0] sm:$0xff] %v5718_v40  ;;  %552 = vst [vmem:[#allocation2 + $0xa8] sm:$0xff] %v498_v61  ;;  %v5746_v12 = vmax.f32 %v371_v55, 0.0  ;;  %v313_v22 = vmul.f32 %v5447_v36, %v252_v43  ;;  %v623_v23 = vld [vmem:[%s6659_s3 + $0x30] sm:$0xff]  ;;  %v624_v24 = vld [vmem:[%s6659_s3 + $0x38] sm:$0xff] }
  0x32   : > { %4859 = vmatpush3.bf16.msra.mxu0 %v5616_v11  ;;  %4011 = vmatprep.mubr.f32.mxu1 %v5602_v1  ;;  %v1749_v11 = vld [vmem:[#allocation2 + $0x49] sm:$0xff]  ;;  %v500_v1 = vsel %vm470_vm1, %v424_v50, 0.0  ;;  %v5748_v20 = vmax.f32 %v372_v56, 0.0  ;;  %v427_v26 = vmax.f32 %v373_v10, 0.0  ;;  %v314_v27 = vmul.f32 %v5447_v36, %v253_v53  ;;  %v1750_v55 = vld [vmem:[#allocation2 + $0x51] sm:$0xff]  ;;  %v5268_v46 = vld [vmem:[#allocation2 + $0x20] sm:$0xff] }
  0x33   : > { %4331 = vmatprep.mubr.f32.mxu0 %v1747_v35  ;;  %4861 = vmatprep.subr.bf16.mxu0 %v5642_v2  ;;  %554 = vst [vmem:[#allocation2 + $0xb8] sm:$0x3] %v500_v1  ;;  %v315_v31 = vmul.f32 %v5447_v36, %v254_v59  ;;  %v316_v34 = vmul.f32 %v5447_v36, %v255_v62  ;;  %v258_v61 = vld [vmem:[%s5419_s10 + $0x108] sm:$0xff]  ;;  %v3434_v30 = vld [vmem:[%s6659_s3 + $0x130] sm:$0xff]  ;;  %v5269_v19 = vld [vmem:[#allocation2 + $0x38] sm:$0xff] }
  0x34   : > { %4012 = vmatmul.mubr.f32.gmra.mrb[2].mxu1 %v1746_v9  ;;  %4733 = vmatprep.subr.bf16.mxu1 %v5664_v51  ;;  %v501_v9 = vsel %vm459_vm0, %v5746_v12, 0.0  ;;  %556 = vst [vmem:[#allocation2 + $0xc8] sm:$0xff] %v5748_v20  ;;  %v374_v43 = vadd.f32 %v5460_v41, %v313_v22  ;;  %v317_v50 = vmul.f32 %v5447_v36, %v256_v14  ;;  %v503_v56 = vsel %vm470_vm1, %v427_v26, 0.0  ;;  %v259_v22 = vld [vmem:[%s5419_s10 + $0x110] sm:$0xff]  ;;  %v260_v26 = vld [vmem:[%s5419_s10 + $0x118] sm:$0x3] }
  0x35   : > { %4332 = vmatmul.mubr.f32.gmra.mrb[2].mxu0 %v1748_v4  ;;  %4014 = vmatprep.mubr.f32.mxu1 %v1747_v35  ;;  %v318_v35 = vmul.f32 %v5447_v36, %v257_v17  ;;  %555 = vst [vmem:[#allocation2 + $0xc0] sm:$0xff] %v501_v9  ;;  %v375_v53 = vadd.f32 %v5460_v41, %v314_v27  ;;  %557 = vst [vmem:[#allocation2 + $0xd0] sm:$0x3] %v503_v56  ;;  %v3433_v54 = vld [vmem:[%s6659_s3 + $0x128] sm:$0xff]  ;;  %v3436_v13 = vld [vmem:[%s6659_s3 + $0x140] sm:$0xff] }
  0x36   : > { %4863 = vmatpush3.bf16.msra.mxu0 %v5642_v2  ;;  %4334 = vmatprep.mubr.f32.mxu0 %v1749_v11  ;;  %v376_v59 = vadd.f32 %v5460_v41, %v315_v31  ;;  %v377_v62 = vadd.f32 %v5460_v41, %v316_v34  ;;  %v1751_v2 = vld [vmem:[#allocation2 + $0x61] sm:$0xff]  ;;  %v5783_v10 = vpack.c.bf16 %v624_v24, %v623_v23  ;;  %v5785_v14 = vmax.f32 %v374_v43, 0.0  ;;  %v3526_v29 = vld [vmem:[%s6659_s3 + $0x410] sm:$0xff] }
  0x37   : > { %4865 = vmatprep.subr.bf16.mxu0 %v5686_v28  ;;  %4735 = vmatpush3.bf16.msra.mxu1 %v5664_v51  ;;  %v378_v17 = vadd.f32 %v5460_v41, %v317_v50  ;;  %v379_v1 = vadd.f32 %v5460_v41, %v318_v35  ;;  %v5792_v27 = vpack.c.bf16 %v626_v42, %v625_v37  ;;  %v5794_v51 = vmax.f32 %v375_v53, 0.0  ;;  %v261_v24 = vld [vmem:[%s5419_s10 + $0x120] sm:$0xff]  ;;  %v262_v34 = vld [vmem:[%s5419_s10 + $0x128] sm:$0xff]  ;;  %v263_v37 = vld [vmem:[%s5419_s10 + $0x130] sm:$0x3] }
  0x38   : > { %4015 = vmatmul.mubr.f32.gmra.mrb[4].mxu1 %v1748_v4  ;;  %4737 = vmatprep.subr.bf16.mxu1 %v5732_v5  ;;  %v430_v31 = vmax.f32 %v376_v59, 0.0  ;;  %v5796_v23 = vmax.f32 %v377_v62, 0.0  ;;  %v504_v9 = vsel %vm459_vm0, %v5785_v14, 0.0  ;;  %v319_v50 = vmul.f32 %v5447_v36, %v258_v61  ;;  %v1752_v42 = vld [vmem:[#allocation2 + $0x69] sm:$0xff]  ;;  %v1753_v62 = vld [vmem:[#allocation2 + $0x79] sm:$0xff] }
  0x39   : > { %4335 = vmatmul.mubr.f32.gmra.mrb[4].mxu0 %v1750_v55  ;;  %4017 = vmatprep.mubr.f32.mxu1 %v1749_v11  ;;  %v5803_v43 = vmax.f32 %v378_v17, 0.0  ;;  %v433_v4 = vmax.f32 %v379_v1, 0.0  ;;  %v3486_v35 = vld [vmem:[%s6659_s3 + $0x2d0] sm:$0xff]  ;;  %v3487_v11 = vld [vmem:[%s6659_s3 + $0x2d8] sm:$0xff]  ;;  %558 = vst [vmem:[#allocation2 + $0xd8] sm:$0xff] %v504_v9  ;;  %559 = vst [vmem:[#allocation2 + $0xe0] sm:$0xff] %v5794_v51  ;;  %v320_v53 = vmul.f32 %v5447_v36, %v259_v22 }
  0x3a   : > { %4867 = vmatpush3.bf16.msra.mxu0 %v5686_v28  ;;  %4337 = vmatprep.mubr.f32.mxu0 %v1751_v2  ;;  %v506_v56 = vsel %vm470_vm1, %v430_v31, 0.0  ;;  %v507_v28 = vsel %vm459_vm0, %v5796_v23, 0.0  ;;  %v321_v59 = vmul.f32 %v5447_v36, %v260_v26  ;;  %v627_v17 = vld [vmem:[%s6659_s3 + $0x50] sm:$0xff]  ;;  %v628_v1 = vld [vmem:[%s6659_s3 + $0x58] sm:$0xff]  ;;  %v380_v22 = vadd.f32 %v5460_v41, %v319_v50 }
  0x3b   : > { %4869 = vmatprep.subr.bf16.mxu0 %v5723_v52  ;;  %4739 = vmatpush3.bf16.msra.mxu1 %v5732_v5  ;;  %560 = vst [vmem:[#allocation2 + $0xe8] sm:$0x3] %v506_v56  ;;  %561 = vst [vmem:[#allocation2 + $0xf0] sm:$0xff] %v507_v28  ;;  %v509_v61 = vsel %vm470_vm1, %v433_v4, 0.0  ;;  %v322_v5 = vmul.f32 %v5447_v36, %v261_v24  ;;  %v323_v26 = vmul.f32 %v5447_v36, %v262_v34  ;;  %v264_v56 = vld [vmem:[%s5419_s10 + $0x138] sm:$0xff]  ;;  %v265_v28 = vld [vmem:[%s5419_s10 + $0x140] sm:$0xff] }
  0x3c   : > { %562 = vst [vmem:[#allocation2 + $0xf8] sm:$0xff] %v5803_v43  ;;  %4018 = vmatmul.mubr.f32.gmra.mrb[6].mxu1 %v1750_v55  ;;  %4741 = vmatprep.subr.bf16.mxu1 %v5783_v10  ;;  %563 = vst [vmem:[#allocation2 + $0x100] sm:$0x3] %v509_v61  ;;  %v381_v31 = vadd.f32 %v5460_v41, %v320_v53  ;;  %v382_v9 = vadd.f32 %v5460_v41, %v321_v59  ;;  %v5843_v24 = vmax.f32 %v380_v22, 0.0  ;;  %v266_v61 = vld [vmem:[%s5419_s10 + $0x148] sm:$0x3] }
  0x3d   : > { %v324_v4 = vmul.f32 %v5447_v36, %v263_v37  ;;  %4338 = vmatmul.mubr.f32.gmra.mrb[6].mxu0 %v1752_v42  ;;  %4020 = vmatprep.mubr.f32.mxu1 %v1751_v2  ;;  %v5841_v50 = vpack.c.bf16 %v3487_v11, %v3486_v35  ;;  %v383_v55 = vadd.f32 %v5460_v41, %v322_v5  ;;  %v1754_v37 = vld [vmem:[#allocation2 + $0x81] sm:$0xff]  ;;  %v267_v11 = vld [vmem:[%s5419_s10 + $0x150] sm:$0xff]  ;;  %v268_v22 = vld [vmem:[%s5419_s10 + $0x158] sm:$0xff] }
  0x3e   : > { %v384_v34 = vadd.f32 %v5460_v41, %v323_v26  ;;  %4871 = vmatpush3.bf16.msra.mxu0 %v5723_v52  ;;  %4340 = vmatprep.mubr.f32.mxu0 %v1753_v62  ;;  %v5850_v53 = vpack.c.bf16 %v628_v1, %v627_v17  ;;  %v5852_v59 = vmax.f32 %v381_v31, 0.0  ;;  %v436_v2 = vmax.f32 %v382_v9, 0.0  ;;  %v1755_v5 = vld [vmem:[#allocation2 + $0x91] sm:$0xff]  ;;  %v269_v31 = vld [vmem:[%s5419_s10 + $0x160] sm:$0x3] }
  0x3f   : > { %v385_v35 = vadd.f32 %v5460_v41, %v324_v4  ;;  %4873 = vmatprep.subr.bf16.mxu0 %v5734_v58  ;;  %4743 = vmatpush3.bf16.msra.mxu1 %v5783_v10  ;;  %v510_v52 = vsel %vm459_vm0, %v5843_v24, 0.0  ;;  %v5862_v26 = vmax.f32 %v383_v55, 0.0  ;;  %v325_v1 = vmul.f32 %v5447_v36, %v264_v56  ;;  %v3488_v9 = vld [vmem:[%s6659_s3 + $0x2e0] sm:$0xff]  ;;  %v3489_v10 = vld [vmem:[%s6659_s3 + $0x2e8] sm:$0xff] }
  0x40   : > { %v5864_v17 = vmax.f32 %v384_v34, 0.0  ;;  %4021 = vmatmul.mubr.f32.gmra.mrb[8].mxu1 %v1752_v42  ;;  %4745 = vmatprep.subr.bf16.mxu1 %v5792_v27  ;;  %564 = vst [vmem:[#allocation2 + $0x108] sm:$0xff] %v510_v52  ;;  %565 = vst [vmem:[#allocation2 + $0x110] sm:$0xff] %v5852_v59  ;;  %v512_v4 = vsel %vm470_vm1, %v436_v2, 0.0  ;;  %v326_v56 = vmul.f32 %v5447_v36, %v265_v28  ;;  %v629_v52 = vld [vmem:[%s6659_s3 + $0x60] sm:$0xff]  ;;  %v630_v28 = vld [vmem:[%s6659_s3 + $0x68] sm:$0xff] }
  0x41   : > { %v439_v55 = vmax.f32 %v385_v35, 0.0  ;;  %v327_v42 = vmul.f32 %v5447_v36, %v266_v61  ;;  %4341 = vmatmul.mubr.f32.gmra.mrb[8].mxu0 %v1754_v37  ;;  %4023 = vmatprep.mubr.f32.mxu1 %v1753_v62  ;;  %566 = vst [vmem:[#allocation2 + $0x118] sm:$0x3] %v512_v4  ;;  %v513_v34 = vsel %vm459_vm0, %v5862_v26, 0.0  ;;  %v386_v61 = vadd.f32 %v5460_v41, %v325_v1  ;;  %v1756_v35 = vld [vmem:[#allocation2 + $0x99] sm:$0xff] }
  0x42   : > { %568 = vst [vmem:[#allocation2 + $0x128] sm:$0xff] %v5864_v17  ;;  %v328_v62 = vmul.f32 %v5447_v36, %v267_v11  ;;  %v329_v2 = vmul.f32 %v5447_v36, %v268_v22  ;;  %4875 = vmatpush3.bf16.msra.mxu0 %v5734_v58  ;;  %4343 = vmatprep.mubr.f32.mxu0 %v1755_v5  ;;  %567 = vst [vmem:[#allocation2 + $0x120] sm:$0xff] %v513_v34  ;;  %v1757_v11 = vld [vmem:[#allocation2 + $0xa9] sm:$0xff] }
  0x43   : > { %v515_v4 = vsel %vm470_vm1, %v439_v55, 0.0  ;;  %v387_v0 = vadd.f32 %v5460_v41, %v326_v56  ;;  %v388_v33 = vadd.f32 %v5460_v41, %v327_v42  ;;  %v330_v1 = vmul.f32 %v5447_v36, %v269_v31  ;;  %4877 = vmatprep.subr.bf16.mxu0 %v5841_v50  ;;  %4747 = vmatpush3.bf16.msra.mxu1 %v5792_v27  ;;  %v272_v56 = vld [vmem:[%s5419_s10 + $0x178] sm:$0x3]  ;;  %v3490_v31 = vld [vmem:[%s6659_s3 + $0x2f0] sm:$0xff] }
  0x44   : > { %v4880_v22 = vpack.c.bf16 %v3489_v10, %v3488_v9  ;;  %569 = vst [vmem:[#allocation2 + $0x130] sm:$0x3] %v515_v4  ;;  %v5902_v58 = vmax.f32 %v386_v61, 0.0  ;;  %v389_v34 = vadd.f32 %v5460_v41, %v328_v62  ;;  %v390_v55 = vadd.f32 %v5460_v41, %v329_v2  ;;  %4024 = vmatmul.mubr.f32.gmra.mrb[10].mxu1 %v1754_v37  ;;  %v3491_v9 = vld [vmem:[%s6659_s3 + $0x2f8] sm:$0xff]  ;;  %v631_v4 = vld [vmem:[%s6659_s3 + $0x70] sm:$0xff] }
  0x45   : > { %4749 = vmatprep.subr.bf16.mxu1 %v5850_v53  ;;  %v4752_v27 = vpack.c.bf16 %v630_v28, %v629_v52  ;;  %v5915_v10 = vmax.f32 %v387_v0, 0.0  ;;  %v442_v42 = vmax.f32 %v388_v33, 0.0  ;;  %v391_v61 = vadd.f32 %v5460_v41, %v330_v1  ;;  %4344 = vmatmul.mubr.f32.gmra.mrb[10].mxu0 %v1756_v35  ;;  %v632_v33 = vld [vmem:[%s6659_s3 + $0x78] sm:$0xff] }
  0x46   : > { %4026 = vmatprep.mubr.f32.mxu1 %v1755_v5  ;;  %v516_v37 = vsel %vm459_vm0, %v5902_v58, 0.0  ;;  %v5921_v62 = vmax.f32 %v389_v34, 0.0  ;;  %v5923_v2 = vmax.f32 %v390_v55, 0.0  ;;  %v331_v0 = vmul.f32 %v5447_v36, %v270_v21  ;;  %4879 = vmatpush3.bf16.msra.mxu0 %v5841_v50  ;;  %v1758_v5 = vld [vmem:[#allocation2 + $0xb1] sm:$0xff]  ;;  %v1759_v55 = vld [vmem:[#allocation2 + $0xc1] sm:$0xff]  ;;  %v654_v45 = vld [vmem:[#allocation2 + $0xf9] sm:$0xff] }
  0x47   : > { %4346 = vmatprep.mubr.f32.mxu0 %v1757_v11  ;;  %570 = vst [vmem:[#allocation2 + $0x138] sm:$0xff] %v516_v37  ;;  %571 = vst [vmem:[#allocation2 + $0x140] sm:$0xff] %v5915_v10  ;;  %v518_v52 = vsel %vm470_vm1, %v442_v42, 0.0  ;;  %v445_v28 = vmax.f32 %v391_v61, 0.0  ;;  %v332_v1 = vmul.f32 %v5447_v36, %v271_v6  ;;  %v333_v34 = vmul.f32 %v5447_v36, %v272_v56  ;;  %v3492_v21 = vld [vmem:[%s6659_s3 + $0x300] sm:$0xff]  ;;  %v3493_v56 = vld [vmem:[%s6659_s3 + $0x308] sm:$0xff] }
  0x48   : > { %4881 = vmatprep.subr.bf16.mxu0 %v4880_v22  ;;  %v4884_v60 = vpack.c.bf16 %v3491_v9, %v3490_v31  ;;  %4751 = vmatpush3.bf16.msra.mxu1 %v5850_v53  ;;  %572 = vst [vmem:[#allocation2 + $0x148] sm:$0x3] %v518_v52  ;;  %v519_v50 = vsel %vm459_vm0, %v5921_v62, 0.0  ;;  %574 = vst [vmem:[#allocation2 + $0x158] sm:$0xff] %v5923_v2  ;;  %v392_v6 = vadd.f32 %v5460_v41, %v331_v0  ;;  %v3428_v61 = vld [vmem:[%s6659_s3 + $0x100] sm:$0xff] }
  0x49   : > { %4027 = vmatmul.mubr.f32.gmra.mrb[12].mxu1 %v1756_v35  ;;  %4753 = vmatprep.subr.bf16.mxu1 %v4752_v27  ;;  %573 = vst [vmem:[#allocation2 + $0x150] sm:$0xff] %v519_v50  ;;  %v521_v31 = vsel %vm470_vm1, %v445_v28, 0.0  ;;  %v4756_v53 = vpack.c.bf16 %v632_v33, %v631_v4  ;;  %v393_v9 = vadd.f32 %v5460_v41, %v332_v1  ;;  %v3429_v35 = vld [vmem:[%s6659_s3 + $0x108] sm:$0xff]  ;;  %v5962_v33 = vld [vmem:[#allocation2 + $0x1a] sm:$0xff] }
  0x4a   : > { %v394_v42 = vadd.f32 %v5460_v41, %v333_v34  ;;  %4347 = vmatmul.mubr.f32.gmra.mrb[12].mxu0 %v1758_v5  ;;  %4029 = vmatprep.mubr.f32.mxu1 %v1757_v11  ;;  %575 = vst [vmem:[#allocation2 + $0x160] sm:$0x3] %v521_v31  ;;  %v5960_v37 = vmax.f32 %v392_v6, 0.0  ;;  %v1760_v4 = vld [vmem:[#allocation2 + $0xc9] sm:$0xff]  ;;  %v4888_v28 = vpack.c.bf16 %v3493_v56, %v3492_v21  ;;  %v273_v34 = vld [vmem:[%s5419_s10 + $0x180] sm:$0xff]  ;;  %v3495_v31 = vld [vmem:[%s6659_s3 + $0x318] sm:$0xff] }
  0x4b   : > { %4883 = vmatpush3.bf16.msra.mxu0 %v4880_v22  ;;  %4349 = vmatprep.mubr.f32.mxu0 %v1759_v55  ;;  %v5964_v0 = vmax.f32 %v393_v9, 0.0  ;;  %v5969_v11 = vpack.c.bf16 %v3429_v35, %v3428_v61  ;;  %v274_v50 = vld [vmem:[%s5419_s10 + $0x188] sm:$0xff]  ;;  %v275_v6 = vld [vmem:[%s5419_s10 + $0x190] sm:$0x3]  ;;  %v334_v21 = vmul.f32 %v5447_v36, %v273_v34 }
  0x4c   : > { %v448_v52 = vmax.f32 %v394_v42, 0.0  ;;  %4885 = vmatprep.subr.bf16.mxu0 %v4884_v60  ;;  %4755 = vmatpush3.bf16.msra.mxu1 %v4752_v27  ;;  %v522_v1 = vsel %vm459_vm0, %v5960_v37, 0.0  ;;  %v3494_v22 = vld [vmem:[%s6659_s3 + $0x310] sm:$0xff]  ;;  %v335_v56 = vmul.f32 %v5447_v36, %v274_v50  ;;  %v5987_v9 = vld [vmem:[#allocation2 + $0x22] sm:$0xff]  ;;  %v651_v42 = vld [vmem:[#allocation2 + $0xd9] sm:$0xff] }
  0x4d   : > { %4030 = vmatmul.mubr.f32.gmra.mrb[14].mxu1 %v1758_v5  ;;  %4757 = vmatprep.subr.bf16.mxu1 %v4756_v53  ;;  %576 = vst [vmem:[#allocation2 + $0x168] sm:$0xff] %v522_v1  ;;  %577 = vst [vmem:[#allocation2 + $0x170] sm:$0xff] %v5964_v0  ;;  %v336_v5 = vmul.f32 %v5447_v36, %v275_v6  ;;  %v5990_v61 = vadd.f32 %v5460_v41, %v334_v21  ;;  %v5996_v1 = vld [vmem:[#allocation2 + $0x32] sm:$0xff] }
  0x4e   : > { %v524_v27 = vsel %vm470_vm1, %v448_v52, 0.0  ;;  %4350 = vmatmul.mubr.f32.gmra.mrb[14].mxu0 %v1760_v4  ;;  %4032 = vmatprep.mubr.f32.mxu1 %v1759_v55  ;;  %v5993_v35 = vadd.f32 %v5460_v41, %v335_v56  ;;  %v4892_v36 = vpack.c.bf16 %v3495_v31, %v3494_v22  ;;  %v3497_v55 = vld [vmem:[%s6659_s3 + $0x328] sm:$0xff]  ;;  %v653_v6 = vld [vmem:[#allocation2 + $0xf1] sm:$0xff] }
  0x4f   : > { %578 = vst [vmem:[#allocation2 + $0x178] sm:$0x3] %v524_v27  ;;  %4887 = vmatpush3.bf16.msra.mxu0 %v4884_v60  ;;  %4408 = vmatprep.mubr.f32.mxu0 %v5962_v33  ;;  %v397_v52 = vadd.f32 %v5460_v41, %v336_v5  ;;  %v3496_v60 = vld [vmem:[%s6659_s3 + $0x320] sm:$0xff]  ;;  %v6668_v34 = vmax.f32 %v5990_v61, 0.0  ;;  %v6019_v27 = vld [vmem:[#allocation2 + $0x4a] sm:$0xff]  ;;  %v3499_v56 = vld [vmem:[%s6659_s3 + $0x338] sm:$0xff] }
  0x50   : > { %4889 = vmatprep.subr.bf16.mxu0 %v4888_v28  ;;  %4759 = vmatpush3.bf16.msra.mxu1 %v4756_v53  ;;  %v6667_v41 = vmax.f32 %v5993_v35, 0.0  ;;  %v652_v53 = vld [vmem:[#allocation2 + $0xe1] sm:$0xff]  ;;  %v3498_v21 = vld [vmem:[%s6659_s3 + $0x330] sm:$0xff] }
  0x51   : > { %4033 = vmatmul.mubr.f32.gmra.mrb[16].mxu1 %v1760_v4  ;;  %4761 = vmatprep.subr.bf16.mxu1 %v5969_v11  ;;  %v451_v50 = vmax.f32 %v397_v52, 0.0  ;;  %v6009_v4 = vld [vmem:[#allocation2 + $0x3a] sm:$0xff]  ;;  %v525_v22 = vsel %vm459_vm0, %v6668_v34, 0.0  ;;  %v6029_v5 = vld [vmem:[#allocation2 + $0x52] sm:$0xff]  ;;  %v6031_v52 = vld [vmem:[#allocation2 + $0x62] sm:$0xff] }
  0x52   : > { %4409 = vmatmul.mubr.f32.vlgmr.msra.gmra.mrb[0].mxu0 %v5987_v9  ;;  %4035 = vmatprep.mubr.f32.mxu1 %v651_v42  ;;  %580 = vst [vmem:[#allocation2 + $0x188] sm:$0xff] %v6667_v41  ;;  %579 = vst [vmem:[#allocation2 + $0x180] sm:$0xff] %v525_v22  ;;  %v655_v42 = vld [vmem:[#allocation2 + $0x109] sm:$0xff]  ;;  %v6043_v22 = vld [vmem:[#allocation2 + $0x7a] sm:$0xff] }
  0x53   : > { %4891 = vmatpush3.bf16.msra.mxu0 %v4888_v28  ;;  %4411 = vmatprep.mubr.f32.mxu0 %v5996_v1  ;;  %v527_v31 = vsel %vm470_vm1, %v451_v50, 0.0  ;;  %v4896_v28 = vpack.c.bf16 %v3497_v55, %v3496_v60  ;;  %v4900_v60 = vpack.c.bf16 %v3499_v56, %v3498_v21  ;;  %v3500_v55 = vld [vmem:[%s6659_s3 + $0x340] sm:$0xff]  ;;  %v3501_v50 = vld [vmem:[%s6659_s3 + $0x348] sm:$0xff]  ;;  %v3502_v21 = vld [vmem:[%s6659_s3 + $0x350] sm:$0xff] }
  0x54   : > { %4893 = vmatprep.subr.bf16.mxu0 %v4892_v36  ;;  %581 = vst [vmem:[#allocation2 + $0x190] sm:$0x3] %v527_v31  ;;  %v4904_v31 = vpack.c.bf16 %v3501_v50, %v3500_v55  ;;  %v3503_v56 = vld [vmem:[%s6659_s3 + $0x358] sm:$0xff]  ;;  %v660_v41 = vld [vmem:[#allocation2 + $0x141] sm:$0xff]  ;;  %v6079_v39 = vld [vmem:[#allocation2 + $0x169] sm:$0xff] }
  0x55   : > { %4036 = vmatmul.mubr.f32.gmra.mrb[18].mxu1 %v652_v53  ;;  %v656_v53 = vld [vmem:[#allocation2 + $0x111] sm:$0xff]  ;;  %v4908_v50 = vpack.c.bf16 %v3503_v56, %v3502_v21  ;;  %v662_v47 = vld [vmem:[#allocation2 + $0x159] sm:$0xff]  ;;  %6702 = vst [vmem:[#allocation10_spill] sm:$0xff] %v6079_v39 }
  0x56   : > { %4412 = vmatmul.mubr.f32.gmra.mrb[2].mxu0 %v6009_v4  ;;  %4038 = vmatprep.mubr.f32.mxu1 %v653_v6  ;;  %v657_v6 = vld [vmem:[#allocation2 + $0x121] sm:$0xff]  ;;  %v6055_v55 = vld [vmem:[#allocation2 + $0x92] sm:$0xff]  ;;  %v6067_v21 = vld [vmem:[#allocation2 + $0xaa] sm:$0xff] }
  0x57   : > { %4414 = vmatprep.mubr.f32.mxu0 %v6019_v27  ;;  %4895 = vmatpush3.bf16.msra.mxu0 %v4892_v36  ;;  %v6041_v36 = vld [vmem:[#allocation2 + $0x6a] sm:$0xff] }
  0x58   : > { %4897 = vmatprep.subr.bf16.mxu0 %v4896_v28  ;;  %v661_v34 = vld [vmem:[#allocation2 + $0x151] sm:$0xff] }
  0x59   : > { %4039 = vmatmul.mubr.f32.gmra.mrb[20].mxu1 %v654_v45  ;;  %v658_v45 = vld [vmem:[#allocation2 + $0x129] sm:$0xff]  ;;  %v6091_v16 = vld [vmem:[#allocation2 + $0x171] sm:$0xff] }
  0x5a   : > { %4415 = vmatmul.mubr.f32.gmra.mrb[4].mxu0 %v6029_v5  ;;  %4041 = vmatprep.mubr.f32.mxu1 %v655_v42  ;;  %v659_v42 = vld [vmem:[#allocation2 + $0x139] sm:$0xff]  ;;  %6703 = vst [vmem:[#allocation11_spill] sm:$0xff] %v6091_v16 }
  0x5b   : > { %4417 = vmatprep.mubr.f32.mxu0 %v6031_v52  ;;  %4899 = vmatpush3.bf16.msra.mxu0 %v4896_v28  ;;  %v6053_v28 = vld [vmem:[#allocation2 + $0x82] sm:$0xff] }
  0x5c   : > { %4901 = vmatprep.subr.bf16.mxu0 %v4900_v60 }
  0x5d   : > { %4042 = vmatmul.mubr.f32.gmra.mrb[22].mxu1 %v656_v53  ;;  %v3504_v53 = vld [vmem:[%s6659_s3 + $0x360] sm:$0xff] }
  0x5e   : > { %4418 = vmatmul.mubr.f32.gmra.mrb[6].mxu0 %v6041_v36  ;;  %4044 = vmatprep.mubr.f32.mxu1 %v657_v6  ;;  %v3505_v6 = vld [vmem:[%s6659_s3 + $0x368] sm:$0xff] }
  0x5f   : > { %4420 = vmatprep.mubr.f32.mxu0 %v6043_v22  ;;  %4903 = vmatpush3.bf16.msra.mxu0 %v4900_v60  ;;  %v6065_v60 = vld [vmem:[#allocation2 + $0x9a] sm:$0xff]  ;;  %v4912_v56 = vpack.c.bf16 %v3505_v6, %v3504_v53 }
  0x60   : > { %4905 = vmatprep.subr.bf16.mxu0 %v4904_v31  ;;  %v3508_v6 = vld [vmem:[%s6659_s3 + $0x380] sm:$0xff] }
  0x61   : > { %4045 = vmatmul.mubr.f32.gmra.mrb[24].mxu1 %v658_v45  ;;  %v3506_v45 = vld [vmem:[%s6659_s3 + $0x370] sm:$0xff] }
  0x62   : > { %4421 = vmatmul.mubr.f32.gmra.mrb[8].mxu0 %v6053_v28  ;;  %4047 = vmatprep.mubr.f32.mxu1 %v659_v42  ;;  %v3507_v42 = vld [vmem:[%s6659_s3 + $0x378] sm:$0xff] }
  0x63   : > { %4423 = vmatprep.mubr.f32.mxu0 %v6055_v55  ;;  %4907 = vmatpush3.bf16.msra.mxu0 %v4904_v31  ;;  %v6077_v31 = vld [vmem:[#allocation2 + $0xb2] sm:$0xff]  ;;  %v4916_v53 = vpack.c.bf16 %v3507_v42, %v3506_v45 }
  0x64   : > { %4909 = vmatprep.subr.bf16.mxu0 %v4908_v50  ;;  %v3430_v42 = vld [vmem:[%s6659_s3 + $0x110] sm:$0xff] }
  0x65   : > { %4048 = vmatmul.mubr.f32.gmra.mrb[26].mxu1 %v660_v41  ;;  %v6081_v41 = vld [vmem:[#allocation2 + $0xc2] sm:$0xff] }
  0x66   : > { %4424 = vmatmul.mubr.f32.gmra.mrb[10].mxu0 %v6065_v60  ;;  %4050 = vmatprep.mubr.f32.mxu1 %v661_v34  ;;  %v3509_v34 = vld [vmem:[%s6659_s3 + $0x388] sm:$0xff] }
  0x67   : > { %4426 = vmatprep.mubr.f32.mxu0 %v6067_v21  ;;  %4911 = vmatpush3.bf16.msra.mxu0 %v4908_v50  ;;  %v6094_v50 = vld [vmem:[#allocation2 + $0xca] sm:$0xff]  ;;  %v6098_v45 = vpack.c.bf16 %v3509_v34, %v3508_v6  ;;  %v6114_v6 = vld [vmem:[#allocation2 + $0xf2] sm:$0xff]  ;;  %v4764_v34 = vpack.c.bf16 %v3431_v44, %v3430_v42  ;;  %v6127_v44 = vld [vmem:[#allocation2 + $0xfa] sm:$0xff] }
  0x68   : > { %4913 = vmatprep.subr.bf16.mxu0 %v4912_v56  ;;  %v6129_v42 = vld [vmem:[#allocation2 + $0x10a] sm:$0xff] }
  0x69   : > { %4051 = vmatmul.mubr.f32.gmra.mrb[28].mxu1 %v662_v47  ;;  %v6096_v47 = vld [vmem:[#allocation2 + $0xda] sm:$0xff] }
  0x6a   : > { %4427 = vmatmul.mubr.f32.gmra.mrb[12].mxu0 %v6077_v31  ;;  %4053 = vmatprep.mubr.f32.mxu1 %v6079_v39 }
  0x6b   : > { %4429 = vmatprep.mubr.f32.mxu0 %v6081_v41  ;;  %4915 = vmatpush3.bf16.msra.mxu0 %v4912_v56  ;;  %v6112_v56 = vld [vmem:[#allocation2 + $0xe2] sm:$0xff] }
  0x6c   : > { %4917 = vmatprep.subr.bf16.mxu0 %v4916_v53 }
  0x6d   : > { %4054 = vmatmul.mubr.f32.gmra.mrb[30].mxu1 %v6091_v16  ;;  %v3432_v16 = vld [vmem:[%s6659_s3 + $0x120] sm:$0xff] }
  0x6e   : > { %4430 = vmatmul.mubr.f32.gmra.mrb[14].mxu0 %v6094_v50  ;;  %4088 = vmatprep.mubr.f32.mxu1 %v6108_v15  ;;  %v4768_v39 = vpack.c.bf16 %v3433_v54, %v3432_v16  ;;  %v6143_v54 = vld [vmem:[#allocation2 + $0x112] sm:$0xff] }
  0x6f   : > { %4432 = vmatprep.mubr.f32.mxu0 %v6096_v47  ;;  %4919 = vmatpush3.bf16.msra.mxu0 %v4916_v53  ;;  %v5267_v53 = vld [vmem:[#allocation2 + $0x18] sm:$0xff]  ;;  %6705 = vst [vmem:[#allocation12_spill] sm:$0xff] %v6143_v54 }
  0x70   : > { %4921 = vmatprep.subr.bf16.mxu0 %v6098_v45 }
  0x71   : > { %4089 = vmatmul.mubr.f32.vlgmr.msra.gmra.mrb[0].mxu1 %v6108_v15 }
  0x72   : > { %4433 = vmatmul.mubr.f32.gmra.mrb[16].mxu0 %v6112_v56  ;;  %4763 = vmatpush3.bf16.msra.mxu1 %v5969_v11  ;;  %v3435_v11 = vld [vmem:[%s6659_s3 + $0x138] sm:$0xff] }
  0x73   : > { %4091 = vmatprep.mubr.f32.mxu1 %v5267_v53  ;;  %4435 = vmatprep.mubr.f32.mxu0 %v6114_v6  ;;  %v6704_v53 = vmax.f32 %v5504_v3, 0.0  ;;  %v4772_v16 = vpack.c.bf16 %v3435_v11, %v3434_v30  ;;  %v3437_v3 = vld [vmem:[%s6659_s3 + $0x148] sm:$0xff]  ;;  %v6707_v11 = vmax.f32 %v5547_v32, 0.0  ;;  %v6179_v32 = vld [vmem:[#allocation2 + $0x152] sm:$0xff] }
  0x74   : > { %4765 = vmatprep.subr.bf16.mxu1 %v4764_v34  ;;  %v6159_v30 = vld [vmem:[#allocation2 + $0x12a] sm:$0xff] }
  0x75   : > { %4092 = vmatmul.mubr.f32.gmra.mrb[2].mxu1 %v5268_v46  ;;  %v6145_v46 = vld [vmem:[#allocation2 + $0x122] sm:$0xff] }
  0x76   : > { %4436 = vmatmul.mubr.f32.gmra.mrb[18].mxu0 %v6127_v44  ;;  %5275 = vmatprep.mubr.msk.f32.mxu1 %vm459_vm0, %v6704_v53  ;;  %v6706_v53 = vmax.f32 %v5534_v25, 0.0  ;;  %v3439_v25 = vld [vmem:[%s6659_s3 + $0x158] sm:$0xff] }
  0x77   : > { %4438 = vmatprep.mubr.f32.mxu0 %v6129_v42  ;;  %4767 = vmatpush3.bf16.msra.mxu1 %v4764_v34  ;;  %v4776_v34 = vpack.c.bf16 %v3437_v3, %v3436_v13  ;;  %v6177_v13 = vld [vmem:[#allocation2 + $0x142] sm:$0xff]  ;;  %v6709_v3 = vmax.f32 %v5584_v57, 0.0  ;;  %v6197_v57 = vld [vmem:[#allocation2 + $0x16a] sm:$0xff] }
  0x78   : > { %4769 = vmatprep.subr.bf16.mxu1 %v4768_v39 }
  0x79   : > { %4095 = vmatmul.mubr.f32.gmra.mrb[4].mxu1 %v5269_v19  ;;  %v6161_v19 = vld [vmem:[#allocation2 + $0x13a] sm:$0xff] }
  0x7a   : > { %4439 = vmatmul.mubr.f32.gmra.mrb[20].mxu0 %v6143_v54  ;;  %5276 = vmatprep.mubr.msk.f32.mxu1 %vm459_vm0, %v6706_v53  ;;  %v3438_v54 = vld [vmem:[%s6659_s3 + $0x150] sm:$0xff]  ;;  %v6708_v53 = vmax.f32 %v5568_v48, 0.0  ;;  %v3441_v48 = vld [vmem:[%s6659_s3 + $0x168] sm:$0xff] }
  0x7b   : > { %4441 = vmatprep.mubr.f32.mxu0 %v6145_v46  ;;  %4771 = vmatpush3.bf16.msra.mxu1 %v4768_v39  ;;  %v4780_v39 = vpack.c.bf16 %v3439_v25, %v3438_v54  ;;  %v6195_v54 = vld [vmem:[#allocation2 + $0x15a] sm:$0xff]  ;;  %v6711_v25 = vmax.f32 %v5626_v18, 0.0  ;;  %v2081_v18 = vld [vmem:[#allocation2 + $0x182] sm:$0xff] }
  0x7c   : > { %4773 = vmatprep.subr.bf16.mxu1 %v4772_v16 }
  0x7d   : > { %4098 = vmatmul.mubr.f32.gmra.mrb[6].mxu1 %v6707_v11  ;;  %v3440_v11 = vld [vmem:[%s6659_s3 + $0x160] sm:$0xff] }
  0x7e   : > { %4442 = vmatmul.mubr.f32.gmra.mrb[22].mxu0 %v6159_v30  ;;  %5277 = vmatprep.mubr.msk.f32.mxu1 %vm459_vm0, %v6708_v53  ;;  %v6710_v53 = vmax.f32 %v5611_v7, 0.0  ;;  %v3443_v7 = vld [vmem:[%s6659_s3 + $0x178] sm:$0xff] }
  0x7f   : > { %4444 = vmatprep.mubr.f32.mxu0 %v6161_v19  ;;  %4775 = vmatpush3.bf16.msra.mxu1 %v4772_v16  ;;  %v4784_v16 = vpack.c.bf16 %v3441_v48, %v3440_v11  ;;  %v6712_v48 = vmax.f32 %v5662_v49, 0.0 }
  0x80   : > { %4777 = vmatprep.subr.bf16.mxu1 %v4776_v34 }
  0x81   : > { %4101 = vmatmul.mubr.f32.gmra.mrb[8].mxu1 %v6709_v3  ;;  %v3442_v3 = vld [vmem:[%s6659_s3 + $0x170] sm:$0xff] }
  0x82   : > { %4445 = vmatmul.mubr.f32.gmra.mrb[24].mxu0 %v6177_v13  ;;  %5278 = vmatprep.mubr.msk.f32.mxu1 %vm459_vm0, %v6710_v53  ;;  %v4788_v11 = vpack.c.bf16 %v3443_v7, %v3442_v3  ;;  %v3444_v53 = vld [vmem:[%s6659_s3 + $0x180] sm:$0xff]  ;;  %v6226_v3 = vld [vmem:[#allocation2 + $0x30] sm:$0xff] }
  0x83   : > { %4447 = vmatprep.mubr.f32.mxu0 %v6179_v32  ;;  %4779 = vmatpush3.bf16.msra.mxu1 %v4776_v34  ;;  %v6212_v34 = vld [vmem:[#allocation2 + $0x172] sm:$0xff]  ;;  %6713 = vst [vmem:[#allocation13_spill] sm:$0xff] %v6226_v3 }
  0x84   : > { %4781 = vmatprep.subr.bf16.mxu1 %v4780_v39  ;;  %v3510_v7 = vld [vmem:[%s6659_s3 + $0x390] sm:$0xff] }
  0x85   : > { %4104 = vmatmul.mubr.f32.gmra.mrb[10].mxu1 %v6711_v25  ;;  %v3445_v25 = vld [vmem:[%s6659_s3 + $0x188] sm:$0xff] }
  0x86   : > { %4448 = vmatmul.mubr.f32.gmra.mrb[26].mxu0 %v6195_v54  ;;  %5279 = vmatprep.mubr.msk.f32.mxu1 %vm459_vm0, %v5679_v63  ;;  %v6228_v49 = vpack.c.bf16 %v3445_v25, %v3444_v53  ;;  %v3512_v25 = vld [vmem:[%s6659_s3 + $0x3a0] sm:$0xff] }
  0x87   : > { %4450 = vmatprep.mubr.f32.mxu0 %v6197_v57  ;;  %4783 = vmatpush3.bf16.msra.mxu1 %v4780_v39  ;;  %v2082_v39 = vld [vmem:[#allocation2 + $0x18a] sm:$0xff] }
  0x88   : > { %4785 = vmatprep.subr.bf16.mxu1 %v4784_v16 }
  0x89   : > { %4107 = vmatmul.mubr.f32.gmra.mrb[12].mxu1 %v6712_v48  ;;  %v3511_v48 = vld [vmem:[%s6659_s3 + $0x398] sm:$0xff] }
  0x8a   : > { %4451 = vmatmul.mubr.f32.gmra.mrb[28].mxu0 %v6212_v34  ;;  %5280 = vmatprep.mubr.msk.f32.mxu1 %vm459_vm0, %v5716_v38  ;;  %v4924_v53 = vpack.c.bf16 %v3511_v48, %v3510_v7  ;;  %v6261_v7 = vld [vmem:[#allocation2 + $0x60] sm:$0xff] }
  0x8b   : > { %4453 = vmatprep.mubr.f32.mxu0 %v2081_v18  ;;  %4787 = vmatpush3.bf16.msra.mxu1 %v4784_v16  ;;  %v6241_v16 = vld [vmem:[#allocation2 + $0x38] sm:$0xff]  ;;  %v6243_v18 = vld [vmem:[#allocation2 + $0x48] sm:$0xff]  ;;  %6716 = vst [vmem:[#allocation16_spill] sm:$0xff] %v6261_v7 }
  0x8c   : > { %4789 = vmatprep.subr.bf16.mxu1 %v4788_v11  ;;  %6714 = vst [vmem:[#allocation14_spill] sm:$0xff] %v6241_v16 }
  0x8d   : > { %4110 = vmatmul.mubr.f32.gmra.mrb[14].mxu1 %v5718_v40 }
  0x8e   : > { %4454 = vmatmul.mubr.f32.gmra.mrb[30].mxu0 %v2082_v39  ;;  %5281 = vmatprep.mubr.msk.f32.mxu1 %vm459_vm0, %v5746_v12  ;;  %v3513_v39 = vld [vmem:[%s6659_s3 + $0x3a8] sm:$0xff] }
  0x8f   : > { %4488 = vmatprep.mubr.f32.mxu0 %v6226_v3  ;;  %4791 = vmatpush3.bf16.msra.mxu1 %v4788_v11  ;;  %v6259_v11 = vld [vmem:[#allocation2 + $0x50] sm:$0xff]  ;;  %v4928_v48 = vpack.c.bf16 %v3513_v39, %v3512_v25  ;;  %v3515_v3 = vld [vmem:[%s6659_s3 + $0x3b8] sm:$0xff]  ;;  %v3516_v39 = vld [vmem:[%s6659_s3 + $0x3c0] sm:$0xff] }
  0x90   : > { %4793 = vmatprep.subr.bf16.mxu1 %v6228_v49  ;;  %6715 = vst [vmem:[#allocation15_spill] sm:$0xff] %v6259_v11 }
  0x91   : > { %4113 = vmatmul.mubr.f32.gmra.mrb[16].mxu1 %v5748_v20 }
  0x92   : > { %4489 = vmatmul.mubr.f32.vlgmr.msra.gmra.mrb[0].mxu0 %v6241_v16  ;;  %5282 = vmatprep.mubr.msk.f32.mxu1 %vm459_vm0, %v5785_v14  ;;  %v3514_v16 = vld [vmem:[%s6659_s3 + $0x3b0] sm:$0xff] }
  0x93   : > { %4923 = vmatpush3.bf16.msra.mxu0 %v6098_v45  ;;  %4491 = vmatprep.mubr.f32.mxu0 %v6243_v18  ;;  %v6275_v45 = vld [vmem:[#allocation2 + $0x68] sm:$0xff]  ;;  %v4932_v25 = vpack.c.bf16 %v3515_v3, %v3514_v16  ;;  %v3518_v16 = vld [vmem:[%s6659_s3 + $0x3d0] sm:$0xff] }
  0x94   : > { %4925 = vmatprep.subr.bf16.mxu0 %v4924_v53  ;;  %6717 = vst [vmem:[#allocation17_spill] sm:$0xff] %v6275_v45 }
  0x95   : > { %4116 = vmatmul.mubr.f32.gmra.mrb[18].mxu1 %v5794_v51 }
  0x96   : > { %4492 = vmatmul.mubr.f32.gmra.mrb[2].mxu0 %v6259_v11  ;;  %5283 = vmatprep.mubr.msk.f32.mxu1 %vm459_vm0, %v5796_v23  ;;  %v3517_v11 = vld [vmem:[%s6659_s3 + $0x3c8] sm:$0xff] }
  0x97   : > { %4494 = vmatprep.mubr.f32.mxu0 %v6261_v7  ;;  %4927 = vmatpush3.bf16.msra.mxu0 %v4924_v53  ;;  %v5270_v7 = vld [vmem:[#allocation2 + $0x78] sm:$0xff]  ;;  %v4936_v3 = vpack.c.bf16 %v3517_v11, %v3516_v39 }
  0x98   : > { %4929 = vmatprep.subr.bf16.mxu0 %v4928_v48  ;;  %v3519_v53 = vld [vmem:[%s6659_s3 + $0x3d8] sm:$0xff] }
  0x99   : > { %4119 = vmatmul.mubr.f32.gmra.mrb[20].mxu1 %v5803_v43  ;;  %v4940_v11 = vpack.c.bf16 %v3519_v53, %v3518_v16  ;;  %v3523_v39 = vld [vmem:[%s6659_s3 + $0x3f8] sm:$0xff]  ;;  %v3446_v53 = vld [vmem:[%s6659_s3 + $0x190] sm:$0xff] }
  0x9a   : > { %4495 = vmatmul.mubr.f32.gmra.mrb[4].mxu0 %v6275_v45  ;;  %5284 = vmatprep.mubr.msk.f32.mxu1 %vm459_vm0, %v5843_v24  ;;  %v5271_v45 = vld [vmem:[#allocation2 + $0x80] sm:$0xff] }
  0x9b   : > { %4497 = vmatprep.mubr.f32.mxu0 %v5270_v7  ;;  %4931 = vmatpush3.bf16.msra.mxu0 %v4928_v48  ;;  %v3520_v7 = vld [vmem:[%s6659_s3 + $0x3e0] sm:$0xff]  ;;  %v3521_v48 = vld [vmem:[%s6659_s3 + $0x3e8] sm:$0xff] }
  0x9c   : > { %4933 = vmatprep.subr.bf16.mxu0 %v4932_v25 }
  0x9d   : > { %4122 = vmatmul.mubr.f32.gmra.mrb[22].mxu1 %v5852_v59 }
  0x9e   : > { %4498 = vmatmul.mubr.f32.gmra.mrb[6].mxu0 %v5271_v45  ;;  %5285 = vmatprep.mubr.msk.f32.mxu1 %vm459_vm0, %v5862_v26  ;;  %v5272_v45 = vld [vmem:[#allocation2 + $0x98] sm:$0xff] }
  0x9f   : > { %5286 = vmatprep.mubr.msk.f32.mxu0 %vm459_vm0, %v5679_v63  ;;  %4935 = vmatpush3.bf16.msra.mxu0 %v4932_v25  ;;  %v4944_v63 = vpack.c.bf16 %v3521_v48, %v3520_v7  ;;  %v3522_v25 = vld [vmem:[%s6659_s3 + $0x3f0] sm:$0xff]  ;;  %v3448_v7 = vld [vmem:[%s6659_s3 + $0x1a0] sm:$0xff]  ;;  %v3449_v48 = vld [vmem:[%s6659_s3 + $0x1a8] sm:$0xff] }
  0xa0   : > { %4937 = vmatprep.subr.bf16.mxu0 %v4936_v3 }
  0xa1   : > { %4125 = vmatmul.mubr.f32.gmra.mrb[24].mxu1 %v5864_v17 }
  0xa2   : > { %4501 = vmatmul.mubr.f32.gmra.mrb[8].mxu0 %v5272_v45  ;;  %5287 = vmatprep.mubr.msk.f32.mxu1 %vm459_vm0, %v5902_v58  ;;  %v2672_v45 = vld [vmem:[#allocation2 + $0x91] sm:$0xff] }
  0xa3   : > { %5288 = vmatprep.mubr.msk.f32.mxu0 %vm459_vm0, %v5716_v38  ;;  %4939 = vmatpush3.bf16.msra.mxu0 %v4936_v3  ;;  %v4948_v38 = vpack.c.bf16 %v3523_v39, %v3522_v25  ;;  %v3524_v3 = vld [vmem:[%s6659_s3 + $0x400] sm:$0xff]  ;;  %v6720_v25 = vld [vmem:[#allocation12_spill] sm:$0xff] }
  0xa4   : > { %4941 = vmatprep.subr.bf16.mxu0 %v4940_v11  ;;  %v3535_v39 = vld [vmem:[%s6659_s3 + $0x458] sm:$0xff] }
  0xa5   : > { %4128 = vmatmul.mubr.f32.gmra.mrb[26].mxu1 %v5915_v10 }
  0xa6   : > { %4504 = vmatmul.mubr.f32.gmra.mrb[10].mxu0 %v5718_v40  ;;  %5289 = vmatprep.mubr.msk.f32.mxu1 %vm459_vm0, %v5921_v62  ;;  %v3525_v40 = vld [vmem:[%s6659_s3 + $0x408] sm:$0xff] }
  0xa7   : > { %5290 = vmatprep.mubr.msk.f32.mxu0 %vm459_vm0, %v5746_v12  ;;  %4943 = vmatpush3.bf16.msra.mxu0 %v4940_v11  ;;  %v1132_v12 = vld [vmem:[#allocation2 + $0x2] sm:$0xff]  ;;  %v6342_v16 = vpack.c.bf16 %v3525_v40, %v3524_v3  ;;  %v1133_v11 = vld [vmem:[#allocation2 + $0xa] sm:$0xff] }
  0xa8   : > { %4945 = vmatprep.subr.bf16.mxu0 %v4944_v63  ;;  %v3536_v40 = vld [vmem:[%s6659_s3 + $0x460] sm:$0xff] }
  0xa9   : > { %4131 = vmatmul.mubr.f32.gmra.mrb[28].mxu1 %v5923_v2 }
  0xaa   : > { %4507 = vmatmul.mubr.f32.gmra.mrb[12].mxu0 %v5748_v20  ;;  %5291 = vmatprep.mubr.msk.f32.mxu1 %vm459_vm0, %v5960_v37  ;;  %v3447_v20 = vld [vmem:[%s6659_s3 + $0x198] sm:$0xff] }
  0xab   : > { %5292 = vmatprep.mubr.msk.f32.mxu0 %vm459_vm0, %v5785_v14  ;;  %4947 = vmatpush3.bf16.msra.mxu0 %v4944_v63  ;;  %v4796_v14 = vpack.c.bf16 %v3447_v20, %v3446_v53  ;;  %v3539_v20 = vld [vmem:[%s6659_s3 + $0x478] sm:$0xff] }
  0xac   : > { %4949 = vmatprep.subr.bf16.mxu0 %v4948_v38 }
  0xad   : > { %4134 = vmatmul.mubr.f32.gmra.mrb[30].mxu1 %v5964_v0 }
  0xae   : > { %4510 = vmatmul.mubr.f32.gmra.mrb[14].mxu0 %v5794_v51  ;;  %4168 = vmatprep.mubr.f32.mxu1 %v1132_v12  ;;  %v4800_v51 = vpack.c.bf16 %v3449_v48, %v3448_v7  ;;  %v3537_v12 = vld [vmem:[%s6659_s3 + $0x468] sm:$0xff]  ;;  %v1439_v7 = vld [vmem:[#allocation2 + $0x18] sm:$0xff] }
  0xaf   : > { %5293 = vmatprep.mubr.msk.f32.mxu0 %vm459_vm0, %v5796_v23  ;;  %4951 = vmatpush3.bf16.msra.mxu0 %v4948_v38  ;;  %v3450_v23 = vld [vmem:[%s6659_s3 + $0x1b0] sm:$0xff]  ;;  %v4976_v53 = vpack.c.bf16 %v3537_v12, %v3536_v40  ;;  %v2977_v40 = vld [vmem:[#allocation2 + $0x82] sm:$0xff]  ;;  %v1463_v12 = vld [vmem:[#allocation2 + $0x138] sm:$0xff] }
  0xb0   : > { %4953 = vmatprep.subr.bf16.mxu0 %v6342_v16  ;;  %v2674_v38 = vld [vmem:[#allocation2 + $0xa9] sm:$0xff]  ;;  %v6500_v48 = vld [vmem:[#allocation2 + $0xf1] sm:$0xff] }
  0xb1   : > { %4169 = vmatmul.mubr.f32.vlgmr.msra.gmra.mrb[0].mxu1 %v1133_v11  ;;  %v6493_v11 = vld [vmem:[#allocation2 + $0xd9] sm:$0xff] }
  0xb2   : > { %4513 = vmatmul.mubr.f32.gmra.mrb[16].mxu0 %v5803_v43  ;;  %4795 = vmatpush3.bf16.msra.mxu1 %v6228_v49  ;;  %v3451_v43 = vld [vmem:[%s6659_s3 + $0x1b8] sm:$0xff]  ;;  %v3533_v49 = vld [vmem:[%s6659_s3 + $0x448] sm:$0xff] }
  0xb3   : > { %4171 = vmatprep.mubr.f32.mxu1 %v5962_v33  ;;  %5294 = vmatprep.mubr.msk.f32.mxu0 %vm459_vm0, %v5843_v24  ;;  %v4804_v24 = vpack.c.bf16 %v3451_v43, %v3450_v23  ;;  %v3452_v33 = vld [vmem:[%s6659_s3 + $0x1c0] sm:$0xff]  ;;  %v6722_v43 = vld [vmem:[#allocation3_spill] sm:$0xff] }
  0xb4   : > { %4797 = vmatprep.subr.bf16.mxu1 %v4796_v14  ;;  %v6515_v23 = vld [vmem:[#allocation2 + $0x121] sm:$0xff] }
  0xb5   : > { %4172 = vmatmul.mubr.f32.gmra.mrb[2].mxu1 %v5987_v9  ;;  %v3453_v9 = vld [vmem:[%s6659_s3 + $0x1c8] sm:$0xff] }
  0xb6   : > { %4516 = vmatmul.mubr.f32.gmra.mrb[18].mxu0 %v5852_v59  ;;  %4174 = vmatprep.mubr.f32.mxu1 %v5996_v1  ;;  %v4808_v59 = vpack.c.bf16 %v3453_v9, %v3452_v33  ;;  %v3455_v1 = vld [vmem:[%s6659_s3 + $0x1d8] sm:$0xff]  ;;  %v6522_v33 = vld [vmem:[#allocation2 + $0x129] sm:$0xff] }
  0xb7   : > { %5295 = vmatprep.mubr.msk.f32.mxu0 %vm459_vm0, %v5862_v26  ;;  %4799 = vmatpush3.bf16.msra.mxu1 %v4796_v14  ;;  %v3454_v26 = vld [vmem:[%s6659_s3 + $0x1d0] sm:$0xff]  ;;  %v6724_v9 = vld [vmem:[#allocation4_spill] sm:$0xff] }
  0xb8   : > { %4801 = vmatprep.subr.bf16.mxu1 %v4800_v51 }
  0xb9   : > { %4175 = vmatmul.mubr.f32.gmra.mrb[4].mxu1 %v6009_v4  ;;  %v3457_v4 = vld [vmem:[%s6659_s3 + $0x1e8] sm:$0xff] }
  0xba   : > { %4519 = vmatmul.mubr.f32.gmra.mrb[20].mxu0 %v5864_v17  ;;  %4177 = vmatprep.mubr.f32.mxu1 %v6019_v27  ;;  %v4812_v17 = vpack.c.bf16 %v3455_v1, %v3454_v26  ;;  %v3459_v27 = vld [vmem:[%s6659_s3 + $0x1f8] sm:$0xff]  ;;  %v6532_v1 = vld [vmem:[#allocation2 + $0x141] sm:$0xff] }
  0xbb   : > { %5296 = vmatprep.mubr.msk.f32.mxu0 %vm459_vm0, %v5902_v58  ;;  %4803 = vmatpush3.bf16.msra.mxu1 %v4800_v51  ;;  %v3456_v58 = vld [vmem:[%s6659_s3 + $0x1e0] sm:$0xff]  ;;  %v6726_v26 = vld [vmem:[#allocation16_spill] sm:$0xff] }
  0xbc   : > { %4805 = vmatprep.subr.bf16.mxu1 %v4804_v24  ;;  %v6721_v51 = vld [vmem:[#allocation13_spill] sm:$0xff] }
  0xbd   : > { %4178 = vmatmul.mubr.f32.gmra.mrb[6].mxu1 %v6029_v5  ;;  %v6719_v5 = vmax.f32 %v5993_v35, 0.0  ;;  %v2665_v35 = vld [vmem:[#allocation2 + $0x39] sm:$0xff] }
  0xbe   : > { %4522 = vmatmul.mubr.f32.gmra.mrb[22].mxu0 %v5915_v10  ;;  %4180 = vmatprep.mubr.f32.mxu1 %v6031_v52  ;;  %v4816_v10 = vpack.c.bf16 %v3457_v4, %v3456_v58  ;;  %v2666_v52 = vld [vmem:[#allocation2 + $0x49] sm:$0xff]  ;;  %v6727_v58 = vld [vmem:[#allocation5_spill] sm:$0xff] }
  0xbf   : > { %5297 = vmatprep.mubr.msk.f32.mxu0 %vm459_vm0, %v5921_v62  ;;  %4807 = vmatpush3.bf16.msra.mxu1 %v4804_v24  ;;  %v3458_v62 = vld [vmem:[%s6659_s3 + $0x1f0] sm:$0xff]  ;;  %v6723_v24 = vld [vmem:[#allocation14_spill] sm:$0xff]  ;;  %v6728_v4 = vld [vmem:[#allocation17_spill] sm:$0xff] }
  0xc0   : > { %4809 = vmatprep.subr.bf16.mxu1 %v4808_v59 }
  0xc1   : > { %4181 = vmatmul.mubr.f32.gmra.mrb[8].mxu1 %v6041_v36 }
  0xc2   : > { %4525 = vmatmul.mubr.f32.gmra.mrb[24].mxu0 %v5923_v2  ;;  %4183 = vmatprep.mubr.f32.mxu1 %v6043_v22  ;;  %v6718_v2 = vmax.f32 %v5990_v61, 0.0  ;;  %v3527_v61 = vld [vmem:[%s6659_s3 + $0x418] sm:$0xff]  ;;  %v3528_v22 = vld [vmem:[%s6659_s3 + $0x420] sm:$0xff] }
  0xc3   : > { %5298 = vmatprep.mubr.msk.f32.mxu0 %vm459_vm0, %v5960_v37  ;;  %4811 = vmatpush3.bf16.msra.mxu1 %v4808_v59  ;;  %v4820_v37 = vpack.c.bf16 %v3459_v27, %v3458_v62  ;;  %v4956_v36 = vpack.c.bf16 %v3527_v61, %v3526_v29  ;;  %v6725_v59 = vld [vmem:[#allocation15_spill] sm:$0xff]  ;;  %v6541_v62 = vld [vmem:[#allocation2 + $0x159] sm:$0xff]  ;;  %v6548_v29 = vld [vmem:[#allocation2 + $0x181] sm:$0xff] }
  0xc4   : > { %4813 = vmatprep.subr.bf16.mxu1 %v4812_v17  ;;  %v1449_v27 = vld [vmem:[#allocation2 + $0x90] sm:$0xff] }
  0xc5   : > { %4184 = vmatmul.mubr.f32.gmra.mrb[10].mxu1 %v6053_v28  ;;  %v3529_v28 = vld [vmem:[%s6659_s3 + $0x428] sm:$0xff]  ;;  %v6731_v61 = vld [vmem:[#allocation7_spill] sm:$0xff] }
  0xc6   : > { %4528 = vmatmul.mubr.f32.gmra.mrb[26].mxu0 %v5964_v0  ;;  %4186 = vmatprep.mubr.f32.mxu1 %v6055_v55  ;;  %v2664_v0 = vld [vmem:[#allocation2 + $0x31] sm:$0xff]  ;;  %v2668_v55 = vld [vmem:[#allocation2 + $0x61] sm:$0xff] }
  0xc7   : > { %5299 = vmatprep.mubr.msk.f32.mxu0 %vm459_vm0, %v6718_v2  ;;  %4815 = vmatpush3.bf16.msra.mxu1 %v4812_v17  ;;  %v6535_v17 = vld [vmem:[#allocation2 + $0x151] sm:$0xff]  ;;  %v6729_v2 = vld [vmem:[#allocation6_spill] sm:$0xff] }
  0xc8   : > { %4817 = vmatprep.subr.bf16.mxu1 %v4816_v10 }
  0xc9   : > { %4187 = vmatmul.mubr.f32.gmra.mrb[12].mxu1 %v6065_v60  ;;  %v4960_v60 = vpack.c.bf16 %v3529_v28, %v3528_v22  ;;  %v1453_v22 = vld [vmem:[#allocation2 + $0xc0] sm:$0xff] }
  0xca   : > { %4531 = vmatmul.mubr.f32.gmra.mrb[28].mxu0 %v6719_v5  ;;  %4189 = vmatprep.mubr.f32.mxu1 %v6067_v21  ;;  %v3530_v21 = vld [vmem:[%s6659_s3 + $0x430] sm:$0xff]  ;;  %v6730_v5 = vld [vmem:[#allocation10_spill] sm:$0xff]  ;;  %v2694_v28 = vld [vmem:[#allocation2 + $0x199] sm:$0xff] }
  0xcb   : > { %4533 = vmatprep.mubr.f32.mxu0 %v6108_v15  ;;  %4819 = vmatpush3.bf16.msra.mxu1 %v4816_v10  ;;  %v1448_v10 = vld [vmem:[#allocation2 + $0x80] sm:$0xff] }
  0xcc   : > { %4821 = vmatprep.subr.bf16.mxu1 %v4820_v37 }
  0xcd   : > { %4190 = vmatmul.mubr.f32.gmra.mrb[14].mxu1 %v6077_v31  ;;  %v3531_v31 = vld [vmem:[%s6659_s3 + $0x438] sm:$0xff] }
  0xce   : > { %4534 = vmatmul.mubr.f32.gmra.mrb[30].mxu0 %v6108_v15  ;;  %4192 = vmatprep.mubr.f32.mxu1 %v6081_v41  ;;  %v2667_v15 = vld [vmem:[#allocation2 + $0x51] sm:$0xff]  ;;  %v2669_v41 = vld [vmem:[#allocation2 + $0x69] sm:$0xff] }
  0xcf   : > { %4568 = vmatprep.mubr.f32.mxu0 %v2664_v0  ;;  %4823 = vmatpush3.bf16.msra.mxu1 %v4820_v37  ;;  %v1450_v37 = vld [vmem:[#allocation2 + $0x98] sm:$0xff]  ;;  %v1451_v0 = vld [vmem:[#allocation2 + $0xa8] sm:$0xff] }
  0xd0   : > { %4984 = vmatprep.subr.bf16.mxu1 %v5369_v8 }
  0xd1   : > { %4193 = vmatmul.mubr.f32.gmra.mrb[16].mxu1 %v6094_v50  ;;  %v2670_v50 = vld [vmem:[#allocation2 + $0x79] sm:$0xff] }
  0xd2   : > { %4569 = vmatmul.mubr.f32.vlgmr.msra.gmra.mrb[0].mxu0 %v2665_v35  ;;  %4195 = vmatprep.mubr.f32.mxu1 %v6096_v47  ;;  %v4964_v47 = vpack.c.bf16 %v3531_v31, %v3530_v21  ;;  %v6732_v35 = vld [vmem:[#allocation11_spill] sm:$0xff]  ;;  %v1455_v21 = vld [vmem:[#allocation2 + $0xd8] sm:$0xff] }
  0xd3   : > { %4955 = vmatpush3.bf16.msra.mxu0 %v6342_v16  ;;  %4571 = vmatprep.mubr.f32.mxu0 %v2666_v52  ;;  %v2676_v16 = vld [vmem:[#allocation2 + $0xc1] sm:$0xff]  ;;  %v1452_v52 = vld [vmem:[#allocation2 + $0xb0] sm:$0xff] }
  0xd4   : > { %4957 = vmatprep.subr.bf16.mxu0 %v4956_v36  ;;  %v2970_v31 = vld [vmem:[#allocation2 + $0x32] sm:$0xff] }
  0xd5   : > { %4196 = vmatmul.mubr.f32.gmra.mrb[18].mxu1 %v6112_v56  ;;  %v3532_v56 = vld [vmem:[%s6659_s3 + $0x440] sm:$0xff] }
  0xd6   : > { %4572 = vmatmul.mubr.f32.gmra.mrb[2].mxu0 %v2667_v15  ;;  %4198 = vmatprep.mubr.f32.mxu1 %v6114_v6  ;;  %v2671_v6 = vld [vmem:[#allocation2 + $0x81] sm:$0xff]  ;;  %v4968_v63 = vpack.c.bf16 %v3533_v49, %v3532_v56  ;;  %v6733_v15 = vld [vmem:[#allocation8_spill] sm:$0xff]  ;;  %v1457_v56 = vld [vmem:[#allocation2 + $0xf0] sm:$0xff] }
  0xd7   : > { %4574 = vmatprep.mubr.f32.mxu0 %v2668_v55  ;;  %4959 = vmatpush3.bf16.msra.mxu0 %v4956_v36  ;;  %v6553_v36 = vld [vmem:[#allocation2 + $0x189] sm:$0xff] }
  0xd8   : > { %4961 = vmatprep.subr.bf16.mxu0 %v4960_v60  ;;  %v1454_v55 = vld [vmem:[#allocation2 + $0xc8] sm:$0xff] }
  0xd9   : > { %4199 = vmatmul.mubr.f32.gmra.mrb[20].mxu1 %v6127_v44  ;;  %v3534_v44 = vld [vmem:[%s6659_s3 + $0x450] sm:$0xff] }
  0xda   : > { %4575 = vmatmul.mubr.f32.gmra.mrb[4].mxu0 %v2669_v41  ;;  %4201 = vmatprep.mubr.f32.mxu1 %v6129_v42  ;;  %v2673_v42 = vld [vmem:[#allocation2 + $0x99] sm:$0xff]  ;;  %v4972_v3 = vpack.c.bf16 %v3535_v39, %v3534_v44  ;;  %v2972_v49 = vld [vmem:[#allocation2 + $0x4a] sm:$0xff] }
  0xdb   : > { %4577 = vmatprep.mubr.f32.mxu0 %v2670_v50  ;;  %4963 = vmatpush3.bf16.msra.mxu0 %v4960_v60  ;;  %v2695_v60 = vld [vmem:[#allocation2 + $0x1a1] sm:$0xff]  ;;  %v1460_v44 = vld [vmem:[#allocation2 + $0x110] sm:$0xff] }
  0xdc   : > { %4965 = vmatprep.subr.bf16.mxu0 %v4964_v47  ;;  %v6734_v41 = vld [vmem:[#allocation9_spill] sm:$0xff]  ;;  %v2975_v39 = vld [vmem:[#allocation2 + $0x6a] sm:$0xff] }
  0xdd   : > { %4202 = vmatmul.mubr.f32.gmra.mrb[22].mxu1 %v6720_v25  ;;  %v1456_v50 = vld [vmem:[#allocation2 + $0xe0] sm:$0xff] }
  0xde   : > { %4578 = vmatmul.mubr.f32.gmra.mrb[6].mxu0 %v2671_v6  ;;  %4204 = vmatprep.mubr.f32.mxu1 %v6145_v46  ;;  %v2675_v46 = vld [vmem:[#allocation2 + $0xb1] sm:$0xff]  ;;  %v2974_v25 = vld [vmem:[#allocation2 + $0x62] sm:$0xff] }
  0xdf   : > { %4580 = vmatprep.mubr.f32.mxu0 %v2672_v45  ;;  %4967 = vmatpush3.bf16.msra.mxu0 %v4964_v47  ;;  %v2971_v47 = vld [vmem:[#allocation2 + $0x3a] sm:$0xff]  ;;  %v2973_v45 = vld [vmem:[#allocation2 + $0x52] sm:$0xff] }
  0xe0   : > { %4969 = vmatprep.subr.bf16.mxu0 %v4968_v63  ;;  %v1458_v6 = vld [vmem:[#allocation2 + $0xf8] sm:$0xff] }
  0xe1   : > { %4205 = vmatmul.mubr.f32.gmra.mrb[24].mxu1 %v6159_v30  ;;  %v3538_v30 = vld [vmem:[%s6659_s3 + $0x470] sm:$0xff] }
  0xe2   : > { %4581 = vmatmul.mubr.f32.gmra.mrb[8].mxu0 %v2673_v42  ;;  %4207 = vmatprep.mubr.f32.mxu1 %v6161_v19  ;;  %v2677_v19 = vld [vmem:[#allocation2 + $0xc9] sm:$0xff]  ;;  %v4980_v14 = vpack.c.bf16 %v3539_v20, %v3538_v30  ;;  %v1461_v42 = vld [vmem:[#allocation2 + $0x120] sm:$0xff] }
  0xe3   : > { %4583 = vmatprep.mubr.f32.mxu0 %v2674_v38  ;;  %4971 = vmatpush3.bf16.msra.mxu0 %v4968_v63  ;;  %v1459_v63 = vld [vmem:[#allocation2 + $0x108] sm:$0xff]  ;;  %v2976_v38 = vld [vmem:[#allocation2 + $0x7a] sm:$0xff]  ;;  %v1465_v30 = vld [vmem:[#allocation2 + $0x150] sm:$0xff] }
  0xe4   : > { %4973 = vmatprep.subr.bf16.mxu0 %v4972_v3  ;;  %v2980_v20 = vld [vmem:[#allocation2 + $0xaa] sm:$0xff] }
  0xe5   : > { %4208 = vmatmul.mubr.f32.gmra.mrb[26].mxu1 %v6177_v13  ;;  %v6498_v13 = vld [vmem:[#allocation2 + $0xe1] sm:$0xff] }
  0xe6   : > { %4584 = vmatmul.mubr.f32.gmra.mrb[10].mxu0 %v2675_v46  ;;  %4210 = vmatprep.mubr.f32.mxu1 %v6179_v32  ;;  %v1440_v32 = vld [vmem:[#allocation2 + $0x20] sm:$0xff]  ;;  %v2978_v46 = vld [vmem:[#allocation2 + $0x92] sm:$0xff] }
  0xe7   : > { %4586 = vmatprep.mubr.f32.mxu0 %v2676_v16  ;;  %4975 = vmatpush3.bf16.msra.mxu0 %v4972_v3  ;;  %v1462_v3 = vld [vmem:[#allocation2 + $0x128] sm:$0xff]  ;;  %v1464_v16 = vld [vmem:[#allocation2 + $0x140] sm:$0xff] }
  0xe8   : > { %4977 = vmatprep.subr.bf16.mxu0 %v4976_v53 }
  0xe9   : > { %4211 = vmatmul.mubr.f32.gmra.mrb[28].mxu1 %v6195_v54  ;;  %v6505_v54 = vld [vmem:[#allocation2 + $0xf9] sm:$0xff] }
  0xea   : > { %4587 = vmatmul.mubr.f32.gmra.mrb[12].mxu0 %v2677_v19  ;;  %4213 = vmatprep.mubr.f32.mxu1 %v6197_v57  ;;  %v6507_v57 = vld [vmem:[#allocation2 + $0x109] sm:$0xff]  ;;  %v1466_v19 = vld [vmem:[#allocation2 + $0x158] sm:$0xff] }
  0xeb   : > { %4589 = vmatprep.mubr.f32.mxu0 %v6493_v11  ;;  %4979 = vmatpush3.bf16.msra.mxu0 %v4976_v53  ;;  %v2979_v53 = vld [vmem:[#allocation2 + $0x9a] sm:$0xff] }
  0xec   : > { %4981 = vmatprep.subr.bf16.mxu0 %v4980_v14 }
  0xed   : > { %4214 = vmatmul.mubr.f32.gmra.mrb[30].mxu1 %v6212_v34  ;;  %v6513_v34 = vld [vmem:[#allocation2 + $0x111] sm:$0xff] }
  0xee   : > { %4590 = vmatmul.mubr.f32.gmra.mrb[14].mxu0 %v6498_v13  ;;  %4248 = vmatprep.mubr.f32.mxu1 %v1439_v7  ;;  %v1467_v7 = vld [vmem:[#allocation2 + $0x168] sm:$0xff] }
  0xef   : > { %4592 = vmatprep.mubr.f32.mxu0 %v6500_v48  ;;  %4983 = vmatpush3.bf16.msra.mxu0 %v4980_v14  ;;  %v2981_v14 = vld [vmem:[#allocation2 + $0xb2] sm:$0xff] }
  0xf1   : > { %4249 = vmatmul.mubr.f32.vlgmr.msra.gmra.mrb[0].mxu1 %v1440_v32  ;;  %v2982_v32 = vld [vmem:[#allocation2 + $0xc2] sm:$0xff] }
  0xf2   : > { %4593 = vmatmul.mubr.f32.gmra.mrb[16].mxu0 %v6505_v54  ;;  %4992 = vmatpush3.bf16.msra.mxu1 %v5369_v8  ;;  %v6525_v8 = vld [vmem:[#allocation2 + $0x139] sm:$0xff] }
  0xf3   : > { %4251 = vmatprep.mubr.f32.mxu1 %v6721_v51  ;;  %4595 = vmatprep.mubr.f32.mxu0 %v6507_v57  ;;  %v1468_v51 = vld [vmem:[#allocation2 + $0x170] sm:$0xff] }
  0xf4   : > { %4985 = vmatprep.subr.bf16.mxu1 %v6722_v43 }
  0xf5   : > { %4252 = vmatmul.mubr.f32.gmra.mrb[2].mxu1 %v6723_v24  ;;  %v2984_v24 = vld [vmem:[#allocation2 + $0xda] sm:$0xff] }
  0xf6   : > { %4596 = vmatmul.mubr.f32.gmra.mrb[18].mxu0 %v6513_v34  ;;  %4254 = vmatprep.mubr.f32.mxu1 %v6243_v18  ;;  %v1447_v18 = vld [vmem:[#allocation2 + $0x78] sm:$0xff] }
  0xf7   : > { %4598 = vmatprep.mubr.f32.mxu0 %v6515_v23  ;;  %4993 = vmatpush3.bf16.msra.mxu1 %v6722_v43  ;;  %v2983_v43 = vld [vmem:[#allocation2 + $0xca] sm:$0xff] }
  0xf8   : > { %4986 = vmatprep.subr.bf16.mxu1 %v6724_v9 }
  0xf9   : > { %4255 = vmatmul.mubr.f32.gmra.mrb[4].mxu1 %v6725_v59  ;;  %v2985_v59 = vld [vmem:[#allocation2 + $0xe2] sm:$0xff] }
  0xfa   : > { %4599 = vmatmul.mubr.f32.gmra.mrb[20].mxu0 %v6522_v33  ;;  %4257 = vmatprep.mubr.f32.mxu1 %v6726_v26  ;;  %v2986_v26 = vld [vmem:[#allocation2 + $0xf2] sm:$0xff] }
  0xfb   : > { %4601 = vmatprep.mubr.f32.mxu0 %v6525_v8  ;;  %4994 = vmatpush3.bf16.msra.mxu1 %v6724_v9  ;;  %v5273_v9 = vld [vmem:[#allocation2 + $0x180] sm:$0xff] }
  0xfc   : > { %4987 = vmatprep.subr.bf16.mxu1 %v6727_v58 }
  0xfd   : > { %4258 = vmatmul.mubr.f32.gmra.mrb[6].mxu1 %v6728_v4  ;;  %v2988_v4 = vld [vmem:[#allocation2 + $0x10a] sm:$0xff] }
  0xfe   : > { %4602 = vmatmul.mubr.f32.gmra.mrb[22].mxu0 %v6532_v1  ;;  %4260 = vmatprep.mubr.f32.mxu1 %v1447_v18  ;;  %v5274_v18 = vld [vmem:[#allocation2 + $0x188] sm:$0xff] }
  0xff   : > { %4604 = vmatprep.mubr.f32.mxu0 %v6535_v17  ;;  %4995 = vmatpush3.bf16.msra.mxu1 %v6727_v58  ;;  %v2987_v58 = vld [vmem:[#allocation2 + $0xfa] sm:$0xff] }
 0x100   : > { %4988 = vmatprep.subr.bf16.mxu1 %v6729_v2 }
 0x101   : > { %4261 = vmatmul.mubr.f32.gmra.mrb[8].mxu1 %v1448_v10  ;;  %v2989_v10 = vld [vmem:[#allocation2 + $0x112] sm:$0xff] }
 0x102   : > { %4605 = vmatmul.mubr.f32.gmra.mrb[24].mxu0 %v6541_v62  ;;  %4263 = vmatprep.mubr.f32.mxu1 %v1449_v27  ;;  %v2990_v27 = vld [vmem:[#allocation2 + $0x122] sm:$0xff] }
 0x103   : > { %4607 = vmatprep.mubr.f32.mxu0 %v6730_v5  ;;  %4996 = vmatpush3.bf16.msra.mxu1 %v6729_v2  ;;  %v2991_v2 = vld [vmem:[#allocation2 + $0x12a] sm:$0xff] }
 0x104   : > { %4989 = vmatprep.subr.bf16.mxu1 %v6731_v61  ;;  %v2999_v5 = vld [vmem:[#allocation2 + $0x18a] sm:$0xff] }
 0x105   : > { %4264 = vmatmul.mubr.f32.gmra.mrb[10].mxu1 %v1450_v37  ;;  %v2992_v37 = vld [vmem:[#allocation2 + $0x13a] sm:$0xff] }
 0x106   : > { %4608 = vmatmul.mubr.f32.gmra.mrb[26].mxu0 %v6732_v35  ;;  %4266 = vmatprep.mubr.f32.mxu1 %v1451_v0 }
 0x107   : > { %4610 = vmatprep.mubr.f32.mxu0 %v6548_v29  ;;  %4997 = vmatpush3.bf16.msra.mxu1 %v6731_v61 }
 0x108   : > { %4990 = vmatprep.subr.bf16.mxu1 %v6733_v15 }
 0x109   : > { %4267 = vmatmul.mubr.f32.gmra.mrb[12].mxu1 %v1452_v52 }
 0x10a   : > { %4611 = vmatmul.mubr.f32.gmra.mrb[28].mxu0 %v6553_v36  ;;  %4269 = vmatprep.mubr.f32.mxu1 %v1453_v22 }
 0x10b   : > { %4613 = vmatprep.mubr.f32.mxu0 %v2694_v28  ;;  %4998 = vmatpush3.bf16.msra.mxu1 %v6733_v15 }
 0x10c   : > { %4991 = vmatprep.subr.bf16.mxu1 %v6734_v41 }
 0x10d   : > { %4270 = vmatmul.mubr.f32.gmra.mrb[14].mxu1 %v1454_v55 }
 0x10e   : > { %4614 = vmatmul.mubr.f32.gmra.mrb[30].mxu0 %v2695_v60  ;;  %4272 = vmatprep.mubr.f32.mxu1 %v1455_v21 }
 0x10f   : > { %4648 = vmatprep.mubr.f32.mxu0 %v2970_v31  ;;  %4999 = vmatpush3.bf16.msra.mxu1 %v6734_v41 }
 0x111   : > { %4273 = vmatmul.mubr.f32.gmra.mrb[16].mxu1 %v1456_v50 }
 0x112   : > { %4649 = vmatmul.mubr.f32.vlgmr.msra.gmra.mrb[0].mxu0 %v2971_v47  ;;  %4275 = vmatprep.mubr.f32.mxu1 %v1457_v56  ;;  %v6581_v47 = vld [vmem:[%s6660_s4] ss:$0 sm:$0xff] }
 0x113   : > { %4651 = vmatprep.mubr.f32.mxu0 %v2972_v49 }
 0x115   : > { %4276 = vmatmul.mubr.f32.gmra.mrb[18].mxu1 %v1458_v6 }
 0x116   : > { %4652 = vmatmul.mubr.f32.gmra.mrb[2].mxu0 %v2973_v45  ;;  %4278 = vmatprep.mubr.f32.mxu1 %v1459_v63 }
 0x117   : > { %4654 = vmatprep.mubr.f32.mxu0 %v2974_v25 }
 0x119   : > { %4279 = vmatmul.mubr.f32.gmra.mrb[20].mxu1 %v1460_v44 }
 0x11a   : > { %4655 = vmatmul.mubr.f32.gmra.mrb[4].mxu0 %v2975_v39  ;;  %4281 = vmatprep.mubr.f32.mxu1 %v1461_v42 }
 0x11b   : > { %4657 = vmatprep.mubr.f32.mxu0 %v2976_v38 }
 0x11d   : > { %4282 = vmatmul.mubr.f32.gmra.mrb[22].mxu1 %v1462_v3 }
 0x11e   : > { %4658 = vmatmul.mubr.f32.gmra.mrb[6].mxu0 %v2977_v40  ;;  %4284 = vmatprep.mubr.f32.mxu1 %v1463_v12 }
 0x11f   : > { %4660 = vmatprep.mubr.f32.mxu0 %v2978_v46 }
 0x121   : > { %4285 = vmatmul.mubr.f32.gmra.mrb[24].mxu1 %v1464_v16 }
 0x122   : > { %4661 = vmatmul.mubr.f32.gmra.mrb[8].mxu0 %v2979_v53  ;;  %4287 = vmatprep.mubr.f32.mxu1 %v1465_v30 }
 0x123   : > { %4663 = vmatprep.mubr.f32.mxu0 %v2980_v20 }
 0x125   : > { %4288 = vmatmul.mubr.f32.gmra.mrb[26].mxu1 %v1466_v19 }
 0x126   : > { %4664 = vmatmul.mubr.f32.gmra.mrb[10].mxu0 %v2981_v14  ;;  %4290 = vmatprep.mubr.f32.mxu1 %v1467_v7 }
 0x127   : > { %4666 = vmatprep.mubr.f32.mxu0 %v2982_v32 }
 0x129   : > { %4291 = vmatmul.mubr.f32.gmra.mrb[28].mxu1 %v1468_v51 }
 0x12a   : > { %4667 = vmatmul.mubr.f32.gmra.mrb[12].mxu0 %v2983_v43  ;;  %4293 = vmatprep.mubr.f32.mxu1 %v5273_v9 }
 0x12b   : > { %4669 = vmatprep.mubr.f32.mxu0 %v2984_v24 }
 0x12d   : > { %4294 = vmatmul.mubr.f32.gmra.mrb[30].mxu1 %v5274_v18 }
 0x12e   : > { %4670 = vmatmul.mubr.f32.gmra.mrb[14].mxu0 %v2985_v59  ;;  %4352 = vmatprep.mubr.f32.mxu1 %v6493_v11  ;;  %v2993_v11 = vld [vmem:[#allocation2 + $0x142] sm:$0xff] }
 0x12f   : > { %4672 = vmatprep.mubr.f32.mxu0 %v2986_v26 }
 0x131   : > { %4353 = vmatmul.mubr.f32.vlgmr.msra.gmra.mrb[16].mxu1 %v6498_v13  ;;  %v2994_v13 = vld [vmem:[#allocation2 + $0x152] sm:$0xff] }
 0x132   : > { %4673 = vmatmul.mubr.f32.gmra.mrb[16].mxu0 %v2987_v58  ;;  %4355 = vmatprep.mubr.f32.mxu1 %v6500_v48  ;;  %v2995_v48 = vld [vmem:[#allocation2 + $0x15a] sm:$0xff] }
 0x133   : > { %4675 = vmatprep.mubr.f32.mxu0 %v2988_v4 }
 0x135   : > { %4356 = vmatmul.mubr.f32.gmra.mrb[18].mxu1 %v6505_v54  ;;  %v2996_v54 = vld [vmem:[#allocation2 + $0x16a] sm:$0xff] }
 0x136   : > { %4676 = vmatmul.mubr.f32.gmra.mrb[18].mxu0 %v2989_v10  ;;  %4358 = vmatprep.mubr.f32.mxu1 %v6507_v57  ;;  %v2997_v57 = vld [vmem:[#allocation2 + $0x172] sm:$0xff] }
 0x137   : > { %4678 = vmatprep.mubr.f32.mxu0 %v2990_v27 }
 0x139   : > { %4359 = vmatmul.mubr.f32.gmra.mrb[20].mxu1 %v6513_v34  ;;  %v1773_v34 = vld [vmem:[#allocation2 + $0x169] sm:$0xff] }
 0x13a   : > { %4679 = vmatmul.mubr.f32.gmra.mrb[20].mxu0 %v2991_v2  ;;  %4361 = vmatprep.mubr.f32.mxu1 %v6515_v23  ;;  %v2998_v23 = vld [vmem:[#allocation2 + $0x182] sm:$0xff] }
 0x13b   : > { %4681 = vmatprep.mubr.f32.mxu0 %v2992_v37 }
 0x13d   : > { %4362 = vmatmul.mubr.f32.gmra.mrb[22].mxu1 %v6522_v33  ;;  %v1774_v33 = vld [vmem:[#allocation2 + $0x171] sm:$0xff] }
 0x13e   : > { %4682 = vmatmul.mubr.f32.gmra.mrb[22].mxu0 %v2993_v11  ;;  %4364 = vmatprep.mubr.f32.mxu1 %v6525_v8  ;;  %v3000_v8 = vld [vmem:[#allocation2 + $0x19a] sm:$0xff] }
 0x13f   : > { %4684 = vmatprep.mubr.f32.mxu0 %v2994_v13 }
 0x141   : > { %4365 = vmatmul.mubr.f32.gmra.mrb[24].mxu1 %v6532_v1  ;;  %v3001_v1 = vld [vmem:[#allocation2 + $0x1a2] sm:$0xff] }
 0x142   : > { %4685 = vmatmul.mubr.f32.gmra.mrb[24].mxu0 %v2995_v48  ;;  %4367 = vmatprep.mubr.f32.mxu1 %v6535_v17 }
 0x143   : > { %4687 = vmatprep.mubr.f32.mxu0 %v2996_v54 }
 0x145   : > { %4368 = vmatmul.mubr.f32.gmra.mrb[26].mxu1 %v6541_v62 }
 0x146   : > { %4688 = vmatmul.mubr.f32.gmra.mrb[26].mxu0 %v2997_v57  ;;  %4370 = vmatprep.mubr.f32.mxu1 %v1773_v34 }
 0x147   : > { %4690 = vmatprep.mubr.f32.mxu0 %v2998_v23 }
 0x149   : > { %4371 = vmatmul.mubr.f32.gmra.mrb[28].mxu1 %v1774_v33 }
 0x14a   : > { %4691 = vmatmul.mubr.f32.gmra.mrb[28].mxu0 %v2999_v5  ;;  %4373 = vmatprep.mubr.f32.mxu1 %v6548_v29 }
 0x14b   : > { %4693 = vmatprep.mubr.f32.mxu0 %v3000_v8 }
 0x14d   : > { %4374 = vmatmul.mubr.f32.gmra.mrb[30].mxu1 %v6553_v36 }
 0x14e   : > { %4694 = vmatmul.mubr.f32.gmra.mrb[30].mxu0 %v3001_v1 }
 0x1c4   : > { %v4250_v17 = vpop.f32.mrb[0].mxu1 }
 0x1c5   : > { %v1554_v0 = vpop.f32.mrb[1].mxu1 }
 0x1c8   : > { %v4253_v61 = vpop.f32.mrb[2].mxu1 }
 0x1c9   : > { %v1564_v62 = vpop.f32.mrb[3].mxu1 }
 0x1cc   : > { %v4256_v35 = vpop.f32.mrb[4].mxu1 }
 0x1cd   : > { %v1574_v52 = vpop.f32.mrb[5].mxu1 }
 0x1d0   : > { %v4259_v22 = vpop.f32.mrb[6].mxu1 }
 0x1d1   : > { %v1584_v28 = vpop.f32.mrb[7].mxu1 }
 0x1d4   : > { %v4262_v15 = vpop.f32.mrb[8].mxu1 }
 0x1d5   : > { %v1594_v55 = vpop.f32.mrb[9].mxu1 }
 0x1d8   : > { %v4265_v60 = vpop.f32.mrb[10].mxu1 }
 0x1d9   : > { %v1604_v21 = vpop.f32.mrb[11].mxu1 }
 0x1dc   : > { %v4268_v31 = vpop.f32.mrb[12].mxu1 }
 0x1dd   : > { %v1614_v29 = vpop.f32.mrb[13].mxu1 }
 0x1e0   : > { %v4271_v41 = vpop.f32.mrb[14].mxu1 }
 0x1e1   : > { %v6575_v50 = vpop.f32.mrb[15].mxu1 }
 0x1e5   : > { %v4650_v36 = vpop.f32.mrb[0].mxu0 }
 0x1e6   : > { %v5000_v56 = vadd.f32 %v4650_v36, %v4250_v17  ;;  %v3085_v49 = vpop.f32.mrb[1].mxu0 }
 0x1e7   : > { %v5001_v6 = vadd.f32 %v3085_v49, %v1554_v0 }
 0x1e8   : > { %v3284_v45 = vadd.f32 %v5000_v56, %v6581_v47 }
 0x1e9   : > { %v3283_v63 = vadd.f32 %v5001_v6, %v6581_v47  ;;  %v4653_v25 = vpop.f32.mrb[2].mxu0 }
 0x1ea   : > { %3316 = vst [vmem:[%s6586_s27 + $0x8] sm:$0xff] %v3284_v45  ;;  %v5002_v44 = vadd.f32 %v4653_v25, %v4253_v61  ;;  %v3095_v39 = vpop.f32.mrb[3].mxu0 }
 0x1eb   : > { %3315 = vst [vmem:[%s6586_s27] sm:$0xff] %v3283_v63  ;;  %v5003_v42 = vadd.f32 %v3095_v39, %v1564_v62 }
 0x1ec   : > { %v3286_v38 = vadd.f32 %v5002_v44, %v6581_v47 }
 0x1ed   : > { %v3285_v3 = vadd.f32 %v5003_v42, %v6581_v47  ;;  %v4656_v40 = vpop.f32.mrb[4].mxu0 }
 0x1ee   : > { %3318 = vst [vmem:[%s6586_s27 + $0x18] sm:$0xff] %v3286_v38  ;;  %v5004_v12 = vadd.f32 %v4656_v40, %v4256_v35  ;;  %v3105_v46 = vpop.f32.mrb[5].mxu0 }
 0x1ef   : > { %3317 = vst [vmem:[%s6586_s27 + $0x10] sm:$0xff] %v3285_v3  ;;  %v5005_v16 = vadd.f32 %v3105_v46, %v1574_v52 }
 0x1f0   : > { %v3288_v53 = vadd.f32 %v5004_v12, %v6581_v47 }
 0x1f1   : > { %v3287_v30 = vadd.f32 %v5005_v16, %v6581_v47  ;;  %v4659_v20 = vpop.f32.mrb[6].mxu0 }
 0x1f2   : > { %3320 = vst [vmem:[%s6586_s27 + $0x28] sm:$0xff] %v3288_v53  ;;  %v5006_v19 = vadd.f32 %v4659_v20, %v4259_v22  ;;  %v3115_v14 = vpop.f32.mrb[7].mxu0 }
 0x1f3   : > { %3319 = vst [vmem:[%s6586_s27 + $0x20] sm:$0xff] %v3287_v30  ;;  %v5007_v7 = vadd.f32 %v3115_v14, %v1584_v28 }
 0x1f4   : > { %v3290_v32 = vadd.f32 %v5006_v19, %v6581_v47 }
 0x1f5   : > { %v3289_v51 = vadd.f32 %v5007_v7, %v6581_v47  ;;  %v4662_v43 = vpop.f32.mrb[8].mxu0 }
 0x1f6   : > { %3322 = vst [vmem:[%s6586_s27 + $0x38] sm:$0xff] %v3290_v32  ;;  %v5008_v24 = vadd.f32 %v4662_v43, %v4262_v15  ;;  %v3125_v9 = vpop.f32.mrb[9].mxu0 }
 0x1f7   : > { %3321 = vst [vmem:[%s6586_s27 + $0x30] sm:$0xff] %v3289_v51  ;;  %v5009_v59 = vadd.f32 %v3125_v9, %v1594_v55 }
 0x1f8   : > { %v3292_v26 = vadd.f32 %v5008_v24, %v6581_v47 }
 0x1f9   : > { %v3291_v18 = vadd.f32 %v5009_v59, %v6581_v47  ;;  %v4665_v58 = vpop.f32.mrb[10].mxu0 }
 0x1fa   : > { %3324 = vst [vmem:[%s6586_s27 + $0x48] sm:$0xff] %v3292_v26  ;;  %v5010_v4 = vadd.f32 %v4665_v58, %v4265_v60  ;;  %v3135_v10 = vpop.f32.mrb[11].mxu0 }
 0x1fb   : > { %3323 = vst [vmem:[%s6586_s27 + $0x40] sm:$0xff] %v3291_v18  ;;  %v5011_v27 = vadd.f32 %v3135_v10, %v1604_v21 }
 0x1fc   : > { %v3294_v2 = vadd.f32 %v5010_v4, %v6581_v47 }
 0x1fd   : > { %v3293_v37 = vadd.f32 %v5011_v27, %v6581_v47  ;;  %v4668_v11 = vpop.f32.mrb[12].mxu0 }
 0x1fe   : > { %3326 = vst [vmem:[%s6586_s27 + $0x58] sm:$0xff] %v3294_v2  ;;  %v5012_v13 = vadd.f32 %v4668_v11, %v4268_v31  ;;  %v3145_v48 = vpop.f32.mrb[13].mxu0 }
 0x1ff   : > { %3325 = vst [vmem:[%s6586_s27 + $0x50] sm:$0xff] %v3293_v37  ;;  %v5013_v54 = vadd.f32 %v3145_v48, %v1614_v29 }
 0x200   : > { %v3296_v57 = vadd.f32 %v5012_v13, %v6581_v47 }
 0x201   : > { %v3295_v34 = vadd.f32 %v5013_v54, %v6581_v47  ;;  %v4671_v23 = vpop.f32.mrb[14].mxu0 }
 0x202   : > { %3328 = vst [vmem:[%s6586_s27 + $0x68] sm:$0xff] %v3296_v57  ;;  %v5014_v33 = vadd.f32 %v4671_v23, %v4271_v41  ;;  %v3155_v5 = vpop.f32.mrb[15].mxu0 }
 0x203   : > { %3327 = vst [vmem:[%s6586_s27 + $0x60] sm:$0xff] %v3295_v34  ;;  %v5015_v8 = vadd.f32 %v3155_v5, %v6575_v50 }
 0x204   : > { %v3298_v1 = vadd.f32 %v5014_v33, %v6581_v47  ;;  %v4354_v17 = vpop.f32.mrb[16].mxu1 }
 0x205   : > { %v3297_v0 = vadd.f32 %v5015_v8, %v6581_v47  ;;  %v4674_v61 = vpop.f32.mrb[16].mxu0  ;;  %v1940_v62 = vpop.f32.mrb[17].mxu1 }
 0x206   : > { %3330 = vst [vmem:[%s6586_s27 + $0x78] sm:$0xff] %v3298_v1  ;;  %v5016_v35 = vadd.f32 %v4674_v61, %v4354_v17  ;;  %v3165_v52 = vpop.f32.mrb[17].mxu0 }
 0x207   : > { %3329 = vst [vmem:[%s6586_s27 + $0x70] sm:$0xff] %v3297_v0  ;;  %v5017_v22 = vadd.f32 %v3165_v52, %v1940_v62 }
 0x208   : > { %v3300_v28 = vadd.f32 %v5016_v35, %v6581_v47  ;;  %v4357_v15 = vpop.f32.mrb[18].mxu1 }
 0x209   : > { %v3299_v55 = vadd.f32 %v5017_v22, %v6581_v47  ;;  %v4677_v60 = vpop.f32.mrb[18].mxu0  ;;  %v1950_v21 = vpop.f32.mrb[19].mxu1 }
 0x20a   : > { %3332 = vst [vmem:[%s6586_s27 + $0x88] sm:$0xff] %v3300_v28  ;;  %v5018_v31 = vadd.f32 %v4677_v60, %v4357_v15  ;;  %v3175_v29 = vpop.f32.mrb[19].mxu0 }
 0x20b   : > { %3331 = vst [vmem:[%s6586_s27 + $0x80] sm:$0xff] %v3299_v55  ;;  %v5019_v41 = vadd.f32 %v3175_v29, %v1950_v21 }
 0x20c   : > { %v3302_v50 = vadd.f32 %v5018_v31, %v6581_v47  ;;  %v4360_v36 = vpop.f32.mrb[20].mxu1 }
 0x20d   : > { %v3301_v56 = vadd.f32 %v5019_v41, %v6581_v47  ;;  %v4680_v49 = vpop.f32.mrb[20].mxu0  ;;  %v1960_v6 = vpop.f32.mrb[21].mxu1 }
 0x20e   : > { %3334 = vst [vmem:[%s6586_s27 + $0x98] sm:$0xff] %v3302_v50  ;;  %v5020_v45 = vadd.f32 %v4680_v49, %v4360_v36  ;;  %v3185_v63 = vpop.f32.mrb[21].mxu0 }
 0x20f   : > { %3333 = vst [vmem:[%s6586_s27 + $0x90] sm:$0xff] %v3301_v56  ;;  %v5021_v25 = vadd.f32 %v3185_v63, %v1960_v6 }
 0x210   : > { %v3304_v44 = vadd.f32 %v5020_v45, %v6581_v47  ;;  %v4363_v39 = vpop.f32.mrb[22].mxu1 }
 0x211   : > { %v3303_v42 = vadd.f32 %v5021_v25, %v6581_v47  ;;  %v4683_v38 = vpop.f32.mrb[22].mxu0  ;;  %v1970_v3 = vpop.f32.mrb[23].mxu1 }
 0x212   : > { %3336 = vst [vmem:[%s6586_s27 + $0xa8] sm:$0xff] %v3304_v44  ;;  %v5022_v40 = vadd.f32 %v4683_v38, %v4363_v39  ;;  %v3195_v12 = vpop.f32.mrb[23].mxu0 }
 0x213   : > { %3335 = vst [vmem:[%s6586_s27 + $0xa0] sm:$0xff] %v3303_v42  ;;  %v5023_v46 = vadd.f32 %v3195_v12, %v1970_v3 }
 0x214   : > { %v3306_v16 = vadd.f32 %v5022_v40, %v6581_v47  ;;  %v4366_v53 = vpop.f32.mrb[24].mxu1 }
 0x215   : > { %v3305_v30 = vadd.f32 %v5023_v46, %v6581_v47  ;;  %v4686_v20 = vpop.f32.mrb[24].mxu0  ;;  %v1980_v19 = vpop.f32.mrb[25].mxu1 }
 0x216   : > { %3338 = vst [vmem:[%s6586_s27 + $0xb8] sm:$0xff] %v3306_v16  ;;  %v5024_v14 = vadd.f32 %v4686_v20, %v4366_v53  ;;  %v3205_v7 = vpop.f32.mrb[25].mxu0 }
 0x217   : > { %3337 = vst [vmem:[%s6586_s27 + $0xb0] sm:$0xff] %v3305_v30  ;;  %v5025_v32 = vadd.f32 %v3205_v7, %v1980_v19 }
 0x218   : > { %v3308_v51 = vadd.f32 %v5024_v14, %v6581_v47  ;;  %v4369_v43 = vpop.f32.mrb[26].mxu1 }
 0x219   : > { %v3307_v24 = vadd.f32 %v5025_v32, %v6581_v47  ;;  %v4689_v9 = vpop.f32.mrb[26].mxu0  ;;  %v1990_v59 = vpop.f32.mrb[27].mxu1 }
 0x21a   : > { %3340 = vst [vmem:[%s6586_s27 + $0xc8] sm:$0xff] %v3308_v51  ;;  %v5026_v26 = vadd.f32 %v4689_v9, %v4369_v43  ;;  %v3215_v18 = vpop.f32.mrb[27].mxu0 }
 0x21b   : > { %3339 = vst [vmem:[%s6586_s27 + $0xc0] sm:$0xff] %v3307_v24  ;;  %v5027_v58 = vadd.f32 %v3215_v18, %v1990_v59 }
 0x21c   : > { %v3310_v4 = vadd.f32 %v5026_v26, %v6581_v47  ;;  %v4372_v10 = vpop.f32.mrb[28].mxu1 }
 0x21d   : > { %v3309_v27 = vadd.f32 %v5027_v58, %v6581_v47  ;;  %v4692_v2 = vpop.f32.mrb[28].mxu0  ;;  %v2000_v37 = vpop.f32.mrb[29].mxu1 }
 0x21e   : > { %3342 = vst [vmem:[%s6586_s27 + $0xd8] sm:$0xff] %v3310_v4  ;;  %v5028_v11 = vadd.f32 %v4692_v2, %v4372_v10  ;;  %v3225_v13 = vpop.f32.mrb[29].mxu0 }
 0x21f   : > { %3341 = vst [vmem:[%s6586_s27 + $0xd0] sm:$0xff] %v3309_v27  ;;  %v5029_v48 = vadd.f32 %v3225_v13, %v2000_v37 }
 0x220   : > { %v3312_v54 = vadd.f32 %v5028_v11, %v6581_v47  ;;  %v4375_v57 = vpop.f32.mrb[30].mxu1 }
 0x221   : > { %v3311_v34 = vadd.f32 %v5029_v48, %v6581_v47  ;;  %v4695_v23 = vpop.f32.mrb[30].mxu0  ;;  %v2010_v33 = vpop.f32.mrb[31].mxu1 }
 0x222   : > { %3344 = vst [vmem:[%s6586_s27 + $0xe8] sm:$0xff] %v3312_v54  ;;  %v5030_v5 = vadd.f32 %v4695_v23, %v4375_v57  ;;  %v3235_v8 = vpop.f32.mrb[31].mxu0 }
 0x223   : > { %3343 = vst [vmem:[%s6586_s27 + $0xe0] sm:$0xff] %v3311_v34  ;;  %v5031_v1 = vadd.f32 %v3235_v8, %v2010_v33 }
 0x224   : > { %v3314_v17 = vadd.f32 %v5030_v5, %v6581_v47 }
 0x225   : > { %v3313_v0 = vadd.f32 %v5031_v1, %v6581_v47 }
 0x226   : > { %3346 = vst [vmem:[%s6586_s27 + $0xf8] sm:$0xff] %v3314_v17 }
 0x227   : > { %3345 = vst [vmem:[%s6586_s27 + $0xf0] sm:$0xff] %v3313_v0 }
 0x228 PF: > { %s15_s18 = sadd.s32 1, %s5306_s18  }
 0x229   : > { %p12_p4 = scmp.ge.s32.totalorder %s15_s18, 4  }
 0x22b   :  { %14 = sbr.rel (!%p12_p4) target bundleno = 1 (0x1), region = 80 }

</bundles_post_ra>
